<compile_context>
chip_gen: v7x
topology: tpu7x:2x2x1
jax: 0.10.0
libtpu: 0.0.40
codegen_flags: <defaults>
</compile_context>

<pallas_src>
import math
from functools import partial

import jax
import jax.numpy as jnp
from jax import lax
from jax.experimental import pallas as pl
from jax.experimental.pallas import tpu as pltpu


# ------------------------------ hw / tiling helpers -------------------------

_VMEM_LIMIT = None


def _vmem_limit_bytes():
    """~3/4 of physical VMEM (<=96 MiB). 48 MiB on v7x, 96 MiB on v5e/v6e."""
    global _VMEM_LIMIT
    if _VMEM_LIMIT is None:
        cap = 128 * 1024 * 1024
        try:
            cap = int(getattr(pltpu.get_tpu_info(), "vmem_capacity_bytes", cap))
        except Exception:
            pass
        _VMEM_LIMIT = int(min(cap * 3 // 4, 96 * 1024 * 1024))
    return _VMEM_LIMIT


def _round_up(x, m):
    return ((x + m - 1) // m) * m


def _pick_tile(dim, target, align):
    """Return (tile, padded_dim): tile divides padded_dim, lane/sublane legal."""
    if dim <= target:
        if dim % align == 0:
            return dim, dim
        p = _round_up(dim, align)       # sub-128 N would mean masked stores:
        return p, p                     # pad up to a single aligned tile
    t = target
    floor = max(align, 128)
    while t >= floor:
        padded = _round_up(dim, t)
        if padded - dim <= max(dim // 8, 1):     # accept <=12.5% padding waste
            return t, padded
        t //= 2
    return floor, _round_up(dim, floor)


# ------------------------------ matmul kernel -------------------------------

def _matmul_kernel(*refs, act, has_bias, has_res, has_ln, eps):
    idx = 0
    x_ref = refs[idx]; idx += 1
    w_ref = refs[idx]; idx += 1
    g_ref = beta_ref = None
    if has_ln:
        g_ref = refs[idx]; idx += 1
        beta_ref = refs[idx]; idx += 1
    b_ref = None
    if has_bias:
        b_ref = refs[idx]; idx += 1
    r_ref = None
    if has_res:
        r_ref = refs[idx]; idx += 1
    o_ref = refs[idx]
    acc_ref = refs[idx + 1]

    @pl.when(pl.program_id(2) == 0)
    def _():
        acc_ref[...] = jnp.zeros_like(acc_ref)

    x = x_ref[...]
    if has_ln:
        # fused LayerNorm prologue (valid only when the block spans full K)
        xf = x.astype(jnp.float32)
        mean = jnp.mean(xf, axis=-1, keepdims=True)
        var = jnp.mean(jnp.square(xf - mean), axis=-1, keepdims=True)
        xf = (xf - mean) * lax.rsqrt(var + jnp.float32(eps))
        xf = xf * g_ref[...] + beta_ref[...]
        x = xf.astype(w_ref.dtype)
    acc_ref[...] += jnp.dot(x, w_ref[...], preferred_element_type=jnp.float32)

    @pl.when(pl.program_id(2) == pl.num_programs(2) - 1)
    def _():
        y = acc_ref[...]
        if has_bias:
            y = y + b_ref[...]
        if act == "gelu":
            # exact erf-based GELU (torch.nn.functional.gelu default)
            y = 0.5 * y * (1.0 + lax.erf(y * jnp.float32(1.0 / math.sqrt(2.0))))
        if has_res:
            y = y + r_ref[...].astype(jnp.float32)
        o_ref[...] = y.astype(o_ref.dtype)


def linear(x, w, b=None, act=None, residual=None, ln=None, out_dtype=None,
           tm_target=512, tn_target=1024, tk_target=4096):
    """y = (LN?)(x) @ w (+ b) (gelu) (+ residual);  w is [K, N]."""
    M, K = x.shape
    K2, N = w.shape
    assert K == K2
    out_dtype = out_dtype if out_dtype is not None else x.dtype

    tm, Mp = _pick_tile(M, tm_target, 8)
    tn, Np = _pick_tile(N, tn_target, 128)
    tk, Kp = _pick_tile(K, tk_target, 128)

    # LN can only be fused when each step sees the whole (unpadded) row of x.
    if ln is not None and (tk != K or Kp != K):
        g, bb, eps_ = ln
        x = layernorm(x, g, bb, eps_)
        ln = None

    # TODO(synk): pre-pad unaligned weights (e.g. GPT-2 vocab=50304) once at
    # init instead of the per-call jnp.pad below (no-op for aligned shapes).
    xp = x if (Mp == M and Kp == K) else jnp.pad(x, ((0, Mp - M), (0, Kp - K)))
    wp = w if (Kp == K and Np == N) else jnp.pad(w, ((0, Kp - K), (0, Np - N)))

    in_specs = [pl.BlockSpec((tm, tk), lambda i, j, kk: (i, kk)),
                pl.BlockSpec((tk, tn), lambda i, j, kk: (kk, j))]
    args = [xp, wp]
    ln_eps = 0.0
    if ln is not None:
        g, bb, ln_eps = ln
        in_specs.append(pl.BlockSpec((1, tk), lambda i, j, kk: (0, kk)))
        in_specs.append(pl.BlockSpec((1, tk), lambda i, j, kk: (0, kk)))
        args.append(g.reshape(1, K).astype(jnp.float32))
        args.append(bb.reshape(1, K).astype(jnp.float32))
    if b is not None:
        bp = b if Np == N else jnp.pad(b, (0, Np - N))
        in_specs.append(pl.BlockSpec((1, tn), lambda i, j, kk: (0, j)))
        args.append(bp.reshape(1, Np).astype(jnp.float32))
    if residual is not None:
        rp = residual if (Mp == M and Np == N) else jnp.pad(
            residual, ((0, Mp - M), (0, Np - N)))
        in_specs.append(pl.BlockSpec((tm, tn), lambda i, j, kk: (i, j)))
        args.append(rp)

    out = pl.pallas_call(
        partial(_matmul_kernel, act=act, has_bias=b is not None,
                has_res=residual is not None, has_ln=ln is not None,
                eps=ln_eps),
        out_shape=jax.ShapeDtypeStruct((Mp, Np), out_dtype),
        grid_spec=pltpu.PrefetchScalarGridSpec(
            num_scalar_prefetch=0,
            grid=(Mp // tm, Np // tn, Kp // tk),
            in_specs=in_specs,
            out_specs=pl.BlockSpec((tm, tn), lambda i, j, kk: (i, j)),
            scratch_shapes=[pltpu.VMEM((tm, tn), jnp.float32)]),
        compiler_params=pltpu.CompilerParams(
            dimension_semantics=("parallel", "parallel", "arbitrary"),
            vmem_limit_bytes=_vmem_limit_bytes()),
    )(*args)
    if Mp != M or Np != N:
        out = out[:M, :N]
    return out


# ----------------------------- layernorm kernel ------------------------------
# Standalone fallback, only used when LN cannot be fused into the next matmul.

def _ln_kernel(x_ref, g_ref, b_ref, o_ref, *, eps):
    x = x_ref[...].astype(jnp.float32)
    mean = jnp.mean(x, axis=-1, keepdims=True)
    var = jnp.mean(jnp.square(x - mean), axis=-1, keepdims=True)
    y = (x - mean) * lax.rsqrt(var + jnp.float32(eps))
    o_ref[...] = (y * g_ref[...] + b_ref[...]).astype(o_ref.dtype)


def layernorm(x, gamma, beta, eps):
    M, D = x.shape
    tm, Mp = _pick_tile(M, 512, 8)
    xp = x if Mp == M else jnp.pad(x, ((0, Mp - M), (0, 0)))
    out = pl.pallas_call(
        partial(_ln_kernel, eps=eps),
        out_shape=jax.ShapeDtypeStruct((Mp, D), x.dtype),
        grid=(Mp // tm,),
        in_specs=[pl.BlockSpec((tm, D), lambda i: (i, 0)),
                  pl.BlockSpec((1, D), lambda i: (0, 0)),
                  pl.BlockSpec((1, D), lambda i: (0, 0))],
        out_specs=pl.BlockSpec((tm, D), lambda i: (i, 0)),
        compiler_params=pltpu.CompilerParams(
            dimension_semantics=("parallel",)),
    )(xp, gamma.reshape(1, D).astype(jnp.float32),
      beta.reshape(1, D).astype(jnp.float32))
    return out[:M] if Mp != M else out


# ---------------------- flash-style causal attention -------------------------

def _attn_kernel(q_ref, k_ref, v_ref, o_ref, m_sc, l_sc, acc_sc,
                 *, scale, tq, tk, num_heads, head_dim):
    qi = pl.program_id(1)
    ki = pl.program_id(2)

    @pl.when(ki == 0)
    def _():
        m_sc[...] = jnp.full_like(m_sc, -jnp.inf)
        l_sc[...] = jnp.zeros_like(l_sc)
        acc_sc[...] = jnp.zeros_like(acc_sc)

    # Fully-masked future KV tiles are skipped (their DMA is also elided via
    # the clamped index_map in the wrapper).  tq == tk, so masked <=> ki > qi.
    @pl.when(ki <= qi)
    def _():
        row = qi * tq + lax.broadcasted_iota(jnp.int32, (tq, tk), 0)
        col = ki * tk + lax.broadcasted_iota(jnp.int32, (tq, tk), 1)
        keep = col <= row
        for h in range(num_heads):
            sl = pl.ds(h * head_dim, head_dim)
            q = q_ref[0, :, sl]                       # [tq, Dh], native (bf16)
            k = k_ref[0, :, sl]                       # [tk, Dh]
            v = v_ref[0, :, sl]                       # [tk, Dh]
            s = lax.dot_general(q, k, (((1,), (1,)), ((), ())),
                                preferred_element_type=jnp.float32)
            # torch order: scores / sqrt(Dh) (f32), then causal -10000 fill
            s = s * jnp.float32(scale)
            s = jnp.where(keep, s, jnp.float32(-10000.0))

            m_prev = m_sc[h]                                        # [tq, 1]
            m_new = jnp.maximum(m_prev, jnp.max(s, axis=-1, keepdims=True))
            alpha = jnp.exp(m_prev - m_new)
            p = jnp.exp(s - m_new)
            l_sc[h] = alpha * l_sc[h] + jnp.sum(p, axis=-1, keepdims=True)
            acc_sc[h] = alpha * acc_sc[h] + jnp.dot(
                p.astype(v.dtype), v, preferred_element_type=jnp.float32)
            m_sc[h] = m_new

    @pl.when(ki == pl.num_programs(2) - 1)
    def _():
        outs = []
        for h in range(num_heads):
            inv = pl.reciprocal(l_sc[h], approx=True)
            outs.append(acc_sc[h] * inv)
        out_cols = jnp.concatenate(outs, axis=-1)          # [tq, H*Dh] f32
        pad_w = o_ref.shape[-1] - out_cols.shape[-1]
        if pad_w:
            out_cols = jnp.concatenate(
                [out_cols, jnp.zeros((out_cols.shape[0], pad_w),
                                     out_cols.dtype)], axis=-1)
        o_ref[0] = out_cols.astype(o_ref.dtype)


def _attn_tile(seq_len):
    """KV/Q tile: 256 on 256-wide MXU gens (v6e/v7x), 128 on v5e."""
    pref = 128
    try:
        name = str(pltpu.get_tpu_info()).lower()
        if ("v6" in name) or ("v7" in name):
            pref = 256
    except Exception:
        pass
    t = pref
    while t > 8 and seq_len % t != 0:
        t //= 2
    return t if seq_len % t == 0 else seq_len


def causal_attention(qkv, num_heads, head_dim):
    """qkv: [B, S, 3D] (fused Q|K|V along last dim) -> context [B, S, D]."""
    B, S, threeD = qkv.shape
    D = threeD // 3
    # TODO(synk): sequences whose length is not a tile multiple fall back to a
    # single full-S KV tile; pad S for very long, non-aligned sequences.
    tq = _attn_tile(S)
    tk = tq
    scale = 1.0 / math.sqrt(head_dim)

    if D % 128 == 0:
        # Read Q / K / V as three lane-block views of the same [B,S,3D] array.
        args = (qkv, qkv, qkv)
        Dp = D
        q_spec = pl.BlockSpec((1, tq, D), lambda b, qi, ki: (b, qi, 0))
        # clamp -> masked-future steps map to the already-resident block, so
        # Pallas elides the K/V DMA (compute skip handled in-kernel).
        k_spec = pl.BlockSpec((1, tk, D),
                              lambda b, qi, ki: (b, jnp.minimum(ki, qi), 1))
        v_spec = pl.BlockSpec((1, tk, D),
                              lambda b, qi, ki: (b, jnp.minimum(ki, qi), 2))
    else:
        # Unaligned D: split + lane-pad once in the wrapper.
        Dp = _round_up(D, 128)
        pad = ((0, 0), (0, 0), (0, Dp - D))
        args = (jnp.pad(qkv[:, :, 0 * D:1 * D], pad),
                jnp.pad(qkv[:, :, 1 * D:2 * D], pad),
                jnp.pad(qkv[:, :, 2 * D:3 * D], pad))
        q_spec = pl.BlockSpec((1, tq, Dp), lambda b, qi, ki: (b, qi, 0))
        k_spec = pl.BlockSpec((1, tk, Dp),
                              lambda b, qi, ki: (b, jnp.minimum(ki, qi), 0))
        v_spec = pl.BlockSpec((1, tk, Dp),
                              lambda b, qi, ki: (b, jnp.minimum(ki, qi), 0))

    out = pl.pallas_call(
        partial(_attn_kernel, scale=scale, tq=tq, tk=tk,
                num_heads=num_heads, head_dim=head_dim),
        out_shape=jax.ShapeDtypeStruct((B, S, Dp), qkv.dtype),
        grid_spec=pltpu.PrefetchScalarGridSpec(
            num_scalar_prefetch=0,
            grid=(B, S // tq, S // tk),
            in_specs=[q_spec, k_spec, v_spec],
            out_specs=pl.BlockSpec((1, tq, Dp), lambda b, qi, ki: (b, qi, 0)),
            scratch_shapes=[pltpu.VMEM((num_heads, tq, 1), jnp.float32),
                            pltpu.VMEM((num_heads, tq, 1), jnp.float32),
                            pltpu.VMEM((num_heads, tq, head_dim), jnp.float32)]),
        compiler_params=pltpu.CompilerParams(
            dimension_semantics=("parallel", "parallel", "arbitrary"),
            vmem_limit_bytes=_vmem_limit_bytes()),
    )(*args)
    return out[:, :, :D] if Dp != D else out


# --------------------------- parameters / forward ---------------------------

def init_params(key, *, vocab_size, max_pos, dim, num_heads, depth, mlp_ratio,
                param_dtype=jnp.bfloat16):
    inter = int(dim * mlp_ratio)
    keys = list(jax.random.split(key, 2 + 4 * depth))
    ki = iter(keys)

    def nrm(k, shape):
        return (0.02 * jax.random.normal(k, shape, jnp.float32)).astype(param_dtype)

    wte = nrm(next(ki), (vocab_size, dim))
    params = {
        "wte": wte,
        "wte_T": wte.T,                       # tied LM head, transposed once
        "wpe": nrm(next(ki), (max_pos, dim)),
        "lnf_g": jnp.ones((dim,), jnp.float32),
        "lnf_b": jnp.zeros((dim,), jnp.float32),
        "blocks": [],
    }
    for _ in range(depth):
        blk = {
            "ln1_g": jnp.ones((dim,), jnp.float32),
            "ln1_b": jnp.zeros((dim,), jnp.float32),
            # fused QKV projection: [D, 3D] weight, [3D] bias
            "wqkv": nrm(next(ki), (dim, 3 * dim)),
            "bqkv": jnp.zeros((3 * dim,), jnp.float32),
            "wo": nrm(next(ki), (dim, dim)),
            "bo": jnp.zeros((dim,), jnp.float32),
            "ln2_g": jnp.ones((dim,), jnp.float32),
            "ln2_b": jnp.zeros((dim,), jnp.float32),
            "w1": nrm(next(ki), (dim, inter)),
            "b1": jnp.zeros((inter,), jnp.float32),
            "w2": nrm(next(ki), (inter, dim)),
            "b2": jnp.zeros((dim,), jnp.float32),
        }
        params["blocks"].append(blk)
    return params


def gpt1d_forward(params, input_ids, *, num_heads, eps=1e-5):
    B, S = input_ids.shape
    vocab, D = params["wte"].shape
    H = num_heads
    Dh = D // H

    # GPTEmbedding1D: word + position embedding (gathers = glue, plain JAX)
    x = params["wte"][input_ids] + params["wpe"][jnp.arange(S)][None, :, :]
    x2 = x.reshape(B * S, D)                                 # bf16

    for blk in params["blocks"]:
        # pre-LN attention (apply_post_layernorm=False); LN1 fused into QKV
        qkv = linear(x2, blk["wqkv"], blk["bqkv"],
                     ln=(blk["ln1_g"], blk["ln1_b"], eps))   # [B*S, 3D]
        ctx = causal_attention(qkv.reshape(B, S, 3 * D), H, Dh)   # [B, S, D]
        ctx = ctx.reshape(B * S, D)
        # output projection with fused residual add
        x2 = linear(ctx, blk["wo"], blk["bo"], residual=x2)

        # pre-LN MLP (LN2 fused into fc1) with exact GELU; residual fused
        m = linear(x2, blk["w1"], blk["b1"], act="gelu",
                   ln=(blk["ln2_g"], blk["ln2_b"], eps))
        x2 = linear(m, blk["w2"], blk["b2"], residual=x2)

    # final norm fused into the tied LM head (Classifier1D, bias=False)
    logits = linear(x2, params["wte_T"],
                    ln=(params["lnf_g"], params["lnf_b"], eps),
                    out_dtype=jnp.float32)
    return logits.reshape(B, S, vocab)


# ---------------------------------- main ------------------------------------

if __name__ == "__main__":
    VOCAB = 512
    MAX_POS = 64
    DIM = 128
    HEADS = 4
    DEPTH = 2
    MLP_RATIO = 4.0
    B, S = 2, 16

    key = jax.random.PRNGKey(0)
    k_param, k_ids = jax.random.split(key)
    params = init_params(k_param, vocab_size=VOCAB, max_pos=MAX_POS, dim=DIM,
                         num_heads=HEADS, depth=DEPTH, mlp_ratio=MLP_RATIO)
    input_ids = jax.random.randint(k_ids, (B, S), 0, VOCAB, dtype=jnp.int32)

    # TODO(synk): attention_mask handling (pad mask -> additive -10000 bias) is
    # supported by the PyTorch module but not exercised here (mask=None path).
    fwd = jax.jit(partial(gpt1d_forward, num_heads=HEADS))
    logits = fwd(params, input_ids)
    jax.block_until_ready(logits)
    assert logits.shape == (B, S, VOCAB)
    print("KERNEL_OK")
</pallas_src>

<mosaic_0001>
module attributes {stable_mosaic.version = 11 : i64} {
  func.func @_matmul_kernel(%arg0: i32, %arg1: i32, %arg2: i32, %arg3: memref<32x128xbf16, #tpu.memory_space<vmem>>, %arg4: memref<128x128xbf16, #tpu.memory_space<vmem>>, %arg5: memref<1x128xf32, #tpu.memory_space<vmem>>, %arg6: memref<32x128xbf16, #tpu.memory_space<vmem>>, %arg7: memref<32x128xbf16, #tpu.memory_space<vmem>>, %arg8: memref<32x128xf32, #tpu.memory_space<vmem>>) attributes {dimension_semantics = [#tpu.dimension_semantics<parallel>, #tpu.dimension_semantics<parallel>, #tpu.dimension_semantics<arbitrary>], iteration_bounds = array<i64: 1, 1, 1>, scalar_prefetch = 0 : i64, scratch_operands = 1 : i64, tpu.core_type = #tpu.core_type<tc>, window_params = [{transform_indices = @transform_0, window_bounds = array<i64: 32, 128>}, {transform_indices = @transform_1, window_bounds = array<i64: 128, 128>}, {transform_indices = @transform_2, window_bounds = array<i64: 1, 128>}, {transform_indices = @transform_3, window_bounds = array<i64: 32, 128>}, {transform_indices = @transform_4, window_bounds = array<i64: 32, 128>}]} {
    %c0_i32 = arith.constant 0 : i32
    %0 = arith.cmpi eq, %arg2, %c0_i32 : i32
    %1 = arith.extui %0 : i1 to i32
    %c0_i32_0 = arith.constant 0 : i32
    %2 = arith.cmpi ne, %1, %c0_i32_0 : i32
    scf.if %2 {
      %cst_10 = arith.constant 0.000000e+00 : f32
      %12 = vector.broadcast %cst_10 : f32 to vector<32x128xf32>
      %c0_11 = arith.constant 0 : index
      %c0_12 = arith.constant 0 : index
      %13 = vector.load %arg8[%c0_11, %c0_12] : memref<32x128xf32, #tpu.memory_space<vmem>>, vector<32x128xf32>
      tpu.vector_store %arg8[%c0_11, %c0_12], %12 {strides = array<i32>} : memref<32x128xf32, #tpu.memory_space<vmem>>, vector<32x128xf32>,
    } else {
    }
    %c0 = arith.constant 0 : index
    %c0_1 = arith.constant 0 : index
    %3 = vector.load %arg3[%c0, %c0_1] : memref<32x128xbf16, #tpu.memory_space<vmem>>, vector<32x128xbf16>
    %c0_2 = arith.constant 0 : index
    %c0_3 = arith.constant 0 : index
    %4 = vector.load %arg8[%c0_2, %c0_3] : memref<32x128xf32, #tpu.memory_space<vmem>>, vector<32x128xf32>
    %c0_4 = arith.constant 0 : index
    %c0_5 = arith.constant 0 : index
    %5 = vector.load %arg4[%c0_4, %c0_5] : memref<128x128xbf16, #tpu.memory_space<vmem>>, vector<128x128xbf16>
    %cst = arith.constant dense<0.000000e+00> : vector<32x128xf32>
    %6 = tpu.matmul %3, %5, %cst {dimension_numbers = #tpu.dot_dimension_numbers<[1], [0], [0], [1], [0, 0, 1, 1], [], []>} : vector<32x128xbf16>, vector<128x128xbf16>, vector<32x128xf32> -> vector<32x128xf32>
    %7 = arith.addf %4, %6 : vector<32x128xf32>
    %c0_6 = arith.constant 0 : index
    %c0_7 = arith.constant 0 : index
    %8 = vector.load %arg8[%c0_6, %c0_7] : memref<32x128xf32, #tpu.memory_space<vmem>>, vector<32x128xf32>
    tpu.vector_store %arg8[%c0_6, %c0_7], %7 {strides = array<i32>} : memref<32x128xf32, #tpu.memory_space<vmem>>, vector<32x128xf32>,
    %c0_i32_8 = arith.constant 0 : i32
    %9 = arith.cmpi eq, %arg2, %c0_i32_8 : i32
    %10 = arith.extui %9 : i1 to i32
    %c0_i32_9 = arith.constant 0 : i32
    %11 = arith.cmpi ne, %10, %c0_i32_9 : i32
    scf.if %11 {
      %c0_10 = arith.constant 0 : index
      %c0_11 = arith.constant 0 : index
      %12 = vector.load %arg8[%c0_10, %c0_11] : memref<32x128xf32, #tpu.memory_space<vmem>>, vector<32x128xf32>
      %c0_12 = arith.constant 0 : index
      %c0_13 = arith.constant 0 : index
      %13 = vector.load %arg5[%c0_12, %c0_13] : memref<1x128xf32, #tpu.memory_space<vmem>>, vector<1x128xf32>
      %14 = vector.broadcast %13 : vector<1x128xf32> to vector<32x128xf32>
      %15 = arith.addf %12, %14 : vector<32x128xf32>
      %c0_14 = arith.constant 0 : index
      %c0_15 = arith.constant 0 : index
      %16 = vector.load %arg6[%c0_14, %c0_15] : memref<32x128xbf16, #tpu.memory_space<vmem>>, vector<32x128xbf16>
      %17 = arith.extf %16 : vector<32x128xbf16> to vector<32x128xf32>
      %18 = arith.addf %15, %17 : vector<32x128xf32>
      %19 = arith.truncf %18 : vector<32x128xf32> to vector<32x128xbf16>
      %c0_16 = arith.constant 0 : index
      %c0_17 = arith.constant 0 : index
      %20 = vector.load %arg7[%c0_16, %c0_17] : memref<32x128xbf16, #tpu.memory_space<vmem>>, vector<32x128xbf16>
      tpu.vector_store %arg7[%c0_16, %c0_17], %19 {strides = array<i32>} : memref<32x128xbf16, #tpu.memory_space<vmem>>, vector<32x128xbf16>,
    } else {
    }
    return
  }
  func.func @transform_0(%arg0: i32, %arg1: i32, %arg2: i32) -> (i32, i32) {
    %c0_i32 = arith.constant 0 : i32
    return %arg0, %arg2 : i32, i32
  }
  func.func @transform_1(%arg0: i32, %arg1: i32, %arg2: i32) -> (i32, i32) {
    %c0_i32 = arith.constant 0 : i32
    return %arg2, %arg1 : i32, i32
  }
  func.func @transform_2(%arg0: i32, %arg1: i32, %arg2: i32) -> (i32, i32) {
    %c0_i32 = arith.constant 0 : i32
    %c0_i32_0 = arith.constant 0 : i32
    return %c0_i32, %arg1 : i32, i32
  }
  func.func @transform_3(%arg0: i32, %arg1: i32, %arg2: i32) -> (i32, i32) {
    %c0_i32 = arith.constant 0 : i32
    return %arg0, %arg1 : i32, i32
  }
  func.func @transform_4(%arg0: i32, %arg1: i32, %arg2: i32) -> (i32, i32) {
    %c0_i32 = arith.constant 0 : i32
    return %arg0, %arg1 : i32, i32
  }
}

module attributes {stable_mosaic.version = 11 : i64} {
  func.func @_matmul_kernel(%arg0: i32, %arg1: i32, %arg2: i32, %arg3: memref<32x128xbf16, #tpu.memory_space<vmem>>, %arg4: memref<128x384xbf16, #tpu.memory_space<vmem>>, %arg5: memref<1x128xf32, #tpu.memory_space<vmem>>, %arg6: memref<1x128xf32, #tpu.memory_space<vmem>>, %arg7: memref<1x384xf32, #tpu.memory_space<vmem>>, %arg8: memref<32x384xbf16, #tpu.memory_space<vmem>>, %arg9: memref<32x384xf32, #tpu.memory_space<vmem>>) attributes {dimension_semantics = [#tpu.dimension_semantics<parallel>, #tpu.dimension_semantics<parallel>, #tpu.dimension_semantics<arbitrary>], iteration_bounds = array<i64: 1, 1, 1>, scalar_prefetch = 0 : i64, scratch_operands = 1 : i64, tpu.core_type = #tpu.core_type<tc>, window_params = [{transform_indices = @transform_0, window_bounds = array<i64: 32, 128>}, {transform_indices = @transform_1, window_bounds = array<i64: 128, 384>}, {transform_indices = @transform_2, window_bounds = array<i64: 1, 128>}, {transform_indices = @transform_3, window_bounds = array<i64: 1, 128>}, {transform_indices = @transform_4, window_bounds = array<i64: 1, 384>}, {transform_indices = @transform_5, window_bounds = array<i64: 32, 384>}]} {
    %c0_i32 = arith.constant 0 : i32
    %0 = arith.cmpi eq, %arg2, %c0_i32 : i32
    %1 = arith.extui %0 : i1 to i32
    %c0_i32_0 = arith.constant 0 : i32
    %2 = arith.cmpi ne, %1, %c0_i32_0 : i32
    scf.if %2 {
      %cst_19 = arith.constant 0.000000e+00 : f32
      %38 = vector.broadcast %cst_19 : f32 to vector<32x384xf32>
      %c0_20 = arith.constant 0 : index
      %c0_21 = arith.constant 0 : index
      %39 = vector.load %arg9[%c0_20, %c0_21] : memref<32x384xf32, #tpu.memory_space<vmem>>, vector<32x384xf32>
      tpu.vector_store %arg9[%c0_20, %c0_21], %38 {strides = array<i32>} : memref<32x384xf32, #tpu.memory_space<vmem>>, vector<32x384xf32>,
    } else {
    }
    %c0 = arith.constant 0 : index
    %c0_1 = arith.constant 0 : index
    %3 = vector.load %arg3[%c0, %c0_1] : memref<32x128xbf16, #tpu.memory_space<vmem>>, vector<32x128xbf16>
    %4 = arith.extf %3 : vector<32x128xbf16> to vector<32x128xf32>
    %cst = arith.constant dense<0.000000e+00> : vector<32xf32>
    %5 = vector.multi_reduction <add>, %4, %cst [1] : vector<32x128xf32> to vector<32xf32>
    %6 = vector.shape_cast %5 : vector<32xf32> to vector<32x1xf32>
    %cst_2 = arith.constant 1.280000e+02 : f32
    %7 = vector.broadcast %cst_2 : f32 to vector<32x1xf32>
    %8 = arith.divf %6, %7 : vector<32x1xf32>
    %9 = vector.broadcast %8 : vector<32x1xf32> to vector<32x128xf32>
    %10 = arith.subf %4, %9 : vector<32x128xf32>
    %11 = arith.mulf %10, %10 : vector<32x128xf32>
    %cst_3 = arith.constant dense<0.000000e+00> : vector<32xf32>
    %12 = vector.multi_reduction <add>, %11, %cst_3 [1] : vector<32x128xf32> to vector<32xf32>
    %13 = vector.shape_cast %12 : vector<32xf32> to vector<32x1xf32>
    %cst_4 = arith.constant 1.280000e+02 : f32
    %14 = vector.broadcast %cst_4 : f32 to vector<32x1xf32>
    %15 = arith.divf %13, %14 : vector<32x1xf32>
    %16 = vector.broadcast %8 : vector<32x1xf32> to vector<32x128xf32>
    %17 = arith.subf %4, %16 : vector<32x128xf32>
    %cst_5 = arith.constant 9.99999974E-6 : f32
    %18 = vector.broadcast %cst_5 : f32 to vector<32x1xf32>
    %19 = arith.addf %15, %18 : vector<32x1xf32>
    %20 = math.rsqrt %19 : vector<32x1xf32>
    %21 = vector.broadcast %20 : vector<32x1xf32> to vector<32x128xf32>
    %22 = arith.mulf %17, %21 : vector<32x128xf32>
    %c0_6 = arith.constant 0 : index
    %c0_7 = arith.constant 0 : index
    %23 = vector.load %arg5[%c0_6, %c0_7] : memref<1x128xf32, #tpu.memory_space<vmem>>, vector<1x128xf32>
    %24 = vector.broadcast %23 : vector<1x128xf32> to vector<32x128xf32>
    %25 = arith.mulf %22, %24 : vector<32x128xf32>
    %c0_8 = arith.constant 0 : index
    %c0_9 = arith.constant 0 : index
    %26 = vector.load %arg6[%c0_8, %c0_9] : memref<1x128xf32, #tpu.memory_space<vmem>>, vector<1x128xf32>
    %27 = vector.broadcast %26 : vector<1x128xf32> to vector<32x128xf32>
    %28 = arith.addf %25, %27 : vector<32x128xf32>
    %29 = arith.truncf %28 : vector<32x128xf32> to vector<32x128xbf16>
    %c0_10 = arith.constant 0 : index
    %c0_11 = arith.constant 0 : index
    %30 = vector.load %arg9[%c0_10, %c0_11] : memref<32x384xf32, #tpu.memory_space<vmem>>, vector<32x384xf32>
    %c0_12 = arith.constant 0 : index
    %c0_13 = arith.constant 0 : index
    %31 = vector.load %arg4[%c0_12, %c0_13] : memref<128x384xbf16, #tpu.memory_space<vmem>>, vector<128x384xbf16>
    %cst_14 = arith.constant dense<0.000000e+00> : vector<32x384xf32>
    %32 = tpu.matmul %29, %31, %cst_14 {dimension_numbers = #tpu.dot_dimension_numbers<[1], [0], [0], [1], [0, 0, 1, 1], [], []>} : vector<32x128xbf16>, vector<128x384xbf16>, vector<32x384xf32> -> vector<32x384xf32>
    %33 = arith.addf %30, %32 : vector<32x384xf32>
    %c0_15 = arith.constant 0 : index
    %c0_16 = arith.constant 0 : index
    %34 = vector.load %arg9[%c0_15, %c0_16] : memref<32x384xf32, #tpu.memory_space<vmem>>, vector<32x384xf32>
    tpu.vector_store %arg9[%c0_15, %c0_16], %33 {strides = array<i32>} : memref<32x384xf32, #tpu.memory_space<vmem>>, vector<32x384xf32>,
    %c0_i32_17 = arith.constant 0 : i32
    %35 = arith.cmpi eq, %arg2, %c0_i32_17 : i32
    %36 = arith.extui %35 : i1 to i32
    %c0_i32_18 = arith.constant 0 : i32
    %37 = arith.cmpi ne, %36, %c0_i32_18 : i32
    scf.if %37 {
      %c0_19 = arith.constant 0 : index
      %c0_20 = arith.constant 0 : index
      %38 = vector.load %arg9[%c0_19, %c0_20] : memref<32x384xf32, #tpu.memory_space<vmem>>, vector<32x384xf32>
      %c0_21 = arith.constant 0 : index
      %c0_22 = arith.constant 0 : index
      %39 = vector.load %arg7[%c0_21, %c0_22] : memref<1x384xf32, #tpu.memory_space<vmem>>, vector<1x384xf32>
      %40 = vector.broadcast %39 : vector<1x384xf32> to vector<32x384xf32>
      %41 = arith.addf %38, %40 : vector<32x384xf32>
      %42 = arith.truncf %41 : vector<32x384xf32> to vector<32x384xbf16>
      %c0_23 = arith.constant 0 : index
      %c0_24 = arith.constant 0 : index
      %43 = vector.load %arg8[%c0_23, %c0_24] : memref<32x384xbf16, #tpu.memory_space<vmem>>, vector<32x384xbf16>
      tpu.vector_store %arg8[%c0_23, %c0_24], %42 {strides = array<i32>} : memref<32x384xbf16, #tpu.memory_space<vmem>>, vector<32x384xbf16>,
    } else {
    }
    return
  }
  func.func @transform_0(%arg0: i32, %arg1: i32, %arg2: i32) -> (i32, i32) {
    %c0_i32 = arith.constant 0 : i32
    return %arg0, %arg2 : i32, i32
  }
  func.func @transform_1(%arg0: i32, %arg1: i32, %arg2: i32) -> (i32, i32) {
    %c0_i32 = arith.constant 0 : i32
    return %arg2, %arg1 : i32, i32
  }
  func.func @transform_2(%arg0: i32, %arg1: i32, %arg2: i32) -> (i32, i32) {
    %c0_i32 = arith.constant 0 : i32
    %c0_i32_0 = arith.constant 0 : i32
    return %c0_i32, %arg2 : i32, i32
  }
  func.func @transform_3(%arg0: i32, %arg1: i32, %arg2: i32) -> (i32, i32) {
    %c0_i32 = arith.constant 0 : i32
    %c0_i32_0 = arith.constant 0 : i32
    return %c0_i32, %arg2 : i32, i32
  }
  func.func @transform_4(%arg0: i32, %arg1: i32, %arg2: i32) -> (i32, i32) {
    %c0_i32 = arith.constant 0 : i32
    %c0_i32_0 = arith.constant 0 : i32
    return %c0_i32, %arg1 : i32, i32
  }
  func.func @transform_5(%arg0: i32, %arg1: i32, %arg2: i32) -> (i32, i32) {
    %c0_i32 = arith.constant 0 : i32
    return %arg0, %arg1 : i32, i32
  }
}

module attributes {stable_mosaic.version = 11 : i64} {
  func.func @_attn_kernel(%arg0: i32, %arg1: i32, %arg2: i32, %arg3: memref<1x16x128xbf16, #tpu.memory_space<vmem>>, %arg4: memref<1x16x128xbf16, #tpu.memory_space<vmem>>, %arg5: memref<1x16x128xbf16, #tpu.memory_space<vmem>>, %arg6: memref<1x16x128xbf16, #tpu.memory_space<vmem>>, %arg7: memref<4x16x1xf32, #tpu.memory_space<vmem>>, %arg8: memref<4x16x1xf32, #tpu.memory_space<vmem>>, %arg9: memref<4x16x32xf32, #tpu.memory_space<vmem>>) attributes {dimension_semantics = [#tpu.dimension_semantics<parallel>, #tpu.dimension_semantics<parallel>, #tpu.dimension_semantics<arbitrary>], iteration_bounds = array<i64: 2, 1, 1>, scalar_prefetch = 0 : i64, scratch_operands = 3 : i64, tpu.core_type = #tpu.core_type<tc>, window_params = [{transform_indices = @transform_0, window_bounds = array<i64: 1, 16, 128>}, {transform_indices = @transform_1, window_bounds = array<i64: 1, 16, 128>}, {transform_indices = @transform_2, window_bounds = array<i64: 1, 16, 128>}, {transform_indices = @transform_3, window_bounds = array<i64: 1, 16, 128>}]} {
    %c0_i32 = arith.constant 0 : i32
    %0 = arith.cmpi eq, %arg2, %c0_i32 : i32
    %1 = arith.extui %0 : i1 to i32
    %c0_i32_0 = arith.constant 0 : i32
    %2 = arith.cmpi ne, %1, %c0_i32_0 : i32
    scf.if %2 {
      %cst = arith.constant 0xFF800000 : f32
      %9 = vector.broadcast %cst : f32 to vector<4x16x1xf32>
      %c0 = arith.constant 0 : index
      %c0_4 = arith.constant 0 : index
      %c0_5 = arith.constant 0 : index
      %10 = vector.load %arg7[%c0, %c0_4, %c0_5] : memref<4x16x1xf32, #tpu.memory_space<vmem>>, vector<4x16x1xf32>
      tpu.vector_store %arg7[%c0, %c0_4, %c0_5], %9 {strides = array<i32>} : memref<4x16x1xf32, #tpu.memory_space<vmem>>, vector<4x16x1xf32>,
      %cst_6 = arith.constant 0.000000e+00 : f32
      %11 = vector.broadcast %cst_6 : f32 to vector<4x16x1xf32>
      %c0_7 = arith.constant 0 : index
      %c0_8 = arith.constant 0 : index
      %c0_9 = arith.constant 0 : index
      %12 = vector.load %arg8[%c0_7, %c0_8, %c0_9] : memref<4x16x1xf32, #tpu.memory_space<vmem>>, vector<4x16x1xf32>
      tpu.vector_store %arg8[%c0_7, %c0_8, %c0_9], %11 {strides = array<i32>} : memref<4x16x1xf32, #tpu.memory_space<vmem>>, vector<4x16x1xf32>,
      %cst_10 = arith.constant 0.000000e+00 : f32
      %13 = vector.broadcast %cst_10 : f32 to vector<4x16x32xf32>
      %c0_11 = arith.constant 0 : index
      %c0_12 = arith.constant 0 : index
      %c0_13 = arith.constant 0 : index
      %14 = vector.load %arg9[%c0_11, %c0_12, %c0_13] : memref<4x16x32xf32, #tpu.memory_space<vmem>>, vector<4x16x32xf32>
      tpu.vector_store %arg9[%c0_11, %c0_12, %c0_13], %13 {strides = array<i32>} : memref<4x16x32xf32, #tpu.memory_space<vmem>>, vector<4x16x32xf32>,
    } else {
    }
    %3 = arith.cmpi sle, %arg2, %arg1 : i32
    %4 = arith.extui %3 : i1 to i32
    %c0_i32_1 = arith.constant 0 : i32
    %5 = arith.cmpi ne, %4, %c0_i32_1 : i32
    scf.if %5 {
      %c16_i32 = arith.constant 16 : i32
      %9 = arith.muli %arg1, %c16_i32 : i32
      %10 = tpu.iota {dimensions = array<i32: 0>} : vector<16x16xi32>
      %11 = vector.broadcast %9 : i32 to vector<16x16xi32>
      %12 = arith.addi %11, %10 : vector<16x16xi32>
      %c16_i32_4 = arith.constant 16 : i32
      %13 = arith.muli %arg2, %c16_i32_4 : i32
      %14 = tpu.iota {dimensions = array<i32: 1>} : vector<16x16xi32>
      %15 = vector.broadcast %13 : i32 to vector<16x16xi32>
      %16 = arith.addi %15, %14 : vector<16x16xi32>
      %17 = arith.cmpi sle, %16, %12 : vector<16x16xi32>
      %c0 = arith.constant 0 : index
      %c0_5 = arith.constant 0 : index
      %c0_6 = arith.constant 0 : index
      %18 = vector.load %arg3[%c0, %c0_5, %c0_6] : memref<1x16x128xbf16, #tpu.memory_space<vmem>>, vector<1x16x32xbf16>
      %19 = vector.shape_cast %18 : vector<1x16x32xbf16> to vector<16x32xbf16>
      %c0_7 = arith.constant 0 : index
      %c0_8 = arith.constant 0 : index
      %c0_9 = arith.constant 0 : index
      %20 = vector.load %arg4[%c0_7, %c0_8, %c0_9] : memref<1x16x128xbf16, #tpu.memory_space<vmem>>, vector<1x16x32xbf16>
      %21 = vector.shape_cast %20 : vector<1x16x32xbf16> to vector<16x32xbf16>
      %c0_10 = arith.constant 0 : index
      %c0_11 = arith.constant 0 : index
      %c0_12 = arith.constant 0 : index
      %22 = vector.load %arg5[%c0_10, %c0_11, %c0_12] : memref<1x16x128xbf16, #tpu.memory_space<vmem>>, vector<1x16x32xbf16>
      %23 = vector.shape_cast %22 : vector<1x16x32xbf16> to vector<16x32xbf16>
      %cst = arith.constant dense<0.000000e+00> : vector<16x16xf32>
      %24 = tpu.matmul %19, %21, %cst {dimension_numbers = #tpu.dot_dimension_numbers<[1], [1], [0], [0], [0, 0, 1, 0], [], []>} : vector<16x32xbf16>, vector<16x32xbf16>, vector<16x16xf32> -> vector<16x16xf32>
      %cst_13 = arith.constant 0.176776692 : f32
      %25 = vector.broadcast %cst_13 : f32 to vector<16x16xf32>
      %26 = arith.mulf %24, %25 : vector<16x16xf32>
      %cst_14 = arith.constant -1.000000e+04 : f32
      %27 = vector.broadcast %cst_14 : f32 to vector<16x16xf32>
      %28 = arith.select %17, %26, %27 : vector<16x16xi1>, vector<16x16xf32>
      %c0_15 = arith.constant 0 : index
      %c0_16 = arith.constant 0 : index
      %c0_17 = arith.constant 0 : index
      %29 = vector.load %arg7[%c0_15, %c0_16, %c0_17] : memref<4x16x1xf32, #tpu.memory_space<vmem>>, vector<1x16x1xf32>
      %30 = vector.shape_cast %29 : vector<1x16x1xf32> to vector<16x1xf32>
      %cst_18 = arith.constant dense<0xFF800000> : vector<16xf32>
      %31 = vector.multi_reduction <maximumf>, %28, %cst_18 [1] : vector<16x16xf32> to vector<16xf32>
      %32 = vector.shape_cast %31 : vector<16xf32> to vector<16x1xf32>
      %33 = arith.maximumf %30, %32 : vector<16x1xf32>
      %34 = arith.subf %30, %33 : vector<16x1xf32>
      %35 = math.exp %34 : vector<16x1xf32>
      %36 = vector.broadcast %33 : vector<16x1xf32> to vector<16x16xf32>
      %37 = arith.subf %28, %36 : vector<16x16xf32>
      %38 = math.exp %37 : vector<16x16xf32>
      %c0_19 = arith.constant 0 : index
      %c0_20 = arith.constant 0 : index
      %c0_21 = arith.constant 0 : index
      %39 = vector.load %arg8[%c0_19, %c0_20, %c0_21] : memref<4x16x1xf32, #tpu.memory_space<vmem>>, vector<1x16x1xf32>
      %40 = vector.shape_cast %39 : vector<1x16x1xf32> to vector<16x1xf32>
      %41 = arith.mulf %35, %40 : vector<16x1xf32>
      %cst_22 = arith.constant dense<0.000000e+00> : vector<16xf32>
      %42 = vector.multi_reduction <add>, %38, %cst_22 [1] : vector<16x16xf32> to vector<16xf32>
      %43 = vector.shape_cast %42 : vector<16xf32> to vector<16x1xf32>
      %44 = arith.addf %41, %43 : vector<16x1xf32>
      %c0_23 = arith.constant 0 : index
      %c0_24 = arith.constant 0 : index
      %c0_25 = arith.constant 0 : index
      %45 = vector.load %arg8[%c0_23, %c0_24, %c0_25] : memref<4x16x1xf32, #tpu.memory_space<vmem>>, vector<1x16x1xf32>
      %46 = vector.shape_cast %45 : vector<1x16x1xf32> to vector<16x1xf32>
      %47 = vector.shape_cast %44 : vector<16x1xf32> to vector<1x16x1xf32>
      tpu.vector_store %arg8[%c0_23, %c0_24, %c0_25], %47 {strides = array<i32>} : memref<4x16x1xf32, #tpu.memory_space<vmem>>, vector<1x16x1xf32>,
      %c0_26 = arith.constant 0 : index
      %c0_27 = arith.constant 0 : index
      %c0_28 = arith.constant 0 : index
      %48 = vector.load %arg9[%c0_26, %c0_27, %c0_28] : memref<4x16x32xf32, #tpu.memory_space<vmem>>, vector<1x16x32xf32>
      %49 = vector.shape_cast %48 : vector<1x16x32xf32> to vector<16x32xf32>
      %50 = vector.broadcast %35 : vector<16x1xf32> to vector<16x32xf32>
      %51 = arith.mulf %50, %49 : vector<16x32xf32>
      %52 = arith.truncf %38 : vector<16x16xf32> to vector<16x16xbf16>
      %cst_29 = arith.constant dense<0.000000e+00> : vector<16x32xf32>
      %53 = tpu.matmul %52, %23, %cst_29 {dimension_numbers = #tpu.dot_dimension_numbers<[1], [0], [0], [1], [0, 0, 1, 1], [], []>} : vector<16x16xbf16>, vector<16x32xbf16>, vector<16x32xf32> -> vector<16x32xf32>
      %54 = arith.addf %51, %53 : vector<16x32xf32>
      %c0_30 = arith.constant 0 : index
      %c0_31 = arith.constant 0 : index
      %c0_32 = arith.constant 0 : index
      %55 = vector.load %arg9[%c0_30, %c0_31, %c0_32] : memref<4x16x32xf32, #tpu.memory_space<vmem>>, vector<1x16x32xf32>
      %56 = vector.shape_cast %55 : vector<1x16x32xf32> to vector<16x32xf32>
      %57 = vector.shape_cast %54 : vector<16x32xf32> to vector<1x16x32xf32>
      tpu.vector_store %arg9[%c0_30, %c0_31, %c0_32], %57 {strides = array<i32>} : memref<4x16x32xf32, #tpu.memory_space<vmem>>, vector<1x16x32xf32>,
      %c0_33 = arith.constant 0 : index
      %c0_34 = arith.constant 0 : index
      %c0_35 = arith.constant 0 : index
      %58 = vector.load %arg7[%c0_33, %c0_34, %c0_35] : memref<4x16x1xf32, #tpu.memory_space<vmem>>, vector<1x16x1xf32>
      %59 = vector.shape_cast %58 : vector<1x16x1xf32> to vector<16x1xf32>
      %60 = vector.shape_cast %33 : vector<16x1xf32> to vector<1x16x1xf32>
      tpu.vector_store %arg7[%c0_33, %c0_34, %c0_35], %60 {strides = array<i32>} : memref<4x16x1xf32, #tpu.memory_space<vmem>>, vector<1x16x1xf32>,
      %c0_36 = arith.constant 0 : index
      %c0_37 = arith.constant 0 : index
      %c32 = arith.constant 32 : index
      %61 = vector.load %arg3[%c0_36, %c0_37, %c32] : memref<1x16x128xbf16, #tpu.memory_space<vmem>>, vector<1x16x32xbf16>
      %62 = vector.shape_cast %61 : vector<1x16x32xbf16> to vector<16x32xbf16>
      %c0_38 = arith.constant 0 : index
      %c0_39 = arith.constant 0 : index
      %c32_40 = arith.constant 32 : index
      %63 = vector.load %arg4[%c0_38, %c0_39, %c32_40] : memref<1x16x128xbf16, #tpu.memory_space<vmem>>, vector<1x16x32xbf16>
      %64 = vector.shape_cast %63 : vector<1x16x32xbf16> to vector<16x32xbf16>
      %c0_41 = arith.constant 0 : index
      %c0_42 = arith.constant 0 : index
      %c32_43 = arith.constant 32 : index
      %65 = vector.load %arg5[%c0_41, %c0_42, %c32_43] : memref<1x16x128xbf16, #tpu.memory_space<vmem>>, vector<1x16x32xbf16>
      %66 = vector.shape_cast %65 : vector<1x16x32xbf16> to vector<16x32xbf16>
      %cst_44 = arith.constant dense<0.000000e+00> : vector<16x16xf32>
      %67 = tpu.matmul %62, %64, %cst_44 {dimension_numbers = #tpu.dot_dimension_numbers<[1], [1], [0], [0], [0, 0, 1, 0], [], []>} : vector<16x32xbf16>, vector<16x32xbf16>, vector<16x16xf32> -> vector<16x16xf32>
      %cst_45 = arith.constant 0.176776692 : f32
      %68 = vector.broadcast %cst_45 : f32 to vector<16x16xf32>
      %69 = arith.mulf %67, %68 : vector<16x16xf32>
      %cst_46 = arith.constant -1.000000e+04 : f32
      %70 = vector.broadcast %cst_46 : f32 to vector<16x16xf32>
      %71 = arith.select %17, %69, %70 : vector<16x16xi1>, vector<16x16xf32>
      %c1 = arith.constant 1 : index
      %c0_47 = arith.constant 0 : index
      %c0_48 = arith.constant 0 : index
      %72 = vector.load %arg7[%c1, %c0_47, %c0_48] : memref<4x16x1xf32, #tpu.memory_space<vmem>>, vector<1x16x1xf32>
      %73 = vector.shape_cast %72 : vector<1x16x1xf32> to vector<16x1xf32>
      %cst_49 = arith.constant dense<0xFF800000> : vector<16xf32>
      %74 = vector.multi_reduction <maximumf>, %71, %cst_49 [1] : vector<16x16xf32> to vector<16xf32>
      %75 = vector.shape_cast %74 : vector<16xf32> to vector<16x1xf32>
      %76 = arith.maximumf %73, %75 : vector<16x1xf32>
      %77 = arith.subf %73, %76 : vector<16x1xf32>
      %78 = math.exp %77 : vector<16x1xf32>
      %79 = vector.broadcast %76 : vector<16x1xf32> to vector<16x16xf32>
      %80 = arith.subf %71, %79 : vector<16x16xf32>
      %81 = math.exp %80 : vector<16x16xf32>
      %c1_50 = arith.constant 1 : index
      %c0_51 = arith.constant 0 : index
      %c0_52 = arith.constant 0 : index
      %82 = vector.load %arg8[%c1_50, %c0_51, %c0_52] : memref<4x16x1xf32, #tpu.memory_space<vmem>>, vector<1x16x1xf32>
      %83 = vector.shape_cast %82 : vector<1x16x1xf32> to vector<16x1xf32>
      %84 = arith.mulf %78, %83 : vector<16x1xf32>
      %cst_53 = arith.constant dense<0.000000e+00> : vector<16xf32>
      %85 = vector.multi_reduction <add>, %81, %cst_53 [1] : vector<16x16xf32> to vector<16xf32>
      %86 = vector.shape_cast %85 : vector<16xf32> to vector<16x1xf32>
      %87 = arith.addf %84, %86 : vector<16x1xf32>
      %c1_54 = arith.constant 1 : index
      %c0_55 = arith.constant 0 : index
      %c0_56 = arith.constant 0 : index
      %88 = vector.load %arg8[%c1_54, %c0_55, %c0_56] : memref<4x16x1xf32, #tpu.memory_space<vmem>>, vector<1x16x1xf32>
      %89 = vector.shape_cast %88 : vector<1x16x1xf32> to vector<16x1xf32>
      %90 = vector.shape_cast %87 : vector<16x1xf32> to vector<1x16x1xf32>
      tpu.vector_store %arg8[%c1_54, %c0_55, %c0_56], %90 {strides = array<i32>} : memref<4x16x1xf32, #tpu.memory_space<vmem>>, vector<1x16x1xf32>,
      %c1_57 = arith.constant 1 : index
      %c0_58 = arith.constant 0 : index
      %c0_59 = arith.constant 0 : index
      %91 = vector.load %arg9[%c1_57, %c0_58, %c0_59] : memref<4x16x32xf32, #tpu.memory_space<vmem>>, vector<1x16x32xf32>
      %92 = vector.shape_cast %91 : vector<1x16x32xf32> to vector<16x32xf32>
      %93 = vector.broadcast %78 : vector<16x1xf32> to vector<16x32xf32>
      %94 = arith.mulf %93, %92 : vector<16x32xf32>
      %95 = arith.truncf %81 : vector<16x16xf32> to vector<16x16xbf16>
      %cst_60 = arith.constant dense<0.000000e+00> : vector<16x32xf32>
      %96 = tpu.matmul %95, %66, %cst_60 {dimension_numbers = #tpu.dot_dimension_numbers<[1], [0], [0], [1], [0, 0, 1, 1], [], []>} : vector<16x16xbf16>, vector<16x32xbf16>, vector<16x32xf32> -> vector<16x32xf32>
      %97 = arith.addf %94, %96 : vector<16x32xf32>
      %c1_61 = arith.constant 1 : index
      %c0_62 = arith.constant 0 : index
      %c0_63 = arith.constant 0 : index
      %98 = vector.load %arg9[%c1_61, %c0_62, %c0_63] : memref<4x16x32xf32, #tpu.memory_space<vmem>>, vector<1x16x32xf32>
      %99 = vector.shape_cast %98 : vector<1x16x32xf32> to vector<16x32xf32>
      %100 = vector.shape_cast %97 : vector<16x32xf32> to vector<1x16x32xf32>
      tpu.vector_store %arg9[%c1_61, %c0_62, %c0_63], %100 {strides = array<i32>} : memref<4x16x32xf32, #tpu.memory_space<vmem>>, vector<1x16x32xf32>,
      %c1_64 = arith.constant 1 : index
      %c0_65 = arith.constant 0 : index
      %c0_66 = arith.constant 0 : index
      %101 = vector.load %arg7[%c1_64, %c0_65, %c0_66] : memref<4x16x1xf32, #tpu.memory_space<vmem>>, vector<1x16x1xf32>
      %102 = vector.shape_cast %101 : vector<1x16x1xf32> to vector<16x1xf32>
      %103 = vector.shape_cast %76 : vector<16x1xf32> to vector<1x16x1xf32>
      tpu.vector_store %arg7[%c1_64, %c0_65, %c0_66], %103 {strides = array<i32>} : memref<4x16x1xf32, #tpu.memory_space<vmem>>, vector<1x16x1xf32>,
      %c0_67 = arith.constant 0 : index
      %c0_68 = arith.constant 0 : index
      %c64 = arith.constant 64 : index
      %104 = vector.load %arg3[%c0_67, %c0_68, %c64] : memref<1x16x128xbf16, #tpu.memory_space<vmem>>, vector<1x16x32xbf16>
      %105 = vector.shape_cast %104 : vector<1x16x32xbf16> to vector<16x32xbf16>
      %c0_69 = arith.constant 0 : index
      %c0_70 = arith.constant 0 : index
      %c64_71 = arith.constant 64 : index
      %106 = vector.load %arg4[%c0_69, %c0_70, %c64_71] : memref<1x16x128xbf16, #tpu.memory_space<vmem>>, vector<1x16x32xbf16>
      %107 = vector.shape_cast %106 : vector<1x16x32xbf16> to vector<16x32xbf16>
      %c0_72 = arith.constant 0 : index
      %c0_73 = arith.constant 0 : index
      %c64_74 = arith.constant 64 : index
      %108 = vector.load %arg5[%c0_72, %c0_73, %c64_74] : memref<1x16x128xbf16, #tpu.memory_space<vmem>>, vector<1x16x32xbf16>
      %109 = vector.shape_cast %108 : vector<1x16x32xbf16> to vector<16x32xbf16>
      %cst_75 = arith.constant dense<0.000000e+00> : vector<16x16xf32>
      %110 = tpu.matmul %105, %107, %cst_75 {dimension_numbers = #tpu.dot_dimension_numbers<[1], [1], [0], [0], [0, 0, 1, 0], [], []>} : vector<16x32xbf16>, vector<16x32xbf16>, vector<16x16xf32> -> vector<16x16xf32>
      %cst_76 = arith.constant 0.176776692 : f32
      %111 = vector.broadcast %cst_76 : f32 to vector<16x16xf32>
      %112 = arith.mulf %110, %111 : vector<16x16xf32>
      %cst_77 = arith.constant -1.000000e+04 : f32
      %113 = vector.broadcast %cst_77 : f32 to vector<16x16xf32>
      %114 = arith.select %17, %112, %113 : vector<16x16xi1>, vector<16x16xf32>
      %c2 = arith.constant 2 : index
      %c0_78 = arith.constant 0 : index
      %c0_79 = arith.constant 0 : index
      %115 = vector.load %arg7[%c2, %c0_78, %c0_79] : memref<4x16x1xf32, #tpu.memory_space<vmem>>, vector<1x16x1xf32>
      %116 = vector.shape_cast %115 : vector<1x16x1xf32> to vector<16x1xf32>
      %cst_80 = arith.constant dense<0xFF800000> : vector<16xf32>
      %117 = vector.multi_reduction <maximumf>, %114, %cst_80 [1] : vector<16x16xf32> to vector<16xf32>
      %118 = vector.shape_cast %117 : vector<16xf32> to vector<16x1xf32>
      %119 = arith.maximumf %116, %118 : vector<16x1xf32>
      %120 = arith.subf %116, %119 : vector<16x1xf32>
      %121 = math.exp %120 : vector<16x1xf32>
      %122 = vector.broadcast %119 : vector<16x1xf32> to vector<16x16xf32>
      %123 = arith.subf %114, %122 : vector<16x16xf32>
      %124 = math.exp %123 : vector<16x16xf32>
      %c2_81 = arith.constant 2 : index
      %c0_82 = arith.constant 0 : index
      %c0_83 = arith.constant 0 : index
      %125 = vector.load %arg8[%c2_81, %c0_82, %c0_83] : memref<4x16x1xf32, #tpu.memory_space<vmem>>, vector<1x16x1xf32>
      %126 = vector.shape_cast %125 : vector<1x16x1xf32> to vector<16x1xf32>
      %127 = arith.mulf %121, %126 : vector<16x1xf32>
      %cst_84 = arith.constant dense<0.000000e+00> : vector<16xf32>
      %128 = vector.multi_reduction <add>, %124, %cst_84 [1] : vector<16x16xf32> to vector<16xf32>
      %129 = vector.shape_cast %128 : vector<16xf32> to vector<16x1xf32>
      %130 = arith.addf %127, %129 : vector<16x1xf32>
      %c2_85 = arith.constant 2 : index
      %c0_86 = arith.constant 0 : index
      %c0_87 = arith.constant 0 : index
      %131 = vector.load %arg8[%c2_85, %c0_86, %c0_87] : memref<4x16x1xf32, #tpu.memory_space<vmem>>, vector<1x16x1xf32>
      %132 = vector.shape_cast %131 : vector<1x16x1xf32> to vector<16x1xf32>
      %133 = vector.shape_cast %130 : vector<16x1xf32> to vector<1x16x1xf32>
      tpu.vector_store %arg8[%c2_85, %c0_86, %c0_87], %133 {strides = array<i32>} : memref<4x16x1xf32, #tpu.memory_space<vmem>>, vector<1x16x1xf32>,
      %c2_88 = arith.constant 2 : index
      %c0_89 = arith.constant 0 : index
      %c0_90 = arith.constant 0 : index
      %134 = vector.load %arg9[%c2_88, %c0_89, %c0_90] : memref<4x16x32xf32, #tpu.memory_space<vmem>>, vector<1x16x32xf32>
      %135 = vector.shape_cast %134 : vector<1x16x32xf32> to vector<16x32xf32>
      %136 = vector.broadcast %121 : vector<16x1xf32> to vector<16x32xf32>
      %137 = arith.mulf %136, %135 : vector<16x32xf32>
      %138 = arith.truncf %124 : vector<16x16xf32> to vector<16x16xbf16>
      %cst_91 = arith.constant dense<0.000000e+00> : vector<16x32xf32>
      %139 = tpu.matmul %138, %109, %cst_91 {dimension_numbers = #tpu.dot_dimension_numbers<[1], [0], [0], [1], [0, 0, 1, 1], [], []>} : vector<16x16xbf16>, vector<16x32xbf16>, vector<16x32xf32> -> vector<16x32xf32>
      %140 = arith.addf %137, %139 : vector<16x32xf32>
      %c2_92 = arith.constant 2 : index
      %c0_93 = arith.constant 0 : index
      %c0_94 = arith.constant 0 : index
      %141 = vector.load %arg9[%c2_92, %c0_93, %c0_94] : memref<4x16x32xf32, #tpu.memory_space<vmem>>, vector<1x16x32xf32>
      %142 = vector.shape_cast %141 : vector<1x16x32xf32> to vector<16x32xf32>
      %143 = vector.shape_cast %140 : vector<16x32xf32> to vector<1x16x32xf32>
      tpu.vector_store %arg9[%c2_92, %c0_93, %c0_94], %143 {strides = array<i32>} : memref<4x16x32xf32, #tpu.memory_space<vmem>>, vector<1x16x32xf32>,
      %c2_95 = arith.constant 2 : index
      %c0_96 = arith.constant 0 : index
      %c0_97 = arith.constant 0 : index
      %144 = vector.load %arg7[%c2_95, %c0_96, %c0_97] : memref<4x16x1xf32, #tpu.memory_space<vmem>>, vector<1x16x1xf32>
      %145 = vector.shape_cast %144 : vector<1x16x1xf32> to vector<16x1xf32>
      %146 = vector.shape_cast %119 : vector<16x1xf32> to vector<1x16x1xf32>
      tpu.vector_store %arg7[%c2_95, %c0_96, %c0_97], %146 {strides = array<i32>} : memref<4x16x1xf32, #tpu.memory_space<vmem>>, vector<1x16x1xf32>,
      %c0_98 = arith.constant 0 : index
      %c0_99 = arith.constant 0 : index
      %c96 = arith.constant 96 : index
      %147 = vector.load %arg3[%c0_98, %c0_99, %c96] : memref<1x16x128xbf16, #tpu.memory_space<vmem>>, vector<1x16x32xbf16>
      %148 = vector.shape_cast %147 : vector<1x16x32xbf16> to vector<16x32xbf16>
      %c0_100 = arith.constant 0 : index
      %c0_101 = arith.constant 0 : index
      %c96_102 = arith.constant 96 : index
      %149 = vector.load %arg4[%c0_100, %c0_101, %c96_102] : memref<1x16x128xbf16, #tpu.memory_space<vmem>>, vector<1x16x32xbf16>
      %150 = vector.shape_cast %149 : vector<1x16x32xbf16> to vector<16x32xbf16>
      %c0_103 = arith.constant 0 : index
      %c0_104 = arith.constant 0 : index
      %c96_105 = arith.constant 96 : index
      %151 = vector.load %arg5[%c0_103, %c0_104, %c96_105] : memref<1x16x128xbf16, #tpu.memory_space<vmem>>, vector<1x16x32xbf16>
      %152 = vector.shape_cast %151 : vector<1x16x32xbf16> to vector<16x32xbf16>
      %cst_106 = arith.constant dense<0.000000e+00> : vector<16x16xf32>
      %153 = tpu.matmul %148, %150, %cst_106 {dimension_numbers = #tpu.dot_dimension_numbers<[1], [1], [0], [0], [0, 0, 1, 0], [], []>} : vector<16x32xbf16>, vector<16x32xbf16>, vector<16x16xf32> -> vector<16x16xf32>
      %cst_107 = arith.constant 0.176776692 : f32
      %154 = vector.broadcast %cst_107 : f32 to vector<16x16xf32>
      %155 = arith.mulf %153, %154 : vector<16x16xf32>
      %cst_108 = arith.constant -1.000000e+04 : f32
      %156 = vector.broadcast %cst_108 : f32 to vector<16x16xf32>
      %157 = arith.select %17, %155, %156 : vector<16x16xi1>, vector<16x16xf32>
      %c3 = arith.constant 3 : index
      %c0_109 = arith.constant 0 : index
      %c0_110 = arith.constant 0 : index
      %158 = vector.load %arg7[%c3, %c0_109, %c0_110] : memref<4x16x1xf32, #tpu.memory_space<vmem>>, vector<1x16x1xf32>
      %159 = vector.shape_cast %158 : vector<1x16x1xf32> to vector<16x1xf32>
      %cst_111 = arith.constant dense<0xFF800000> : vector<16xf32>
      %160 = vector.multi_reduction <maximumf>, %157, %cst_111 [1] : vector<16x16xf32> to vector<16xf32>
      %161 = vector.shape_cast %160 : vector<16xf32> to vector<16x1xf32>
      %162 = arith.maximumf %159, %161 : vector<16x1xf32>
      %163 = arith.subf %159, %162 : vector<16x1xf32>
      %164 = math.exp %163 : vector<16x1xf32>
      %165 = vector.broadcast %162 : vector<16x1xf32> to vector<16x16xf32>
      %166 = arith.subf %157, %165 : vector<16x16xf32>
      %167 = math.exp %166 : vector<16x16xf32>
      %c3_112 = arith.constant 3 : index
      %c0_113 = arith.constant 0 : index
      %c0_114 = arith.constant 0 : index
      %168 = vector.load %arg8[%c3_112, %c0_113, %c0_114] : memref<4x16x1xf32, #tpu.memory_space<vmem>>, vector<1x16x1xf32>
      %169 = vector.shape_cast %168 : vector<1x16x1xf32> to vector<16x1xf32>
      %170 = arith.mulf %164, %169 : vector<16x1xf32>
      %cst_115 = arith.constant dense<0.000000e+00> : vector<16xf32>
      %171 = vector.multi_reduction <add>, %167, %cst_115 [1] : vector<16x16xf32> to vector<16xf32>
      %172 = vector.shape_cast %171 : vector<16xf32> to vector<16x1xf32>
      %173 = arith.addf %170, %172 : vector<16x1xf32>
      %c3_116 = arith.constant 3 : index
      %c0_117 = arith.constant 0 : index
      %c0_118 = arith.constant 0 : index
      %174 = vector.load %arg8[%c3_116, %c0_117, %c0_118] : memref<4x16x1xf32, #tpu.memory_space<vmem>>, vector<1x16x1xf32>
      %175 = vector.shape_cast %174 : vector<1x16x1xf32> to vector<16x1xf32>
      %176 = vector.shape_cast %173 : vector<16x1xf32> to vector<1x16x1xf32>
      tpu.vector_store %arg8[%c3_116, %c0_117, %c0_118], %176 {strides = array<i32>} : memref<4x16x1xf32, #tpu.memory_space<vmem>>, vector<1x16x1xf32>,
      %c3_119 = arith.constant 3 : index
      %c0_120 = arith.constant 0 : index
      %c0_121 = arith.constant 0 : index
      %177 = vector.load %arg9[%c3_119, %c0_120, %c0_121] : memref<4x16x32xf32, #tpu.memory_space<vmem>>, vector<1x16x32xf32>
      %178 = vector.shape_cast %177 : vector<1x16x32xf32> to vector<16x32xf32>
      %179 = vector.broadcast %164 : vector<16x1xf32> to vector<16x32xf32>
      %180 = arith.mulf %179, %178 : vector<16x32xf32>
      %181 = arith.truncf %167 : vector<16x16xf32> to vector<16x16xbf16>
      %cst_122 = arith.constant dense<0.000000e+00> : vector<16x32xf32>
      %182 = tpu.matmul %181, %152, %cst_122 {dimension_numbers = #tpu.dot_dimension_numbers<[1], [0], [0], [1], [0, 0, 1, 1], [], []>} : vector<16x16xbf16>, vector<16x32xbf16>, vector<16x32xf32> -> vector<16x32xf32>
      %183 = arith.addf %180, %182 : vector<16x32xf32>
      %c3_123 = arith.constant 3 : index
      %c0_124 = arith.constant 0 : index
      %c0_125 = arith.constant 0 : index
      %184 = vector.load %arg9[%c3_123, %c0_124, %c0_125] : memref<4x16x32xf32, #tpu.memory_space<vmem>>, vector<1x16x32xf32>
      %185 = vector.shape_cast %184 : vector<1x16x32xf32> to vector<16x32xf32>
      %186 = vector.shape_cast %183 : vector<16x32xf32> to vector<1x16x32xf32>
      tpu.vector_store %arg9[%c3_123, %c0_124, %c0_125], %186 {strides = array<i32>} : memref<4x16x32xf32, #tpu.memory_space<vmem>>, vector<1x16x32xf32>,
      %c3_126 = arith.constant 3 : index
      %c0_127 = arith.constant 0 : index
      %c0_128 = arith.constant 0 : index
      %187 = vector.load %arg7[%c3_126, %c0_127, %c0_128] : memref<4x16x1xf32, #tpu.memory_space<vmem>>, vector<1x16x1xf32>
      %188 = vector.shape_cast %187 : vector<1x16x1xf32> to vector<16x1xf32>
      %189 = vector.shape_cast %162 : vector<16x1xf32> to vector<1x16x1xf32>
      tpu.vector_store %arg7[%c3_126, %c0_127, %c0_128], %189 {strides = array<i32>} : memref<4x16x1xf32, #tpu.memory_space<vmem>>, vector<1x16x1xf32>,
    } else {
    }
    %c0_i32_2 = arith.constant 0 : i32
    %6 = arith.cmpi eq, %arg2, %c0_i32_2 : i32
    %7 = arith.extui %6 : i1 to i32
    %c0_i32_3 = arith.constant 0 : i32
    %8 = arith.cmpi ne, %7, %c0_i32_3 : i32
    scf.if %8 {
      %c0 = arith.constant 0 : index
      %c0_4 = arith.constant 0 : index
      %c0_5 = arith.constant 0 : index
      %9 = vector.load %arg8[%c0, %c0_4, %c0_5] : memref<4x16x1xf32, #tpu.memory_space<vmem>>, vector<1x16x1xf32>
      %10 = vector.shape_cast %9 : vector<1x16x1xf32> to vector<16x1xf32>
      %11 = tpu.reciprocal %10 {approx = true} : vector<16x1xf32> -> vector<16x1xf32>
      %c0_6 = arith.constant 0 : index
      %c0_7 = arith.constant 0 : index
      %c0_8 = arith.constant 0 : index
      %12 = vector.load %arg9[%c0_6, %c0_7, %c0_8] : memref<4x16x32xf32, #tpu.memory_space<vmem>>, vector<1x16x32xf32>
      %13 = vector.shape_cast %12 : vector<1x16x32xf32> to vector<16x32xf32>
      %14 = vector.broadcast %11 : vector<16x1xf32> to vector<16x32xf32>
      %15 = arith.mulf %13, %14 : vector<16x32xf32>
      %c1 = arith.constant 1 : index
      %c0_9 = arith.constant 0 : index
      %c0_10 = arith.constant 0 : index
      %16 = vector.load %arg8[%c1, %c0_9, %c0_10] : memref<4x16x1xf32, #tpu.memory_space<vmem>>, vector<1x16x1xf32>
      %17 = vector.shape_cast %16 : vector<1x16x1xf32> to vector<16x1xf32>
      %18 = tpu.reciprocal %17 {approx = true} : vector<16x1xf32> -> vector<16x1xf32>
      %c1_11 = arith.constant 1 : index
      %c0_12 = arith.constant 0 : index
      %c0_13 = arith.constant 0 : index
      %19 = vector.load %arg9[%c1_11, %c0_12, %c0_13] : memref<4x16x32xf32, #tpu.memory_space<vmem>>, vector<1x16x32xf32>
      %20 = vector.shape_cast %19 : vector<1x16x32xf32> to vector<16x32xf32>
      %21 = vector.broadcast %18 : vector<16x1xf32> to vector<16x32xf32>
      %22 = arith.mulf %20, %21 : vector<16x32xf32>
      %c2 = arith.constant 2 : index
      %c0_14 = arith.constant 0 : index
      %c0_15 = arith.constant 0 : index
      %23 = vector.load %arg8[%c2, %c0_14, %c0_15] : memref<4x16x1xf32, #tpu.memory_space<vmem>>, vector<1x16x1xf32>
      %24 = vector.shape_cast %23 : vector<1x16x1xf32> to vector<16x1xf32>
      %25 = tpu.reciprocal %24 {approx = true} : vector<16x1xf32> -> vector<16x1xf32>
      %c2_16 = arith.constant 2 : index
      %c0_17 = arith.constant 0 : index
      %c0_18 = arith.constant 0 : index
      %26 = vector.load %arg9[%c2_16, %c0_17, %c0_18] : memref<4x16x32xf32, #tpu.memory_space<vmem>>, vector<1x16x32xf32>
      %27 = vector.shape_cast %26 : vector<1x16x32xf32> to vector<16x32xf32>
      %28 = vector.broadcast %25 : vector<16x1xf32> to vector<16x32xf32>
      %29 = arith.mulf %27, %28 : vector<16x32xf32>
      %c3 = arith.constant 3 : index
      %c0_19 = arith.constant 0 : index
      %c0_20 = arith.constant 0 : index
      %30 = vector.load %arg8[%c3, %c0_19, %c0_20] : memref<4x16x1xf32, #tpu.memory_space<vmem>>, vector<1x16x1xf32>
      %31 = vector.shape_cast %30 : vector<1x16x1xf32> to vector<16x1xf32>
      %32 = tpu.reciprocal %31 {approx = true} : vector<16x1xf32> -> vector<16x1xf32>
      %c3_21 = arith.constant 3 : index
      %c0_22 = arith.constant 0 : index
      %c0_23 = arith.constant 0 : index
      %33 = vector.load %arg9[%c3_21, %c0_22, %c0_23] : memref<4x16x32xf32, #tpu.memory_space<vmem>>, vector<1x16x32xf32>
      %34 = vector.shape_cast %33 : vector<1x16x32xf32> to vector<16x32xf32>
      %35 = vector.broadcast %32 : vector<16x1xf32> to vector<16x32xf32>
      %36 = arith.mulf %34, %35 : vector<16x32xf32>
      %37 = tpu.concatenate %15, %22, %29, %36 in 1 : vector<16x32xf32>, vector<16x32xf32>, vector<16x32xf32>, vector<16x32xf32> -> vector<16x128xf32>
      %38 = arith.truncf %37 : vector<16x128xf32> to vector<16x128xbf16>
      %c0_24 = arith.constant 0 : index
      %c0_25 = arith.constant 0 : index
      %c0_26 = arith.constant 0 : index
      %39 = vector.load %arg6[%c0_24, %c0_25, %c0_26] : memref<1x16x128xbf16, #tpu.memory_space<vmem>>, vector<1x16x128xbf16>
      %40 = vector.shape_cast %39 : vector<1x16x128xbf16> to vector<16x128xbf16>
      %41 = vector.shape_cast %38 : vector<16x128xbf16> to vector<1x16x128xbf16>
      tpu.vector_store %arg6[%c0_24, %c0_25, %c0_26], %41 {strides = array<i32>} : memref<1x16x128xbf16, #tpu.memory_space<vmem>>, vector<1x16x128xbf16>,
    } else {
    }
    return
  }
  func.func @transform_0(%arg0: i32, %arg1: i32, %arg2: i32) -> (i32, i32, i32) {
    %c0_i32 = arith.constant 0 : i32
    %c0_i32_0 = arith.constant 0 : i32
    return %arg0, %arg1, %c0_i32 : i32, i32, i32
  }
  func.func @transform_1(%arg0: i32, %arg1: i32, %arg2: i32) -> (i32, i32, i32) {
    %0 = arith.minsi %arg2, %arg1 : i32
    %c1_i32 = arith.constant 1 : i32
    %c0_i32 = arith.constant 0 : i32
    return %arg0, %0, %c1_i32 : i32, i32, i32
  }
  func.func @transform_2(%arg0: i32, %arg1: i32, %arg2: i32) -> (i32, i32, i32) {
    %0 = arith.minsi %arg2, %arg1 : i32
    %c2_i32 = arith.constant 2 : i32
    %c0_i32 = arith.constant 0 : i32
    return %arg0, %0, %c2_i32 : i32, i32, i32
  }
  func.func @transform_3(%arg0: i32, %arg1: i32, %arg2: i32) -> (i32, i32, i32) {
    %c0_i32 = arith.constant 0 : i32
    %c0_i32_0 = arith.constant 0 : i32
    return %arg0, %arg1, %c0_i32 : i32, i32, i32
  }
}

module attributes {stable_mosaic.version = 11 : i64} {
  func.func @_matmul_kernel(%arg0: i32, %arg1: i32, %arg2: i32, %arg3: memref<32x128xbf16, #tpu.memory_space<vmem>>, %arg4: memref<128x512xbf16, #tpu.memory_space<vmem>>, %arg5: memref<1x128xf32, #tpu.memory_space<vmem>>, %arg6: memref<1x128xf32, #tpu.memory_space<vmem>>, %arg7: memref<1x512xf32, #tpu.memory_space<vmem>>, %arg8: memref<32x512xbf16, #tpu.memory_space<vmem>>, %arg9: memref<32x512xf32, #tpu.memory_space<vmem>>) attributes {dimension_semantics = [#tpu.dimension_semantics<parallel>, #tpu.dimension_semantics<parallel>, #tpu.dimension_semantics<arbitrary>], iteration_bounds = array<i64: 1, 1, 1>, scalar_prefetch = 0 : i64, scratch_operands = 1 : i64, tpu.core_type = #tpu.core_type<tc>, window_params = [{transform_indices = @transform_0, window_bounds = array<i64: 32, 128>}, {transform_indices = @transform_1, window_bounds = array<i64: 128, 512>}, {transform_indices = @transform_2, window_bounds = array<i64: 1, 128>}, {transform_indices = @transform_3, window_bounds = array<i64: 1, 128>}, {transform_indices = @transform_4, window_bounds = array<i64: 1, 512>}, {transform_indices = @transform_5, window_bounds = array<i64: 32, 512>}]} {
    %c0_i32 = arith.constant 0 : i32
    %0 = arith.cmpi eq, %arg2, %c0_i32 : i32
    %1 = arith.extui %0 : i1 to i32
    %c0_i32_0 = arith.constant 0 : i32
    %2 = arith.cmpi ne, %1, %c0_i32_0 : i32
    scf.if %2 {
      %cst_19 = arith.constant 0.000000e+00 : f32
      %38 = vector.broadcast %cst_19 : f32 to vector<32x512xf32>
      %c0_20 = arith.constant 0 : index
      %c0_21 = arith.constant 0 : index
      %39 = vector.load %arg9[%c0_20, %c0_21] : memref<32x512xf32, #tpu.memory_space<vmem>>, vector<32x512xf32>
      tpu.vector_store %arg9[%c0_20, %c0_21], %38 {strides = array<i32>} : memref<32x512xf32, #tpu.memory_space<vmem>>, vector<32x512xf32>,
    } else {
    }
    %c0 = arith.constant 0 : index
    %c0_1 = arith.constant 0 : index
    %3 = vector.load %arg3[%c0, %c0_1] : memref<32x128xbf16, #tpu.memory_space<vmem>>, vector<32x128xbf16>
    %4 = arith.extf %3 : vector<32x128xbf16> to vector<32x128xf32>
    %cst = arith.constant dense<0.000000e+00> : vector<32xf32>
    %5 = vector.multi_reduction <add>, %4, %cst [1] : vector<32x128xf32> to vector<32xf32>
    %6 = vector.shape_cast %5 : vector<32xf32> to vector<32x1xf32>
    %cst_2 = arith.constant 1.280000e+02 : f32
    %7 = vector.broadcast %cst_2 : f32 to vector<32x1xf32>
    %8 = arith.divf %6, %7 : vector<32x1xf32>
    %9 = vector.broadcast %8 : vector<32x1xf32> to vector<32x128xf32>
    %10 = arith.subf %4, %9 : vector<32x128xf32>
    %11 = arith.mulf %10, %10 : vector<32x128xf32>
    %cst_3 = arith.constant dense<0.000000e+00> : vector<32xf32>
    %12 = vector.multi_reduction <add>, %11, %cst_3 [1] : vector<32x128xf32> to vector<32xf32>
    %13 = vector.shape_cast %12 : vector<32xf32> to vector<32x1xf32>
    %cst_4 = arith.constant 1.280000e+02 : f32
    %14 = vector.broadcast %cst_4 : f32 to vector<32x1xf32>
    %15 = arith.divf %13, %14 : vector<32x1xf32>
    %16 = vector.broadcast %8 : vector<32x1xf32> to vector<32x128xf32>
    %17 = arith.subf %4, %16 : vector<32x128xf32>
    %cst_5 = arith.constant 9.99999974E-6 : f32
    %18 = vector.broadcast %cst_5 : f32 to vector<32x1xf32>
    %19 = arith.addf %15, %18 : vector<32x1xf32>
    %20 = math.rsqrt %19 : vector<32x1xf32>
    %21 = vector.broadcast %20 : vector<32x1xf32> to vector<32x128xf32>
    %22 = arith.mulf %17, %21 : vector<32x128xf32>
    %c0_6 = arith.constant 0 : index
    %c0_7 = arith.constant 0 : index
    %23 = vector.load %arg5[%c0_6, %c0_7] : memref<1x128xf32, #tpu.memory_space<vmem>>, vector<1x128xf32>
    %24 = vector.broadcast %23 : vector<1x128xf32> to vector<32x128xf32>
    %25 = arith.mulf %22, %24 : vector<32x128xf32>
    %c0_8 = arith.constant 0 : index
    %c0_9 = arith.constant 0 : index
    %26 = vector.load %arg6[%c0_8, %c0_9] : memref<1x128xf32, #tpu.memory_space<vmem>>, vector<1x128xf32>
    %27 = vector.broadcast %26 : vector<1x128xf32> to vector<32x128xf32>
    %28 = arith.addf %25, %27 : vector<32x128xf32>
    %29 = arith.truncf %28 : vector<32x128xf32> to vector<32x128xbf16>
    %c0_10 = arith.constant 0 : index
    %c0_11 = arith.constant 0 : index
    %30 = vector.load %arg9[%c0_10, %c0_11] : memref<32x512xf32, #tpu.memory_space<vmem>>, vector<32x512xf32>
    %c0_12 = arith.constant 0 : index
    %c0_13 = arith.constant 0 : index
    %31 = vector.load %arg4[%c0_12, %c0_13] : memref<128x512xbf16, #tpu.memory_space<vmem>>, vector<128x512xbf16>
    %cst_14 = arith.constant dense<0.000000e+00> : vector<32x512xf32>
    %32 = tpu.matmul %29, %31, %cst_14 {dimension_numbers = #tpu.dot_dimension_numbers<[1], [0], [0], [1], [0, 0, 1, 1], [], []>} : vector<32x128xbf16>, vector<128x512xbf16>, vector<32x512xf32> -> vector<32x512xf32>
    %33 = arith.addf %30, %32 : vector<32x512xf32>
    %c0_15 = arith.constant 0 : index
    %c0_16 = arith.constant 0 : index
    %34 = vector.load %arg9[%c0_15, %c0_16] : memref<32x512xf32, #tpu.memory_space<vmem>>, vector<32x512xf32>
    tpu.vector_store %arg9[%c0_15, %c0_16], %33 {strides = array<i32>} : memref<32x512xf32, #tpu.memory_space<vmem>>, vector<32x512xf32>,
    %c0_i32_17 = arith.constant 0 : i32
    %35 = arith.cmpi eq, %arg2, %c0_i32_17 : i32
    %36 = arith.extui %35 : i1 to i32
    %c0_i32_18 = arith.constant 0 : i32
    %37 = arith.cmpi ne, %36, %c0_i32_18 : i32
    scf.if %37 {
      %c0_19 = arith.constant 0 : index
      %c0_20 = arith.constant 0 : index
      %38 = vector.load %arg9[%c0_19, %c0_20] : memref<32x512xf32, #tpu.memory_space<vmem>>, vector<32x512xf32>
      %c0_21 = arith.constant 0 : index
      %c0_22 = arith.constant 0 : index
      %39 = vector.load %arg7[%c0_21, %c0_22] : memref<1x512xf32, #tpu.memory_space<vmem>>, vector<1x512xf32>
      %40 = vector.broadcast %39 : vector<1x512xf32> to vector<32x512xf32>
      %41 = arith.addf %38, %40 : vector<32x512xf32>
      %cst_23 = arith.constant 5.000000e-01 : f32
      %42 = vector.broadcast %cst_23 : f32 to vector<32x512xf32>
      %43 = arith.mulf %42, %41 : vector<32x512xf32>
      %cst_24 = arith.constant 0.707106769 : f32
      %44 = vector.broadcast %cst_24 : f32 to vector<32x512xf32>
      %45 = arith.mulf %41, %44 : vector<32x512xf32>
      %46 = math.erf %45 : vector<32x512xf32>
      %cst_25 = arith.constant 1.000000e+00 : f32
      %47 = vector.broadcast %cst_25 : f32 to vector<32x512xf32>
      %48 = arith.addf %47, %46 : vector<32x512xf32>
      %49 = arith.mulf %43, %48 : vector<32x512xf32>
      %50 = arith.truncf %49 : vector<32x512xf32> to vector<32x512xbf16>
      %c0_26 = arith.constant 0 : index
      %c0_27 = arith.constant 0 : index
      %51 = vector.load %arg8[%c0_26, %c0_27] : memref<32x512xbf16, #tpu.memory_space<vmem>>, vector<32x512xbf16>
      tpu.vector_store %arg8[%c0_26, %c0_27], %50 {strides = array<i32>} : memref<32x512xbf16, #tpu.memory_space<vmem>>, vector<32x512xbf16>,
    } else {
    }
    return
  }
  func.func @transform_0(%arg0: i32, %arg1: i32, %arg2: i32) -> (i32, i32) {
    %c0_i32 = arith.constant 0 : i32
    return %arg0, %arg2 : i32, i32
  }
  func.func @transform_1(%arg0: i32, %arg1: i32, %arg2: i32) -> (i32, i32) {
    %c0_i32 = arith.constant 0 : i32
    return %arg2, %arg1 : i32, i32
  }
  func.func @transform_2(%arg0: i32, %arg1: i32, %arg2: i32) -> (i32, i32) {
    %c0_i32 = arith.constant 0 : i32
    %c0_i32_0 = arith.constant 0 : i32
    return %c0_i32, %arg2 : i32, i32
  }
  func.func @transform_3(%arg0: i32, %arg1: i32, %arg2: i32) -> (i32, i32) {
    %c0_i32 = arith.constant 0 : i32
    %c0_i32_0 = arith.constant 0 : i32
    return %c0_i32, %arg2 : i32, i32
  }
  func.func @transform_4(%arg0: i32, %arg1: i32, %arg2: i32) -> (i32, i32) {
    %c0_i32 = arith.constant 0 : i32
    %c0_i32_0 = arith.constant 0 : i32
    return %c0_i32, %arg1 : i32, i32
  }
  func.func @transform_5(%arg0: i32, %arg1: i32, %arg2: i32) -> (i32, i32) {
    %c0_i32 = arith.constant 0 : i32
    return %arg0, %arg1 : i32, i32
  }
}

module attributes {stable_mosaic.version = 11 : i64} {
  func.func @_matmul_kernel(%arg0: i32, %arg1: i32, %arg2: i32, %arg3: memref<32x512xbf16, #tpu.memory_space<vmem>>, %arg4: memref<512x128xbf16, #tpu.memory_space<vmem>>, %arg5: memref<1x128xf32, #tpu.memory_space<vmem>>, %arg6: memref<32x128xbf16, #tpu.memory_space<vmem>>, %arg7: memref<32x128xbf16, #tpu.memory_space<vmem>>, %arg8: memref<32x128xf32, #tpu.memory_space<vmem>>) attributes {dimension_semantics = [#tpu.dimension_semantics<parallel>, #tpu.dimension_semantics<parallel>, #tpu.dimension_semantics<arbitrary>], iteration_bounds = array<i64: 1, 1, 1>, scalar_prefetch = 0 : i64, scratch_operands = 1 : i64, tpu.core_type = #tpu.core_type<tc>, window_params = [{transform_indices = @transform_0, window_bounds = array<i64: 32, 512>}, {transform_indices = @transform_1, window_bounds = array<i64: 512, 128>}, {transform_indices = @transform_2, window_bounds = array<i64: 1, 128>}, {transform_indices = @transform_3, window_bounds = array<i64: 32, 128>}, {transform_indices = @transform_4, window_bounds = array<i64: 32, 128>}]} {
    %c0_i32 = arith.constant 0 : i32
    %0 = arith.cmpi eq, %arg2, %c0_i32 : i32
    %1 = arith.extui %0 : i1 to i32
    %c0_i32_0 = arith.constant 0 : i32
    %2 = arith.cmpi ne, %1, %c0_i32_0 : i32
    scf.if %2 {
      %cst_10 = arith.constant 0.000000e+00 : f32
      %12 = vector.broadcast %cst_10 : f32 to vector<32x128xf32>
      %c0_11 = arith.constant 0 : index
      %c0_12 = arith.constant 0 : index
      %13 = vector.load %arg8[%c0_11, %c0_12] : memref<32x128xf32, #tpu.memory_space<vmem>>, vector<32x128xf32>
      tpu.vector_store %arg8[%c0_11, %c0_12], %12 {strides = array<i32>} : memref<32x128xf32, #tpu.memory_space<vmem>>, vector<32x128xf32>,
    } else {
    }
    %c0 = arith.constant 0 : index
    %c0_1 = arith.constant 0 : index
    %3 = vector.load %arg3[%c0, %c0_1] : memref<32x512xbf16, #tpu.memory_space<vmem>>, vector<32x512xbf16>
    %c0_2 = arith.constant 0 : index
    %c0_3 = arith.constant 0 : index
    %4 = vector.load %arg8[%c0_2, %c0_3] : memref<32x128xf32, #tpu.memory_space<vmem>>, vector<32x128xf32>
    %c0_4 = arith.constant 0 : index
    %c0_5 = arith.constant 0 : index
    %5 = vector.load %arg4[%c0_4, %c0_5] : memref<512x128xbf16, #tpu.memory_space<vmem>>, vector<512x128xbf16>
    %cst = arith.constant dense<0.000000e+00> : vector<32x128xf32>
    %6 = tpu.matmul %3, %5, %cst {dimension_numbers = #tpu.dot_dimension_numbers<[1], [0], [0], [1], [0, 0, 1, 1], [], []>} : vector<32x512xbf16>, vector<512x128xbf16>, vector<32x128xf32> -> vector<32x128xf32>
    %7 = arith.addf %4, %6 : vector<32x128xf32>
    %c0_6 = arith.constant 0 : index
    %c0_7 = arith.constant 0 : index
    %8 = vector.load %arg8[%c0_6, %c0_7] : memref<32x128xf32, #tpu.memory_space<vmem>>, vector<32x128xf32>
    tpu.vector_store %arg8[%c0_6, %c0_7], %7 {strides = array<i32>} : memref<32x128xf32, #tpu.memory_space<vmem>>, vector<32x128xf32>,
    %c0_i32_8 = arith.constant 0 : i32
    %9 = arith.cmpi eq, %arg2, %c0_i32_8 : i32
    %10 = arith.extui %9 : i1 to i32
    %c0_i32_9 = arith.constant 0 : i32
    %11 = arith.cmpi ne, %10, %c0_i32_9 : i32
    scf.if %11 {
      %c0_10 = arith.constant 0 : index
      %c0_11 = arith.constant 0 : index
      %12 = vector.load %arg8[%c0_10, %c0_11] : memref<32x128xf32, #tpu.memory_space<vmem>>, vector<32x128xf32>
      %c0_12 = arith.constant 0 : index
      %c0_13 = arith.constant 0 : index
      %13 = vector.load %arg5[%c0_12, %c0_13] : memref<1x128xf32, #tpu.memory_space<vmem>>, vector<1x128xf32>
      %14 = vector.broadcast %13 : vector<1x128xf32> to vector<32x128xf32>
      %15 = arith.addf %12, %14 : vector<32x128xf32>
      %c0_14 = arith.constant 0 : index
      %c0_15 = arith.constant 0 : index
      %16 = vector.load %arg6[%c0_14, %c0_15] : memref<32x128xbf16, #tpu.memory_space<vmem>>, vector<32x128xbf16>
      %17 = arith.extf %16 : vector<32x128xbf16> to vector<32x128xf32>
      %18 = arith.addf %15, %17 : vector<32x128xf32>
      %19 = arith.truncf %18 : vector<32x128xf32> to vector<32x128xbf16>
      %c0_16 = arith.constant 0 : index
      %c0_17 = arith.constant 0 : index
      %20 = vector.load %arg7[%c0_16, %c0_17] : memref<32x128xbf16, #tpu.memory_space<vmem>>, vector<32x128xbf16>
      tpu.vector_store %arg7[%c0_16, %c0_17], %19 {strides = array<i32>} : memref<32x128xbf16, #tpu.memory_space<vmem>>, vector<32x128xbf16>,
    } else {
    }
    return
  }
  func.func @transform_0(%arg0: i32, %arg1: i32, %arg2: i32) -> (i32, i32) {
    %c0_i32 = arith.constant 0 : i32
    return %arg0, %arg2 : i32, i32
  }
  func.func @transform_1(%arg0: i32, %arg1: i32, %arg2: i32) -> (i32, i32) {
    %c0_i32 = arith.constant 0 : i32
    return %arg2, %arg1 : i32, i32
  }
  func.func @transform_2(%arg0: i32, %arg1: i32, %arg2: i32) -> (i32, i32) {
    %c0_i32 = arith.constant 0 : i32
    %c0_i32_0 = arith.constant 0 : i32
    return %c0_i32, %arg1 : i32, i32
  }
  func.func @transform_3(%arg0: i32, %arg1: i32, %arg2: i32) -> (i32, i32) {
    %c0_i32 = arith.constant 0 : i32
    return %arg0, %arg1 : i32, i32
  }
  func.func @transform_4(%arg0: i32, %arg1: i32, %arg2: i32) -> (i32, i32) {
    %c0_i32 = arith.constant 0 : i32
    return %arg0, %arg1 : i32, i32
  }
}

module attributes {stable_mosaic.version = 11 : i64} {
  func.func @_matmul_kernel(%arg0: i32, %arg1: i32, %arg2: i32, %arg3: memref<32x128xbf16, #tpu.memory_space<vmem>>, %arg4: memref<128x512xbf16, #tpu.memory_space<vmem>>, %arg5: memref<1x128xf32, #tpu.memory_space<vmem>>, %arg6: memref<1x128xf32, #tpu.memory_space<vmem>>, %arg7: memref<32x512xf32, #tpu.memory_space<vmem>>, %arg8: memref<32x512xf32, #tpu.memory_space<vmem>>) attributes {dimension_semantics = [#tpu.dimension_semantics<parallel>, #tpu.dimension_semantics<parallel>, #tpu.dimension_semantics<arbitrary>], iteration_bounds = array<i64: 1, 1, 1>, scalar_prefetch = 0 : i64, scratch_operands = 1 : i64, tpu.core_type = #tpu.core_type<tc>, window_params = [{transform_indices = @transform_0, window_bounds = array<i64: 32, 128>}, {transform_indices = @transform_1, window_bounds = array<i64: 128, 512>}, {transform_indices = @transform_2, window_bounds = array<i64: 1, 128>}, {transform_indices = @transform_3, window_bounds = array<i64: 1, 128>}, {transform_indices = @transform_4, window_bounds = array<i64: 32, 512>}]} {
    %c0_i32 = arith.constant 0 : i32
    %0 = arith.cmpi eq, %arg2, %c0_i32 : i32
    %1 = arith.extui %0 : i1 to i32
    %c0_i32_0 = arith.constant 0 : i32
    %2 = arith.cmpi ne, %1, %c0_i32_0 : i32
    scf.if %2 {
      %cst_19 = arith.constant 0.000000e+00 : f32
      %38 = vector.broadcast %cst_19 : f32 to vector<32x512xf32>
      %c0_20 = arith.constant 0 : index
      %c0_21 = arith.constant 0 : index
      %39 = vector.load %arg8[%c0_20, %c0_21] : memref<32x512xf32, #tpu.memory_space<vmem>>, vector<32x512xf32>
      tpu.vector_store %arg8[%c0_20, %c0_21], %38 {strides = array<i32>} : memref<32x512xf32, #tpu.memory_space<vmem>>, vector<32x512xf32>,
    } else {
    }
    %c0 = arith.constant 0 : index
    %c0_1 = arith.constant 0 : index
    %3 = vector.load %arg3[%c0, %c0_1] : memref<32x128xbf16, #tpu.memory_space<vmem>>, vector<32x128xbf16>
    %4 = arith.extf %3 : vector<32x128xbf16> to vector<32x128xf32>
    %cst = arith.constant dense<0.000000e+00> : vector<32xf32>
    %5 = vector.multi_reduction <add>, %4, %cst [1] : vector<32x128xf32> to vector<32xf32>
    %6 = vector.shape_cast %5 : vector<32xf32> to vector<32x1xf32>
    %cst_2 = arith.constant 1.280000e+02 : f32
    %7 = vector.broadcast %cst_2 : f32 to vector<32x1xf32>
    %8 = arith.divf %6, %7 : vector<32x1xf32>
    %9 = vector.broadcast %8 : vector<32x1xf32> to vector<32x128xf32>
    %10 = arith.subf %4, %9 : vector<32x128xf32>
    %11 = arith.mulf %10, %10 : vector<32x128xf32>
    %cst_3 = arith.constant dense<0.000000e+00> : vector<32xf32>
    %12 = vector.multi_reduction <add>, %11, %cst_3 [1] : vector<32x128xf32> to vector<32xf32>
    %13 = vector.shape_cast %12 : vector<32xf32> to vector<32x1xf32>
    %cst_4 = arith.constant 1.280000e+02 : f32
    %14 = vector.broadcast %cst_4 : f32 to vector<32x1xf32>
    %15 = arith.divf %13, %14 : vector<32x1xf32>
    %16 = vector.broadcast %8 : vector<32x1xf32> to vector<32x128xf32>
    %17 = arith.subf %4, %16 : vector<32x128xf32>
    %cst_5 = arith.constant 9.99999974E-6 : f32
    %18 = vector.broadcast %cst_5 : f32 to vector<32x1xf32>
    %19 = arith.addf %15, %18 : vector<32x1xf32>
    %20 = math.rsqrt %19 : vector<32x1xf32>
    %21 = vector.broadcast %20 : vector<32x1xf32> to vector<32x128xf32>
    %22 = arith.mulf %17, %21 : vector<32x128xf32>
    %c0_6 = arith.constant 0 : index
    %c0_7 = arith.constant 0 : index
    %23 = vector.load %arg5[%c0_6, %c0_7] : memref<1x128xf32, #tpu.memory_space<vmem>>, vector<1x128xf32>
    %24 = vector.broadcast %23 : vector<1x128xf32> to vector<32x128xf32>
    %25 = arith.mulf %22, %24 : vector<32x128xf32>
    %c0_8 = arith.constant 0 : index
    %c0_9 = arith.constant 0 : index
    %26 = vector.load %arg6[%c0_8, %c0_9] : memref<1x128xf32, #tpu.memory_space<vmem>>, vector<1x128xf32>
    %27 = vector.broadcast %26 : vector<1x128xf32> to vector<32x128xf32>
    %28 = arith.addf %25, %27 : vector<32x128xf32>
    %29 = arith.truncf %28 : vector<32x128xf32> to vector<32x128xbf16>
    %c0_10 = arith.constant 0 : index
    %c0_11 = arith.constant 0 : index
    %30 = vector.load %arg8[%c0_10, %c0_11] : memref<32x512xf32, #tpu.memory_space<vmem>>, vector<32x512xf32>
    %c0_12 = arith.constant 0 : index
    %c0_13 = arith.constant 0 : index
    %31 = vector.load %arg4[%c0_12, %c0_13] : memref<128x512xbf16, #tpu.memory_space<vmem>>, vector<128x512xbf16>
    %cst_14 = arith.constant dense<0.000000e+00> : vector<32x512xf32>
    %32 = tpu.matmul %29, %31, %cst_14 {dimension_numbers = #tpu.dot_dimension_numbers<[1], [0], [0], [1], [0, 0, 1, 1], [], []>} : vector<32x128xbf16>, vector<128x512xbf16>, vector<32x512xf32> -> vector<32x512xf32>
    %33 = arith.addf %30, %32 : vector<32x512xf32>
    %c0_15 = arith.constant 0 : index
    %c0_16 = arith.constant 0 : index
    %34 = vector.load %arg8[%c0_15, %c0_16] : memref<32x512xf32, #tpu.memory_space<vmem>>, vector<32x512xf32>
    tpu.vector_store %arg8[%c0_15, %c0_16], %33 {strides = array<i32>} : memref<32x512xf32, #tpu.memory_space<vmem>>, vector<32x512xf32>,
    %c0_i32_17 = arith.constant 0 : i32
    %35 = arith.cmpi eq, %arg2, %c0_i32_17 : i32
    %36 = arith.extui %35 : i1 to i32
    %c0_i32_18 = arith.constant 0 : i32
    %37 = arith.cmpi ne, %36, %c0_i32_18 : i32
    scf.if %37 {
      %c0_19 = arith.constant 0 : index
      %c0_20 = arith.constant 0 : index
      %38 = vector.load %arg8[%c0_19, %c0_20] : memref<32x512xf32, #tpu.memory_space<vmem>>, vector<32x512xf32>
      %c0_21 = arith.constant 0 : index
      %c0_22 = arith.constant 0 : index
      %39 = vector.load %arg7[%c0_21, %c0_22] : memref<32x512xf32, #tpu.memory_space<vmem>>, vector<32x512xf32>
      tpu.vector_store %arg7[%c0_21, %c0_22], %38 {strides = array<i32>} : memref<32x512xf32, #tpu.memory_space<vmem>>, vector<32x512xf32>,
    } else {
    }
    return
  }
  func.func @transform_0(%arg0: i32, %arg1: i32, %arg2: i32) -> (i32, i32) {
    %c0_i32 = arith.constant 0 : i32
    return %arg0, %arg2 : i32, i32
  }
  func.func @transform_1(%arg0: i32, %arg1: i32, %arg2: i32) -> (i32, i32) {
    %c0_i32 = arith.constant 0 : i32
    return %arg2, %arg1 : i32, i32
  }
  func.func @transform_2(%arg0: i32, %arg1: i32, %arg2: i32) -> (i32, i32) {
    %c0_i32 = arith.constant 0 : i32
    %c0_i32_0 = arith.constant 0 : i32
    return %c0_i32, %arg2 : i32, i32
  }
  func.func @transform_3(%arg0: i32, %arg1: i32, %arg2: i32) -> (i32, i32) {
    %c0_i32 = arith.constant 0 : i32
    %c0_i32_0 = arith.constant 0 : i32
    return %c0_i32, %arg2 : i32, i32
  }
  func.func @transform_4(%arg0: i32, %arg1: i32, %arg2: i32) -> (i32, i32) {
    %c0_i32 = arith.constant 0 : i32
    return %arg0, %arg1 : i32, i32
  }
}

</mosaic_0001>

<bundles_post_ra>
// kernel: gpt1d_forward.13
= control target key start
LH: loop header
LB: loop body
LE: loop exit
PB: predicated region body
PF: predicated region fallthrough
CT: control target
= control target key end

     0   :  { %9 = vsyncpa [#allocation4], 0  ;;  %s612_s0 = inlined_call_operand.hbm [shape: bf16[32,128], index: 0, kind: input, shape index: {}]   ;;  %s613_s1 = inlined_call_operand.hbm [shape: bf16[128,128], index: 1, kind: input, shape index: {}]   ;;  %s614_s2 = inlined_call_operand.hbm [shape: f32[1,128], index: 2, kind: input, shape index: {}]   ;;  %s615_s3 = inlined_call_operand.hbm [shape: bf16[32,128], index: 3, kind: input, shape index: {}]   ;;  %s616_s4 = inlined_call_operand.hbm [shape: bf16[32,128], index: 4, kind: output, shape index: {}]  }
   0x1   :  { %10 = vsyncpa [#allocation7], 0 }
   0x2   :  { %11 = vsyncpa [#allocation10], 0 }
   0x3   :  { %12 = vsyncpa [#allocation5], 0  ;;  %s494_s15 = smov [#allocation6]   ;;  %s495_s17 = smov [#allocation3]  }
   0x4   :  { %s30_s16 = sshll.u32 %s494_s15, 4  ;;  %s18_s18 = sshll.u32 %s495_s17, 4  ;;  %s31_s16 = int_to_ptr.vmem [resolvable:$true] %s30_s16  ;;  %s526_s18 = int_to_ptr.vmem [resolvable:$true] %s18_s18 }
   0x5   :  { %s376_s21 = scalar_lea.hbm %s613_s1, 1024 }
   0x6   :  { %p377_p0 = scmp.ne.s32.totalorder %s613_s1, %s376_s21  ;;  %p380_p1 = scmp.lt.u32.totalorder %s376_s21, %s613_s1 }
   0x8   :  { %p382_p2 = pnand %p380_p1, %p377_p0 }
   0xa   :  { %385 = shalt.err (!%p382_p2)
}
   0xb   :  { %s386_s26 = scalar_lea.vmem %s31_s16, 1024  ;;  %p391_p4 = scmp.lt.s32.totalorder %s31_s16, %s31_s16 }
   0xc   :  { %p387_p3 = scmp.ne.s32.totalorder %s31_s16, %s386_s26  ;;  %p392_p5 = scmp.lt.s32.totalorder %s386_s26, %s386_s26 }
   0xe   :  { %p393_p6 = por %p392_p5, %p391_p4 }
  0x10   :  { %p394_p7 = pnand %p393_p6, %p387_p3 }
  0x12   :  { %397 = shalt.err (!%p394_p7)
}
  0x13   :  { %s496_s27 = smov 64   ;;  %s497_s28 = smov 4  }
  0x14   :  { %36 = dma.hbm_to_vmem [thread:$0]  %s613_s1, 1024, %s31_s16, [#allocation7], %s496_s27, %s496_s27, %s497_s28  }
  0x15   :  { %s398_s7 = scalar_lea.hbm %s612_s0, 256 }
  0x16   :  { %p399_p8 = scmp.ne.s32.totalorder %s612_s0, %s398_s7  ;;  %p402_p9 = scmp.lt.u32.totalorder %s398_s7, %s612_s0 }
  0x18   :  { %p404_p10 = pnand %p402_p9, %p399_p8 }
  0x1a   :  { %407 = shalt.err (!%p404_p10)
}
  0x1b   :  { %s408_s12 = scalar_lea.vmem %s526_s18, 256  ;;  %p413_p12 = scmp.lt.s32.totalorder %s526_s18, %s526_s18 }
  0x1c   :  { %p409_p11 = scmp.ne.s32.totalorder %s526_s18, %s408_s12  ;;  %p414_p13 = scmp.lt.s32.totalorder %s408_s12, %s408_s12 }
  0x1e   :  { %p415_p0 = por %p414_p13, %p413_p12 }
  0x20   :  { %p416_p1 = pnand %p415_p0, %p409_p11 }
  0x22   :  { %419 = shalt.err (!%p416_p1)
}
  0x23   :  { %24 = dma.hbm_to_vmem [thread:$0]  %s612_s0, 256, %s526_s18, [#allocation4], %s496_s27, %s496_s27, %s497_s28  }
  0x24   :  { %s498_s14 = smov [#allocation8]   ;;  %s499_s16 = smov [#allocation9]  }
  0x25   :  { %s43_s15 = sshll.u32 %s498_s14, 4  ;;  %s52_s17 = sshll.u32 %s499_s16, 4  ;;  %s44_s15 = int_to_ptr.vmem [resolvable:$true] %s43_s15  ;;  %s563_s17 = int_to_ptr.vmem [resolvable:$true] %s52_s17 }
  0x26   :  { %s420_s21 = scalar_lea.hbm %s614_s2, 16 }
  0x27   :  { %p421_p2 = scmp.ne.s32.totalorder %s614_s2, %s420_s21  ;;  %p424_p3 = scmp.lt.u32.totalorder %s420_s21, %s614_s2 }
  0x29   :  { %p426_p4 = pnand %p424_p3, %p421_p2 }
  0x2b   :  { %429 = shalt.err (!%p426_p4)
}
  0x2c   :  { %s430_s0 = scalar_lea.vmem %s44_s15, 16  ;;  %s434_s18 = scalar_lea.vmem %s44_s15, 32 }
  0x2d   :  { %p431_p5 = scmp.ne.s32.totalorder %s44_s15, %s430_s0  ;;  %p435_p6 = scmp.lt.s32.totalorder %s44_s15, %s44_s15 }
  0x2e   :  { %p436_p7 = scmp.lt.s32.totalorder %s434_s18, %s430_s0 }
  0x30   :  { %p437_p8 = por %p436_p7, %p435_p6 }
  0x32   :  { %p438_p9 = pnand %p437_p8, %p431_p5 }
  0x34   :  { %441 = shalt.err (!%p438_p9)
}
  0x35   :  { %46 = dma.hbm_to_vmem [thread:$0]  %s614_s2, 16, %s44_s15, [#allocation7]  }
  0x36   :  { %s442_s6 = scalar_lea.hbm %s615_s3, 256 }
  0x37   :  { %p443_p10 = scmp.ne.s32.totalorder %s615_s3, %s442_s6  ;;  %p446_p11 = scmp.lt.u32.totalorder %s442_s6, %s615_s3 }
  0x39   :  { %p448_p12 = pnand %p446_p11, %p443_p10 }
  0x3b   :  { %451 = shalt.err (!%p448_p12)
}
  0x3c   :  { %s452_s11 = scalar_lea.vmem %s563_s17, 256  ;;  %p457_p0 = scmp.lt.s32.totalorder %s563_s17, %s563_s17 }
  0x3d   :  { %p453_p13 = scmp.ne.s32.totalorder %s563_s17, %s452_s11  ;;  %p458_p1 = scmp.lt.s32.totalorder %s452_s11, %s452_s11 }
  0x3f   :  { %p459_p2 = por %p458_p1, %p457_p0 }
  0x41   :  { %p460_p3 = pnand %p459_p2, %p453_p13 }
  0x43   :  { %463 = shalt.err (!%p460_p3)
}
  0x44   :  { %58 = dma.hbm_to_vmem [thread:$0]  %s615_s3, 256, %s563_s17, [#allocation10], %s496_s27, %s496_s27, %s497_s28  }
  0x45   :  { %486 = dma.done.wait [#allocation4], 256  }
  0x46   :  { %487 = vsyncadd [#allocation4], 4294967040 }
  0x47   :  { %488 = dma.done.wait [#allocation7], 1040  }
  0x48   :  { %489 = vsyncadd [#allocation7], 4294966256 }
  0x49   :  { %490 = dma.done.wait [#allocation10], 256  }
  0x4a   :  { %491 = vsyncadd [#allocation10], 4294967040  ;;  %v366_v0 = vld [vmem:[#allocation6] sm:$0xff]   ;;  %v367_v1 = vld [vmem:[#allocation6 + $0x8] sm:$0xff]   ;;  %s500_s3 = smov [#allocation11]  }
  0x4b   :  { %339 = vmatprep.subr.bf16.mxu0 %v366_v0  ;;  %v368_v2 = vld [vmem:[#allocation6 + $0x10] sm:$0xff]   ;;  %v369_v3 = vld [vmem:[#allocation6 + $0x18] sm:$0xff]   ;;  %v370_v5 = vld [vmem:[#allocation6 + $0x20] sm:$0xff]   ;;  %s276_s1 = sshll.u32 %s500_s3, 4  ;;  %s277_s1 = int_to_ptr.vmem [resolvable:$true] %s276_s1 }
  0x4c   :  { %340 = vmatpush3.bf16.msra.mxu0 %v366_v0  ;;  %v374_v4 = vld [vmem:[#allocation3] sm:$0xff]   ;;  %v371_v6 = vld [vmem:[#allocation6 + $0x28] sm:$0xff]   ;;  %v373_v8 = vld [vmem:[#allocation6 + $0x38] sm:$0xff]   ;;  %s464_s13 = scalar_lea.vmem %s277_s1, 256  ;;  %p469_p5 = scmp.lt.s32.totalorder %s277_s1, %s277_s1 }
  0x4d   :  { %341 = vmatprep.subr.bf16.mxu0 %v367_v1  ;;  %355 = vmatprep.mubr.bf16.mxu0 %v374_v4  ;;  %v372_v7 = vld [vmem:[#allocation6 + $0x30] sm:$0xff]   ;;  %v375_v9 = vld [vmem:[#allocation3 + $0x8] sm:$0xff]   ;;  %v300_v10 = vld [vmem:[#allocation8] ss:$0 sm:$0xff]  ;;  %p465_p4 = scmp.ne.s32.totalorder %s277_s1, %s464_s13  ;;  %p470_p6 = scmp.lt.s32.totalorder %s464_s13, %s464_s13 }
  0x4e   :  { %v327_v11 = vld [vmem:[#allocation9 + $0x8] sm:$0xff]   ;;  %v310_v12 = vld [vmem:[#allocation9] sm:$0xff]  }
  0x4f   :  { %v315_v15 = vunpack.c.l.bf16 %v327_v11  ;;  %v316_v17 = vunpack.c.h.bf16 %v327_v11  ;;  %v311_v19 = vunpack.c.l.bf16 %v310_v12  ;;  %v312_v21 = vunpack.c.h.bf16 %v310_v12  ;;  %p471_p7 = por %p470_p6, %p469_p5 }
  0x50   :  { %342 = vmatpush3.bf16.msra.mxu0 %v367_v1 }
  0x51   :  { %343 = vmatprep.subr.bf16.mxu0 %v368_v2  ;;  %p472_p8 = pnand %p471_p7, %p465_p4 }
  0x54   :  { %344 = vmatpush3.bf16.msra.mxu0 %v368_v2 }
  0x55   :  { %345 = vmatprep.subr.bf16.mxu0 %v369_v3 }
  0x58   :  { %346 = vmatpush3.bf16.msra.mxu0 %v369_v3 }
  0x59   :  { %347 = vmatprep.subr.bf16.mxu0 %v370_v5 }
  0x5c   :  { %348 = vmatpush3.bf16.msra.mxu0 %v370_v5 }
  0x5d   :  { %349 = vmatprep.subr.bf16.mxu0 %v371_v6 }
  0x60   :  { %350 = vmatpush3.bf16.msra.mxu0 %v371_v6 }
  0x61   :  { %351 = vmatprep.subr.bf16.mxu0 %v372_v7 }
  0x64   :  { %352 = vmatpush3.bf16.msra.mxu0 %v372_v7 }
  0x65   :  { %353 = vmatprep.subr.bf16.mxu0 %v373_v8 }
  0x68   :  { %354 = vmatpush3.bf16.msra.mxu0 %v373_v8 }
  0x6b   :  { %356 = vmatmul.mubr.bf16.vlgmr.msra.gmra.mrb[0].mxu0 %v375_v9 }
 0x13e   :  { %v357_v13 = vpop.f32.mrb[0].mxu0 }
 0x13f   :  { %v237_v14 = vadd.f32 %v357_v13, %v300_v10  ;;  %v198_v16 = vpop.f32.mrb[1].mxu0 }
 0x140   :  { %v235_v18 = vadd.f32 %v300_v10, %v198_v16  ;;  %v358_v20 = vpop.f32.mrb[2].mxu0 }
 0x141   :  { %v238_v22 = vadd.f32 %v358_v20, %v300_v10  ;;  %v201_v23 = vpop.f32.mrb[3].mxu0  ;;  %v249_v25 = vadd.f32 %v315_v15, %v237_v14 }
 0x142   :  { %v236_v24 = vadd.f32 %v300_v10, %v201_v23  ;;  %v247_v27 = vadd.f32 %v311_v19, %v235_v18 }
 0x143   :  { %v250_v26 = vadd.f32 %v316_v17, %v238_v22 }
 0x144   :  { %v248_v28 = vadd.f32 %v312_v21, %v236_v24 }
 0x145   :  { %v325_v29 = vpack.c.bf16 %v250_v26, %v249_v25 }
 0x146   :  { %v320_v30 = vpack.c.bf16 %v248_v28, %v247_v27 }
 0x147   :  { %328 = vst [vmem:[#allocation11 + $0x8] sm:$0xff] %v325_v29  }
 0x148   :  { %321 = vst [vmem:[#allocation11] sm:$0xff] %v320_v30  }
 0x149   :  { %475 = shalt.err (!%p472_p8)
}
 0x14a   :  { %s476_s16 = scalar_lea.hbm %s616_s4, 256 }
 0x14b   :  { %p477_p9 = scmp.ne.s32.totalorder %s616_s4, %s476_s16  ;;  %p480_p10 = scmp.lt.u32.totalorder %s476_s16, %s616_s4 }
 0x14d   :  { %p482_p11 = pnand %p480_p10, %p477_p9 }
 0x14f   :  { %485 = shalt.err (!%p482_p11)
}
 0x150   :  { %282 = dma.vmem_to_hbm [thread:$0]  %s277_s1, 256, %s616_s4, [#allocation5], %s496_s27, %s496_s27, %s497_s28  }
 0x151   :  { %492 = dma.done.wait [#allocation5], 256  }
 0x152   :  { %493 = vsyncadd [#allocation5], 4294967040 }
 0x153   :  { %286 = vsyncpa [#allocation4], 1 }
 0x154   :  { %287 = vsyncpa [#allocation7], 1 }
 0x155   :  { %288 = vsyncpa [#allocation10], 1 }
 0x156   :  { %289 = vsyncpa [#allocation5], 1 }

// kernel: gpt1d_forward.11
= control target key start
LH: loop header
LB: loop body
LE: loop exit
PB: predicated region body
PF: predicated region fallthrough
CT: control target
= control target key end

     0   :  { %10 = vsyncpa [#allocation4], 0  ;;  %s997_s0 = inlined_call_operand.hbm [shape: bf16[32,128], index: 0, kind: input, shape index: {}]   ;;  %s998_s1 = inlined_call_operand.hbm [shape: bf16[128,384], index: 1, kind: input, shape index: {}]   ;;  %s999_s2 = inlined_call_operand.hbm [shape: f32[1,128], index: 2, kind: input, shape index: {}]   ;;  %s1000_s3 = inlined_call_operand.hbm [shape: f32[1,128], index: 3, kind: input, shape index: {}]   ;;  %s1001_s4 = inlined_call_operand.hbm [shape: f32[1,384], index: 4, kind: input, shape index: {}]   ;;  %s1002_s5 = inlined_call_operand.hbm [shape: bf16[32,384], index: 5, kind: output, shape index: {}]  }
   0x1   :  { %11 = vsyncpa [#allocation7], 0 }
   0x2   :  { %12 = vsyncpa [#allocation10], 0 }
   0x3   :  { %13 = vsyncpa [#allocation5], 0  ;;  %s858_s18 = smov [#allocation6]   ;;  %s718_s22 = scalar_lea.hbm %s998_s1, 3072 }
   0x4   :  { %s31_s19 = sshll.u32 %s858_s18, 4  ;;  %p719_p0 = scmp.ne.s32.totalorder %s998_s1, %s718_s22  ;;  %s32_s19 = int_to_ptr.vmem [resolvable:$true] %s31_s19 }
   0x5   :  { %p722_p1 = scmp.lt.u32.totalorder %s718_s22, %s998_s1 }
   0x7   :  { %p724_p2 = pnand %p722_p1, %p719_p0 }
   0x9   :  { %727 = shalt.err (!%p724_p2)
}
   0xa   :  { %s728_s27 = scalar_lea.vmem %s32_s19, 3072  ;;  %p733_p4 = scmp.lt.s32.totalorder %s32_s19, %s32_s19 }
   0xb   :  { %p729_p3 = scmp.ne.s32.totalorder %s32_s19, %s728_s27  ;;  %p734_p5 = scmp.lt.s32.totalorder %s728_s27, %s728_s27 }
   0xd   :  { %p735_p6 = por %p734_p5, %p733_p4 }
   0xf   :  { %p736_p7 = pnand %p735_p6, %p729_p3 }
  0x11   :  { %739 = shalt.err (!%p736_p7)
}
  0x12   :  { %s859_s28 = smov 192   ;;  %s860_s29 = smov 12  }
  0x13   :  { %37 = dma.hbm_to_vmem [thread:$0]  %s998_s1, 3072, %s32_s19, [#allocation7], %s859_s28, %s859_s28, %s860_s29  }
  0x14   :  { %s861_s7 = smov [#allocation9]   ;;  %s862_s9 = smov [#allocation3]  }
  0x15   :  { %s54_s8 = sshll.u32 %s861_s7, 4  ;;  %s19_s10 = sshll.u32 %s862_s9, 4  ;;  %s55_s8 = int_to_ptr.vmem [resolvable:$true] %s54_s8  ;;  %s20_s10 = int_to_ptr.vmem [resolvable:$true] %s19_s10 }
  0x16   :  { %s740_s13 = scalar_lea.hbm %s1000_s3, 16 }
  0x17   :  { %p741_p8 = scmp.ne.s32.totalorder %s1000_s3, %s740_s13  ;;  %p744_p9 = scmp.lt.u32.totalorder %s740_s13, %s1000_s3 }
  0x19   :  { %p746_p10 = pnand %p744_p9, %p741_p8 }
  0x1b   :  { %749 = shalt.err (!%p746_p10)
}
  0x1c   :  { %s750_s1 = scalar_lea.vmem %s55_s8, 16  ;;  %s754_s18 = scalar_lea.vmem %s55_s8, 32 }
  0x1d   :  { %p751_p11 = scmp.ne.s32.totalorder %s55_s8, %s750_s1  ;;  %p755_p12 = scmp.lt.s32.totalorder %s55_s8, %s55_s8 }
  0x1e   :  { %p756_p13 = scmp.lt.s32.totalorder %s754_s18, %s750_s1 }
  0x20   :  { %p757_p0 = por %p756_p13, %p755_p12 }
  0x22   :  { %p758_p1 = pnand %p757_p0, %p751_p11 }
  0x24   :  { %761 = shalt.err (!%p758_p1)
}
  0x25   :  { %57 = dma.hbm_to_vmem [thread:$0]  %s1000_s3, 16, %s55_s8, [#allocation10]  }
  0x26   :  { %s762_s23 = scalar_lea.hbm %s997_s0, 256 }
  0x27   :  { %p763_p2 = scmp.ne.s32.totalorder %s997_s0, %s762_s23  ;;  %p766_p3 = scmp.lt.u32.totalorder %s762_s23, %s997_s0 }
  0x29   :  { %p768_p4 = pnand %p766_p3, %p763_p2 }
  0x2b   :  { %771 = shalt.err (!%p768_p4)
}
  0x2c   :  { %s772_s30 = scalar_lea.vmem %s20_s10, 256  ;;  %p777_p6 = scmp.lt.s32.totalorder %s20_s10, %s20_s10 }
  0x2d   :  { %p773_p5 = scmp.ne.s32.totalorder %s20_s10, %s772_s30  ;;  %p778_p7 = scmp.lt.s32.totalorder %s772_s30, %s772_s30 }
  0x2f   :  { %p779_p8 = por %p778_p7, %p777_p6 }
  0x31   :  { %p780_p9 = pnand %p779_p8, %p773_p5 }
  0x33   :  { %783 = shalt.err (!%p780_p9)
}
  0x34   :  { %s863_s3 = smov 64   ;;  %s864_s6 = smov 4  }
  0x35   :  { %25 = dma.hbm_to_vmem [thread:$0]  %s997_s0, 256, %s20_s10, [#allocation4], %s863_s3, %s863_s3, %s864_s6  }
  0x36   :  { %s865_s9 = smov [#allocation8]   ;;  %s866_s12 = smov [#allocation11]  }
  0x37   :  { %s44_s11 = sshll.u32 %s865_s9, 4  ;;  %s64_s13 = sshll.u32 %s866_s12, 4  ;;  %s45_s11 = int_to_ptr.vmem [resolvable:$true] %s44_s11  ;;  %s65_s13 = int_to_ptr.vmem [resolvable:$true] %s64_s13 }
  0x38   :  { %s784_s16 = scalar_lea.hbm %s999_s2, 16 }
  0x39   :  { %p785_p10 = scmp.ne.s32.totalorder %s999_s2, %s784_s16  ;;  %p788_p11 = scmp.lt.u32.totalorder %s784_s16, %s999_s2 }
  0x3b   :  { %p790_p12 = pnand %p788_p11, %p785_p10 }
  0x3d   :  { %793 = shalt.err (!%p790_p12)
}
  0x3e   :  { %s794_s0 = scalar_lea.vmem %s45_s11, 16  ;;  %s798_s10 = scalar_lea.vmem %s45_s11, 32 }
  0x3f   :  { %p795_p13 = scmp.ne.s32.totalorder %s45_s11, %s794_s0  ;;  %p799_p0 = scmp.lt.s32.totalorder %s45_s11, %s45_s11 }
  0x40   :  { %p800_p1 = scmp.lt.s32.totalorder %s798_s10, %s794_s0 }
  0x42   :  { %p801_p2 = por %p800_p1, %p799_p0 }
  0x44   :  { %p802_p3 = pnand %p801_p2, %p795_p13 }
  0x46   :  { %805 = shalt.err (!%p802_p3)
}
  0x47   :  { %47 = dma.hbm_to_vmem [thread:$0]  %s999_s2, 16, %s45_s11, [#allocation7]  }
  0x48   :  { %s806_s24 = scalar_lea.hbm %s1001_s4, 48 }
  0x49   :  { %p807_p4 = scmp.ne.s32.totalorder %s1001_s4, %s806_s24  ;;  %p810_p5 = scmp.lt.u32.totalorder %s806_s24, %s1001_s4 }
  0x4b   :  { %p812_p6 = pnand %p810_p5, %p807_p4 }
  0x4d   :  { %815 = shalt.err (!%p812_p6)
}
  0x4e   :  { %s816_s3 = scalar_lea.vmem %s65_s13, 48  ;;  %s820_s6 = scalar_lea.vmem %s65_s13, 64 }
  0x4f   :  { %p817_p7 = scmp.ne.s32.totalorder %s65_s13, %s816_s3  ;;  %p821_p8 = scmp.lt.s32.totalorder %s65_s13, %s65_s13 }
  0x50   :  { %p822_p9 = scmp.lt.s32.totalorder %s820_s6, %s816_s3 }
  0x52   :  { %p823_p10 = por %p822_p9, %p821_p8 }
  0x54   :  { %p824_p11 = pnand %p823_p10, %p817_p7 }
  0x56   :  { %827 = shalt.err (!%p824_p11)
}
  0x57   :  { %67 = dma.hbm_to_vmem [thread:$0]  %s1001_s4, 48, %s65_s13, [#allocation10]  }
  0x58   :  { %850 = dma.done.wait [#allocation4], 256  }
  0x59   :  { %851 = vsyncadd [#allocation4], 4294967040 }
  0x5a   :  { %852 = dma.done.wait [#allocation7], 3088  }
  0x5b   :  { %853 = vsyncadd [#allocation7], 4294964208 }
  0x5c   :  { %854 = dma.done.wait [#allocation10], 64  }
  0x5d   :  { %855 = vsyncadd [#allocation10], 4294967232  ;;  %v629_v0 = vld [vmem:[#allocation3] sm:$0xff]   ;;  %v636_v1 = vld [vmem:[#allocation3 + $0x8] sm:$0xff]   ;;  %v867_v41 = vmov 0   ;;  %s868_s4 = smov [#allocation12]  }
  0x5e   :  { %v630_v2 = vunpack.c.l.bf16 %v629_v0  ;;  %v634_v3 = vunpack.c.l.bf16 %v636_v1  ;;  %v631_v4 = vunpack.c.h.bf16 %v629_v0  ;;  %v635_v5 = vunpack.c.h.bf16 %v636_v1  ;;  %v678_v6 = vld [vmem:[#allocation6 + $0x4] ss:$12 sps:$4 sm:$0xff]   ;;  %v680_v7 = vld [vmem:[#allocation6] ss:$12 sps:$4 sm:$0xff]   ;;  %v681_v8 = vld [vmem:[#allocation6 + $0x1c] ss:$12 sps:$4 sm:$0xff]   ;;  %381 = vmatprep.mubr.bf16.mxu0 %v867_v41 }
  0x5f   :  { %v683_v9 = vld [vmem:[#allocation6 + $0x8] ss:$12 sps:$4 sm:$0xff]   ;;  %349 = vmatprep.subr.bf16.mxu0 %v678_v6  ;;  %v684_v26 = vld [vmem:[#allocation6 + $0x18] ss:$12 sps:$4 sm:$0xff]   ;;  %v687_v28 = vld [vmem:[#allocation6 + $0x20] ss:$12 sps:$4 sm:$0xff]  }
  0x60   :  { %108 = vadd.xlane.f32.xlu0 %v630_v2  ;;  %112 = vadd.xlane.f32.xlu1 %v634_v3  ;;  %v685_v27 = vld [vmem:[#allocation6 + $0x34] ss:$12 sps:$4 sm:$0xff]   ;;  %v688_v29 = vld [vmem:[#allocation6 + $0x30] ss:$12 sps:$4 sm:$0xff]   ;;  %v689_v30 = vld [vmem:[#allocation6 + $0x4c] ss:$12 sps:$4 sm:$0xff]  }
  0x61   :  { %350 = vmatpush1.bf16.msra.mxu0 %v680_v7  ;;  %647 = vmatprep.subr.bf16.mxu1 %v683_v9  ;;  %v691_v31 = vld [vmem:[#allocation6 + $0x38] ss:$12 sps:$4 sm:$0xff]   ;;  %v692_v32 = vld [vmem:[#allocation6 + $0x48] ss:$12 sps:$4 sm:$0xff]   ;;  %v695_v34 = vld [vmem:[#allocation6 + $0x50] ss:$12 sps:$4 sm:$0xff]  }
  0x62   :  { %351 = vmatprep.subr.bf16.mxu0 %v681_v8  ;;  %648 = vmatpush3.bf16.msra.mxu1 %v683_v9  ;;  %v693_v33 = vld [vmem:[#allocation6 + $0x64] ss:$12 sps:$4 sm:$0xff]   ;;  %v696_v35 = vld [vmem:[#allocation6 + $0x60] ss:$12 sps:$4 sm:$0xff]   ;;  %v697_v36 = vld [vmem:[#allocation6 + $0x7c] ss:$12 sps:$4 sm:$0xff]  }
  0x63   :  { %649 = vmatprep.subr.bf16.mxu1 %v687_v28  ;;  %v699_v37 = vld [vmem:[#allocation6 + $0x68] ss:$12 sps:$4 sm:$0xff]   ;;  %v700_v38 = vld [vmem:[#allocation6 + $0x78] ss:$12 sps:$4 sm:$0xff]   ;;  %v703_v40 = vld [vmem:[#allocation6 + $0x80] ss:$12 sps:$4 sm:$0xff]  }
  0x64   :  { %110 = vadd.xlane.f32.xlu0 %v631_v4  ;;  %114 = vadd.xlane.f32.xlu1 %v635_v5  ;;  %v701_v39 = vld [vmem:[#allocation6 + $0x94] ss:$12 sps:$4 sm:$0xff]   ;;  %v704_v42 = vld [vmem:[#allocation6 + $0x90] ss:$12 sps:$4 sm:$0xff]   ;;  %v705_v43 = vld [vmem:[#allocation6 + $0xac] ss:$12 sps:$4 sm:$0xff]  }
  0x65   :  { %352 = vmatpush1.bf16.msra.mxu0 %v684_v26  ;;  %v707_v44 = vld [vmem:[#allocation6 + $0x98] ss:$12 sps:$4 sm:$0xff]   ;;  %v708_v45 = vld [vmem:[#allocation6 + $0xa8] ss:$12 sps:$4 sm:$0xff]   ;;  %v709_v46 = vld [vmem:[#allocation6 + $0xb0] ss:$12 sps:$4 sm:$0xff]  }
  0x66   :  { %353 = vmatprep.subr.bf16.mxu0 %v685_v27  ;;  %650 = vmatpush3.bf16.msra.mxu1 %v687_v28  ;;  %v586_v61 = vld [vmem:[#allocation8] ss:$0 sm:$0xff]  ;;  %s572_s8 = sshll.u32 %s868_s4, 4  ;;  %s573_s8 = int_to_ptr.vmem [resolvable:$true] %s572_s8 }
  0x67   :  { %651 = vmatprep.subr.bf16.mxu1 %v691_v31  ;;  %s828_s9 = scalar_lea.vmem %s573_s8, 768  ;;  %p833_p13 = scmp.lt.s32.totalorder %s573_s8, %s573_s8 }
  0x68   :  { %p829_p12 = scmp.ne.s32.totalorder %s573_s8, %s828_s9  ;;  %p834_p0 = scmp.lt.s32.totalorder %s828_s9, %s828_s9 }
  0x69   :  { %354 = vmatpush1.bf16.msra.mxu0 %v688_v29 }
  0x6a   :  { %355 = vmatprep.subr.bf16.mxu0 %v689_v30  ;;  %652 = vmatpush3.bf16.msra.mxu1 %v691_v31  ;;  %p835_p1 = por %p834_p0, %p833_p13 }
  0x6b   :  { %653 = vmatprep.subr.bf16.mxu1 %v695_v34 }
  0x6c   :  { %p836_p2 = pnand %p835_p1, %p829_p12 }
  0x6d   :  { %356 = vmatpush1.bf16.msra.mxu0 %v692_v32 }
  0x6e   :  { %357 = vmatprep.subr.bf16.mxu0 %v693_v33  ;;  %654 = vmatpush3.bf16.msra.mxu1 %v695_v34 }
  0x6f   :  { %655 = vmatprep.subr.bf16.mxu1 %v699_v37 }
  0x71   :  { %358 = vmatpush1.bf16.msra.mxu0 %v696_v35 }
  0x72   :  { %359 = vmatprep.subr.bf16.mxu0 %v697_v36  ;;  %656 = vmatpush3.bf16.msra.mxu1 %v699_v37 }
  0x73   :  { %657 = vmatprep.subr.bf16.mxu1 %v703_v40 }
  0x75   :  { %360 = vmatpush1.bf16.msra.mxu0 %v700_v38 }
  0x76   :  { %361 = vmatprep.subr.bf16.mxu0 %v701_v39  ;;  %658 = vmatpush3.bf16.msra.mxu1 %v703_v40 }
  0x77   :  { %659 = vmatprep.subr.bf16.mxu1 %v707_v44 }
  0x79   :  { %362 = vmatpush1.bf16.msra.mxu0 %v704_v42 }
  0x7a   :  { %363 = vmatprep.subr.bf16.mxu0 %v705_v43  ;;  %660 = vmatpush3.bf16.msra.mxu1 %v707_v44 }
  0x7b   :  { %661 = vmatprep.subr.bf16.mxu1 %v709_v46 }
  0x7d   :  { %364 = vmatpush1.bf16.msra.mxu0 %v708_v45 }
  0x7e   :  { %662 = vmatpush3.bf16.msra.mxu1 %v709_v46 }
  0xed   :  { %v109_v10 = vpop.xlane.xlu0 %108  ;;  %v113_v11 = vpop.xlane.xlu1 %112 }
  0xee   :  { %v117_v12 = vmul.f32 0.0078125, %v109_v10  ;;  %v119_v13 = vmul.f32 0.0078125, %v113_v11 }
  0xf0   :  { %v962_v14 = vsub.f32 %v630_v2, %v117_v12  ;;  %v964_v15 = vsub.f32 %v634_v3, %v119_v13  ;;  %v587_v2 = vld [vmem:[#allocation9] ss:$0 sm:$0xff] }
  0xf1   :  { %v111_v16 = vpop.xlane.xlu0 %110  ;;  %v115_v17 = vpop.xlane.xlu1 %114 }
  0xf2   :  { %v118_v18 = vmul.f32 0.0078125, %v111_v16  ;;  %v125_v19 = vmul.f32 %v962_v14, %v962_v14  ;;  %v120_v20 = vmul.f32 0.0078125, %v115_v17  ;;  %v127_v23 = vmul.f32 %v964_v15, %v964_v15 }
  0xf3   :  { %v492_v16 = vlaneseq }
  0xf4   :  { %v968_v21 = vsub.f32 %v631_v4, %v118_v18  ;;  %129 = vadd.xlane.f32.xlu0 %v125_v19  ;;  %v970_v22 = vsub.f32 %v635_v5, %v120_v20  ;;  %v490_v18 = vld [vmem:[#allocation11] sm:$0x7] }
  0xf5   :  { %v493_v17 = vshrl.u32 %v492_v16, 7 }
  0xf6   :  { %v126_v24 = vmul.f32 %v968_v21, %v968_v21  ;;  %v128_v25 = vmul.f32 %v970_v22, %v970_v22 }
  0xf7   :  { %v498_v19 = vsub.s32 1, %v493_v17 }
  0xf8   :  { %133 = vadd.xlane.f32.xlu0 %v127_v23  ;;  %131 = vadd.xlane.f32.xlu1 %v126_v24 }
  0xf9   :  { %v499_v23 = vrot.slane %v490_v18, %v498_v19 }
  0xfc   :  { %135 = vadd.xlane.f32.xlu1 %v128_v25 }
 0x181   :  { %v130_v47 = vpop.xlane.xlu0 %129 }
 0x182   :  { %v137_v48 = vmul.f32 0.0078125, %v130_v47 }
 0x184   :  { %v141_v49 = vadd.f32 1e-05, %v137_v48 }
 0x185   :  { %v132_v50 = vpop.xlane.xlu1 %131  ;;  %v134_v51 = vpop.xlane.xlu0 %133 }
 0x186   :  { %710 = vrsqrt.f32 %v141_v49  ;;  %v138_v52 = vmul.f32 0.0078125, %v132_v50  ;;  %v139_v53 = vmul.f32 0.0078125, %v134_v51 }
 0x188   :  { %v142_v54 = vadd.f32 1e-05, %v138_v52  ;;  %v143_v55 = vadd.f32 1e-05, %v139_v53 }
 0x189   :  { %v136_v56 = vpop.xlane.xlu1 %135 }
 0x18a   :  { %712 = vrsqrt.f32 %v142_v54  ;;  %v140_v57 = vmul.f32 0.0078125, %v136_v56 }
 0x18b   :  { %714 = vrsqrt.f32 %v143_v55 }
 0x18c   :  { %v144_v58 = vadd.f32 1e-05, %v140_v57 }
 0x18e   :  { %716 = vrsqrt.f32 %v144_v58 }
 0x190   :  { %v711_v59 = vpop.eup %710 }
 0x191   :  { %v149_v60 = vmul.f32 %v711_v59, %v962_v14 }
 0x193   :  { %v160_v1 = vmul.f32 %v586_v61, %v149_v60 }
 0x194   :  { %v713_v62 = vpop.eup %712 }
 0x195   :  { %v715_v63 = vpop.eup %714  ;;  %v150_v0 = vmul.f32 %v713_v62, %v968_v21  ;;  %v171_v6 = vadd.f32 %v587_v2, %v160_v1  ;;  %v502_v21 = vsub.s32 2, %v493_v17 }
 0x196   :  { %v151_v3 = vmul.f32 %v715_v63, %v964_v15  ;;  %v494_v15 = vsub.s32 0, %v493_v17 }
 0x197   :  { %v161_v4 = vmul.f32 %v586_v61, %v150_v0  ;;  %v503_v26 = vrot.slane %v490_v18, %v502_v21 }
 0x198   :  { %v717_v5 = vpop.eup %716  ;;  %v162_v9 = vmul.f32 %v586_v61, %v151_v3  ;;  %v495_v20 = vrot.slane %v490_v18, %v494_v15 }
 0x199   :  { %v172_v7 = vadd.f32 %v587_v2, %v161_v4  ;;  %v152_v8 = vmul.f32 %v717_v5, %v970_v22 }
 0x19a   :  { %v173_v12 = vadd.f32 %v587_v2, %v162_v9 }
 0x19b   :  { %v175_v10 = vpack.c.bf16 %v172_v7, %v171_v6  ;;  %v163_v11 = vmul.f32 %v586_v61, %v152_v8 }
 0x19d   :  { %382 = vmatmul.mubr.bf16.vlgmr.msra.gmra.mrb[0].mxu0 %v175_v10  ;;  %663 = vmatprep.mubr.bf16.mxu1 %v175_v10  ;;  %v174_v13 = vadd.f32 %v587_v2, %v163_v11 }
 0x19e   :  { %391 = vmatprep.mubr.bf16.mxu0 %v867_v41 }
 0x19f   :  { %v176_v14 = vpack.c.bf16 %v174_v13, %v173_v12 }
 0x1a1   :  { %664 = vmatmul.mubr.bf16.vlgmr.msra.gmra.mrb[0].mxu1 %v176_v14 }
 0x1a5   :  { %392 = vmatmul.mubr.bf16.gmra.mrb[4].mxu0 %v176_v14 }
 0x270   :  { %v383_v22 = vpop.f32.mrb[0].mxu0 }
 0x271   :  { %v507_v24 = vadd.f32 %v495_v20, %v383_v22  ;;  %v385_v25 = vpop.f32.mrb[1].mxu0 }
 0x272   :  { %v508_v27 = vadd.f32 %v499_v23, %v385_v25  ;;  %v387_v28 = vpop.f32.mrb[2].mxu0 }
 0x273   :  { %v510_v29 = vadd.f32 %v495_v20, %v387_v28  ;;  %v389_v30 = vpop.f32.mrb[3].mxu0 }
 0x274   :  { %v620_v31 = vpack.c.bf16 %v508_v27, %v507_v24  ;;  %v511_v32 = vadd.f32 %v499_v23, %v389_v30  ;;  %v665_v33 = vpop.f32.mrb[0].mxu1 }
 0x275   :  { %v515_v34 = vadd.f32 %v665_v33, %v503_v26  ;;  %v436_v35 = vpop.f32.mrb[1].mxu1 }
 0x276   :  { %559 = vst [vmem:[#allocation12] sm:$0xff] %v620_v31  ;;  %v622_v36 = vpack.c.bf16 %v511_v32, %v510_v29  ;;  %v509_v37 = vadd.f32 %v503_v26, %v436_v35  ;;  %v666_v38 = vpop.f32.mrb[2].mxu1 }
 0x277   :  { %v625_v39 = vpack.c.bf16 %v515_v34, %v515_v34  ;;  %v518_v40 = vadd.f32 %v666_v38, %v503_v26  ;;  %v439_v41 = vpop.f32.mrb[3].mxu1 }
 0x278   :  { %561 = vst [vmem:[#allocation12 + $0xc] sm:$0xff] %v622_v36  ;;  %v621_v42 = vpack.c.bf16 %v509_v37, %v509_v37  ;;  %v512_v43 = vadd.f32 %v503_v26, %v439_v41  ;;  %v393_v44 = vpop.f32.mrb[4].mxu0 }
 0x279   :  { %564 = vst [vmem:[#allocation12 + $0x20] sm:$0xf] %v625_v39  ;;  %v627_v45 = vpack.c.bf16 %v518_v40, %v518_v40  ;;  %v513_v46 = vadd.f32 %v495_v20, %v393_v44  ;;  %v395_v47 = vpop.f32.mrb[5].mxu0 }
 0x27a   :  { %560 = vst [vmem:[#allocation12 + $0x8] sm:$0xf] %v621_v42  ;;  %v623_v48 = vpack.c.bf16 %v512_v43, %v512_v43  ;;  %v514_v49 = vadd.f32 %v499_v23, %v395_v47  ;;  %v397_v50 = vpop.f32.mrb[6].mxu0 }
 0x27b   :  { %566 = vst [vmem:[#allocation12 + $0x2c] sm:$0xf] %v627_v45  ;;  %v516_v51 = vadd.f32 %v495_v20, %v397_v50  ;;  %v399_v52 = vpop.f32.mrb[7].mxu0 }
 0x27c   :  { %562 = vst [vmem:[#allocation12 + $0x14] sm:$0xf] %v623_v48  ;;  %v624_v53 = vpack.c.bf16 %v514_v49, %v513_v46  ;;  %v517_v54 = vadd.f32 %v499_v23, %v399_v52 }
 0x27e   :  { %563 = vst [vmem:[#allocation12 + $0x18] sm:$0xff] %v624_v53  ;;  %v626_v55 = vpack.c.bf16 %v517_v54, %v516_v51 }
 0x280   :  { %565 = vst [vmem:[#allocation12 + $0x24] sm:$0xff] %v626_v55 }
 0x281   :  { %839 = shalt.err (!%p836_p2)
}
 0x282   :  { %s840_s13 = scalar_lea.hbm %s1002_s5, 768 }
 0x283   :  { %p841_p3 = scmp.ne.s32.totalorder %s1002_s5, %s840_s13  ;;  %p844_p4 = scmp.lt.u32.totalorder %s840_s13, %s1002_s5 }
 0x285   :  { %p846_p5 = pnand %p844_p4, %p841_p3 }
 0x287   :  { %849 = shalt.err (!%p846_p5)
}
 0x288   :  { %578 = dma.vmem_to_hbm [thread:$0]  %s573_s8, 768, %s1002_s5, [#allocation5], %s859_s28, %s859_s28, %s860_s29  }
 0x289   :  { %856 = dma.done.wait [#allocation5], 768  }
 0x28a   :  { %857 = vsyncadd [#allocation5], 4294966528 }
 0x28b   :  { %582 = vsyncpa [#allocation4], 1 }
 0x28c   :  { %583 = vsyncpa [#allocation7], 1 }
 0x28d   :  { %584 = vsyncpa [#allocation10], 1 }
 0x28e   :  { %585 = vsyncpa [#allocation5], 1 }

// kernel: gpt1d_forward.14
= control target key start
LH: loop header
LB: loop body
LE: loop exit
PB: predicated region body
PF: predicated region fallthrough
CT: control target
= control target key end

     0   :  { %10 = vsyncpa [#allocation4], 0  ;;  %s1220_s0 = inlined_call_operand.hbm [shape: bf16[32,128], index: 0, kind: input, shape index: {}]   ;;  %s1221_s1 = inlined_call_operand.hbm [shape: bf16[128,512], index: 1, kind: input, shape index: {}]   ;;  %s1222_s2 = inlined_call_operand.hbm [shape: f32[1,128], index: 2, kind: input, shape index: {}]   ;;  %s1223_s3 = inlined_call_operand.hbm [shape: f32[1,128], index: 3, kind: input, shape index: {}]   ;;  %s1224_s4 = inlined_call_operand.hbm [shape: f32[1,512], index: 4, kind: input, shape index: {}]   ;;  %s1225_s5 = inlined_call_operand.hbm [shape: bf16[32,512], index: 5, kind: output, shape index: {}]  }
   0x1   :  { %11 = vsyncpa [#allocation7], 0 }
   0x2   :  { %12 = vsyncpa [#allocation10], 0 }
   0x3   :  { %13 = vsyncpa [#allocation5], 0  ;;  %s1037_s18 = smov [#allocation6]   ;;  %s897_s22 = scalar_lea.hbm %s1221_s1, 4096 }
   0x4   :  { %s31_s19 = sshll.u32 %s1037_s18, 4  ;;  %p898_p0 = scmp.ne.s32.totalorder %s1221_s1, %s897_s22  ;;  %s32_s19 = int_to_ptr.vmem [resolvable:$true] %s31_s19 }
   0x5   :  { %p901_p1 = scmp.lt.u32.totalorder %s897_s22, %s1221_s1 }
   0x7   :  { %p903_p2 = pnand %p901_p1, %p898_p0 }
   0x9   :  { %906 = shalt.err (!%p903_p2)
}
   0xa   :  { %s907_s27 = scalar_lea.vmem %s32_s19, 4096  ;;  %p912_p4 = scmp.lt.s32.totalorder %s32_s19, %s32_s19 }
   0xb   :  { %p908_p3 = scmp.ne.s32.totalorder %s32_s19, %s907_s27  ;;  %p913_p5 = scmp.lt.s32.totalorder %s907_s27, %s907_s27 }
   0xd   :  { %p914_p6 = por %p913_p5, %p912_p4 }
   0xf   :  { %p915_p7 = pnand %p914_p6, %p908_p3 }
  0x11   :  { %918 = shalt.err (!%p915_p7)
}
  0x12   :  { %s1038_s28 = smov 256   ;;  %s1039_s29 = smov 16  }
  0x13   :  { %37 = dma.hbm_to_vmem [thread:$0]  %s1221_s1, 4096, %s32_s19, [#allocation7], %s1038_s28, %s1038_s28, %s1039_s29  }
  0x14   :  { %s1040_s7 = smov [#allocation9]   ;;  %s1041_s9 = smov [#allocation3]  }
  0x15   :  { %s54_s8 = sshll.u32 %s1040_s7, 4  ;;  %s19_s10 = sshll.u32 %s1041_s9, 4  ;;  %s55_s8 = int_to_ptr.vmem [resolvable:$true] %s54_s8  ;;  %s20_s10 = int_to_ptr.vmem [resolvable:$true] %s19_s10 }
  0x16   :  { %s919_s13 = scalar_lea.hbm %s1223_s3, 16 }
  0x17   :  { %p920_p8 = scmp.ne.s32.totalorder %s1223_s3, %s919_s13  ;;  %p923_p9 = scmp.lt.u32.totalorder %s919_s13, %s1223_s3 }
  0x19   :  { %p925_p10 = pnand %p923_p9, %p920_p8 }
  0x1b   :  { %928 = shalt.err (!%p925_p10)
}
  0x1c   :  { %s929_s1 = scalar_lea.vmem %s55_s8, 16  ;;  %s933_s18 = scalar_lea.vmem %s55_s8, 32 }
  0x1d   :  { %p930_p11 = scmp.ne.s32.totalorder %s55_s8, %s929_s1  ;;  %p934_p12 = scmp.lt.s32.totalorder %s55_s8, %s55_s8 }
  0x1e   :  { %p935_p13 = scmp.lt.s32.totalorder %s933_s18, %s929_s1 }
  0x20   :  { %p936_p0 = por %p935_p13, %p934_p12 }
  0x22   :  { %p937_p1 = pnand %p936_p0, %p930_p11 }
  0x24   :  { %940 = shalt.err (!%p937_p1)
}
  0x25   :  { %57 = dma.hbm_to_vmem [thread:$0]  %s1223_s3, 16, %s55_s8, [#allocation10]  }
  0x26   :  { %s941_s23 = scalar_lea.hbm %s1220_s0, 256 }
  0x27   :  { %p942_p2 = scmp.ne.s32.totalorder %s1220_s0, %s941_s23  ;;  %p945_p3 = scmp.lt.u32.totalorder %s941_s23, %s1220_s0 }
  0x29   :  { %p947_p4 = pnand %p945_p3, %p942_p2 }
  0x2b   :  { %950 = shalt.err (!%p947_p4)
}
  0x2c   :  { %s951_s30 = scalar_lea.vmem %s20_s10, 256  ;;  %p956_p6 = scmp.lt.s32.totalorder %s20_s10, %s20_s10 }
  0x2d   :  { %p952_p5 = scmp.ne.s32.totalorder %s20_s10, %s951_s30  ;;  %p957_p7 = scmp.lt.s32.totalorder %s951_s30, %s951_s30 }
  0x2f   :  { %p958_p8 = por %p957_p7, %p956_p6 }
  0x31   :  { %p959_p9 = pnand %p958_p8, %p952_p5 }
  0x33   :  { %962 = shalt.err (!%p959_p9)
}
  0x34   :  { %s1042_s3 = smov 64   ;;  %s1043_s6 = smov 4  }
  0x35   :  { %25 = dma.hbm_to_vmem [thread:$0]  %s1220_s0, 256, %s20_s10, [#allocation4], %s1042_s3, %s1042_s3, %s1043_s6  }
  0x36   :  { %s1044_s9 = smov [#allocation8]   ;;  %s1045_s12 = smov [#allocation11]  }
  0x37   :  { %s44_s11 = sshll.u32 %s1044_s9, 4  ;;  %s64_s13 = sshll.u32 %s1045_s12, 4  ;;  %s45_s11 = int_to_ptr.vmem [resolvable:$true] %s44_s11  ;;  %s65_s13 = int_to_ptr.vmem [resolvable:$true] %s64_s13 }
  0x38   :  { %s963_s16 = scalar_lea.hbm %s1222_s2, 16 }
  0x39   :  { %p964_p10 = scmp.ne.s32.totalorder %s1222_s2, %s963_s16  ;;  %p967_p11 = scmp.lt.u32.totalorder %s963_s16, %s1222_s2 }
  0x3b   :  { %p969_p12 = pnand %p967_p11, %p964_p10 }
  0x3d   :  { %972 = shalt.err (!%p969_p12)
}
  0x3e   :  { %s973_s0 = scalar_lea.vmem %s45_s11, 16  ;;  %s977_s10 = scalar_lea.vmem %s45_s11, 32 }
  0x3f   :  { %p974_p13 = scmp.ne.s32.totalorder %s45_s11, %s973_s0  ;;  %p978_p0 = scmp.lt.s32.totalorder %s45_s11, %s45_s11 }
  0x40   :  { %p979_p1 = scmp.lt.s32.totalorder %s977_s10, %s973_s0 }
  0x42   :  { %p980_p2 = por %p979_p1, %p978_p0 }
  0x44   :  { %p981_p3 = pnand %p980_p2, %p974_p13 }
  0x46   :  { %984 = shalt.err (!%p981_p3)
}
  0x47   :  { %47 = dma.hbm_to_vmem [thread:$0]  %s1222_s2, 16, %s45_s11, [#allocation7]  }
  0x48   :  { %s985_s24 = scalar_lea.hbm %s1224_s4, 64 }
  0x49   :  { %p986_p4 = scmp.ne.s32.totalorder %s1224_s4, %s985_s24  ;;  %p989_p5 = scmp.lt.u32.totalorder %s985_s24, %s1224_s4 }
  0x4b   :  { %p991_p6 = pnand %p989_p5, %p986_p4 }
  0x4d   :  { %994 = shalt.err (!%p991_p6)
}
  0x4e   :  { %s995_s3 = scalar_lea.vmem %s65_s13, 64  ;;  %p1000_p8 = scmp.lt.s32.totalorder %s65_s13, %s65_s13 }
  0x4f   :  { %p996_p7 = scmp.ne.s32.totalorder %s65_s13, %s995_s3  ;;  %p1001_p9 = scmp.lt.s32.totalorder %s995_s3, %s995_s3 }
  0x51   :  { %p1002_p10 = por %p1001_p9, %p1000_p8 }
  0x53   :  { %p1003_p11 = pnand %p1002_p10, %p996_p7 }
  0x55   :  { %1006 = shalt.err (!%p1003_p11)
}
  0x56   :  { %67 = dma.hbm_to_vmem [thread:$0]  %s1224_s4, 64, %s65_s13, [#allocation10]  }
  0x57   :  { %1029 = dma.done.wait [#allocation4], 256  }
  0x58   :  { %1030 = vsyncadd [#allocation4], 4294967040 }
  0x59   :  { %1031 = dma.done.wait [#allocation7], 4112  }
  0x5a   :  { %1032 = vsyncadd [#allocation7], 4294963184 }
  0x5b   :  { %1033 = dma.done.wait [#allocation10], 80  }
  0x5c   :  { %1034 = vsyncadd [#allocation10], 4294967216  ;;  %v790_v0 = vld [vmem:[#allocation3] sm:$0xff]   ;;  %v797_v1 = vld [vmem:[#allocation3 + $0x8] sm:$0xff]   ;;  %v1046_v52 = vmov 0   ;;  %s1047_s4 = smov [#allocation12]  }
  0x5d   :  { %v791_v2 = vunpack.c.l.bf16 %v790_v0  ;;  %v795_v3 = vunpack.c.l.bf16 %v797_v1  ;;  %v792_v4 = vunpack.c.h.bf16 %v790_v0  ;;  %v796_v5 = vunpack.c.h.bf16 %v797_v1  ;;  %v809_v6 = vld [vmem:[#allocation6 + $0x4] ss:$16 sps:$4 sm:$0xff]   ;;  %v811_v7 = vld [vmem:[#allocation6 + $0xc] ss:$16 sps:$4 sm:$0xff]   ;;  %v813_v8 = vld [vmem:[#allocation6] ss:$16 sps:$4 sm:$0xff]   ;;  %421 = vmatprep.mubr.bf16.mxu0 %v1046_v52  ;;  %474 = vmatprep.mubr.bf16.mxu1 %v1046_v52 }
  0x5e   :  { %v814_v9 = vld [vmem:[#allocation6 + $0x8] ss:$16 sps:$4 sm:$0xff]   ;;  %v815_v10 = vld [vmem:[#allocation6 + $0x24] ss:$16 sps:$4 sm:$0xff]   ;;  %v817_v11 = vld [vmem:[#allocation6 + $0x2c] ss:$16 sps:$4 sm:$0xff]   ;;  %389 = vmatprep.subr.bf16.mxu0 %v809_v6  ;;  %442 = vmatprep.subr.bf16.mxu1 %v811_v7 }
  0x5f   :  { %112 = vadd.xlane.f32.xlu0 %v791_v2  ;;  %116 = vadd.xlane.f32.xlu1 %v795_v3  ;;  %v819_v28 = vld [vmem:[#allocation6 + $0x20] ss:$16 sps:$4 sm:$0xff]   ;;  %v820_v29 = vld [vmem:[#allocation6 + $0x28] ss:$16 sps:$4 sm:$0xff]   ;;  %v821_v30 = vld [vmem:[#allocation6 + $0x44] ss:$16 sps:$4 sm:$0xff]  }
  0x60   :  { %390 = vmatpush1.bf16.msra.mxu0 %v813_v8  ;;  %443 = vmatpush1.bf16.msra.mxu1 %v814_v9  ;;  %v823_v31 = vld [vmem:[#allocation6 + $0x4c] ss:$16 sps:$4 sm:$0xff]   ;;  %v825_v32 = vld [vmem:[#allocation6 + $0x40] ss:$16 sps:$4 sm:$0xff]   ;;  %v826_v33 = vld [vmem:[#allocation6 + $0x48] ss:$16 sps:$4 sm:$0xff]  }
  0x61   :  { %391 = vmatprep.subr.bf16.mxu0 %v815_v10  ;;  %444 = vmatprep.subr.bf16.mxu1 %v817_v11  ;;  %v827_v34 = vld [vmem:[#allocation6 + $0x64] ss:$16 sps:$4 sm:$0xff]   ;;  %v829_v35 = vld [vmem:[#allocation6 + $0x6c] ss:$16 sps:$4 sm:$0xff]   ;;  %v831_v36 = vld [vmem:[#allocation6 + $0x60] ss:$16 sps:$4 sm:$0xff]  }
  0x62   :  { %v832_v37 = vld [vmem:[#allocation6 + $0x68] ss:$16 sps:$4 sm:$0xff]   ;;  %v833_v38 = vld [vmem:[#allocation6 + $0x84] ss:$16 sps:$4 sm:$0xff]   ;;  %v835_v39 = vld [vmem:[#allocation6 + $0x8c] ss:$16 sps:$4 sm:$0xff]  }
  0x63   :  { %114 = vadd.xlane.f32.xlu0 %v792_v4  ;;  %118 = vadd.xlane.f32.xlu1 %v796_v5  ;;  %v837_v40 = vld [vmem:[#allocation6 + $0x80] ss:$16 sps:$4 sm:$0xff]   ;;  %v838_v41 = vld [vmem:[#allocation6 + $0x88] ss:$16 sps:$4 sm:$0xff]   ;;  %v839_v42 = vld [vmem:[#allocation6 + $0xa4] ss:$16 sps:$4 sm:$0xff]  }
  0x64   :  { %392 = vmatpush1.bf16.msra.mxu0 %v819_v28  ;;  %445 = vmatpush1.bf16.msra.mxu1 %v820_v29  ;;  %v841_v43 = vld [vmem:[#allocation6 + $0xac] ss:$16 sps:$4 sm:$0xff]   ;;  %v843_v44 = vld [vmem:[#allocation6 + $0xa0] ss:$16 sps:$4 sm:$0xff]   ;;  %v844_v45 = vld [vmem:[#allocation6 + $0xa8] ss:$16 sps:$4 sm:$0xff]  }
  0x65   :  { %393 = vmatprep.subr.bf16.mxu0 %v821_v30  ;;  %446 = vmatprep.subr.bf16.mxu1 %v823_v31  ;;  %v845_v46 = vld [vmem:[#allocation6 + $0xc4] ss:$16 sps:$4 sm:$0xff]   ;;  %v847_v47 = vld [vmem:[#allocation6 + $0xcc] ss:$16 sps:$4 sm:$0xff]   ;;  %v849_v48 = vld [vmem:[#allocation6 + $0xc0] ss:$16 sps:$4 sm:$0xff]  }
  0x66   :  { %v850_v49 = vld [vmem:[#allocation6 + $0xc8] ss:$16 sps:$4 sm:$0xff]   ;;  %v851_v50 = vld [vmem:[#allocation6 + $0xe4] ss:$16 sps:$4 sm:$0xff]   ;;  %v853_v51 = vld [vmem:[#allocation6 + $0xec] ss:$16 sps:$4 sm:$0xff]  }
  0x67   :  { %v855_v53 = vld [vmem:[#allocation6 + $0xe0] ss:$16 sps:$4 sm:$0xff]   ;;  %v856_v54 = vld [vmem:[#allocation6 + $0xe8] ss:$16 sps:$4 sm:$0xff]   ;;  %v546_v29 = vld [vmem:[#allocation11] sm:$0xf] }
  0x68   :  { %394 = vmatpush1.bf16.msra.mxu0 %v825_v32  ;;  %447 = vmatpush1.bf16.msra.mxu1 %v826_v33  ;;  %v740_v10 = vld [vmem:[#allocation9] ss:$0 sm:$0xff]  ;;  %s725_s7 = sshll.u32 %s1047_s4, 4  ;;  %s726_s7 = int_to_ptr.vmem [resolvable:$true] %s725_s7 }
  0x69   :  { %395 = vmatprep.subr.bf16.mxu0 %v827_v34  ;;  %448 = vmatprep.subr.bf16.mxu1 %v829_v35  ;;  %s1007_s8 = scalar_lea.vmem %s726_s7, 1024  ;;  %p1012_p13 = scmp.lt.s32.totalorder %s726_s7, %s726_s7 }
  0x6a   :  { %p1008_p12 = scmp.ne.s32.totalorder %s726_s7, %s1007_s8  ;;  %p1013_p0 = scmp.lt.s32.totalorder %s1007_s8, %s1007_s8 }
  0x6c   :  { %396 = vmatpush1.bf16.msra.mxu0 %v831_v36  ;;  %449 = vmatpush1.bf16.msra.mxu1 %v832_v37  ;;  %p1014_p1 = por %p1013_p0, %p1012_p13 }
  0x6d   :  { %397 = vmatprep.subr.bf16.mxu0 %v833_v38  ;;  %450 = vmatprep.subr.bf16.mxu1 %v835_v39 }
  0x6e   :  { %p1015_p2 = pnand %p1014_p1, %p1008_p12 }
  0x70   :  { %398 = vmatpush1.bf16.msra.mxu0 %v837_v40  ;;  %451 = vmatpush1.bf16.msra.mxu1 %v838_v41 }
  0x71   :  { %399 = vmatprep.subr.bf16.mxu0 %v839_v42  ;;  %452 = vmatprep.subr.bf16.mxu1 %v841_v43 }
  0x74   :  { %400 = vmatpush1.bf16.msra.mxu0 %v843_v44  ;;  %453 = vmatpush1.bf16.msra.mxu1 %v844_v45 }
  0x75   :  { %401 = vmatprep.subr.bf16.mxu0 %v845_v46  ;;  %454 = vmatprep.subr.bf16.mxu1 %v847_v47 }
  0x78   :  { %402 = vmatpush1.bf16.msra.mxu0 %v849_v48  ;;  %455 = vmatpush1.bf16.msra.mxu1 %v850_v49 }
  0x79   :  { %403 = vmatprep.subr.bf16.mxu0 %v851_v50  ;;  %456 = vmatprep.subr.bf16.mxu1 %v853_v51 }
  0x7c   :  { %404 = vmatpush1.bf16.msra.mxu0 %v855_v53  ;;  %457 = vmatpush1.bf16.msra.mxu1 %v856_v54 }
  0xec   :  { %v113_v12 = vpop.xlane.xlu0 %112  ;;  %v117_v13 = vpop.xlane.xlu1 %116 }
  0xed   :  { %v121_v14 = vmul.f32 0.0078125, %v113_v12  ;;  %v123_v15 = vmul.f32 0.0078125, %v117_v13 }
  0xef   :  { %v1141_v16 = vsub.f32 %v791_v2, %v121_v14  ;;  %v1143_v17 = vsub.f32 %v795_v3, %v123_v15 }
  0xf0   :  { %v115_v18 = vpop.xlane.xlu0 %114  ;;  %v119_v19 = vpop.xlane.xlu1 %118 }
  0xf1   :  { %v122_v20 = vmul.f32 0.0078125, %v115_v18  ;;  %v129_v21 = vmul.f32 %v1141_v16, %v1141_v16  ;;  %v124_v22 = vmul.f32 0.0078125, %v119_v19  ;;  %v131_v25 = vmul.f32 %v1143_v17, %v1143_v17 }
  0xf3   :  { %v1147_v23 = vsub.f32 %v792_v4, %v122_v20  ;;  %133 = vadd.xlane.f32.xlu0 %v129_v21  ;;  %v1149_v24 = vsub.f32 %v796_v5, %v124_v22  ;;  %v739_v5 = vld [vmem:[#allocation8] ss:$0 sm:$0xff] }
  0xf5   :  { %v130_v26 = vmul.f32 %v1147_v23, %v1147_v23  ;;  %v132_v27 = vmul.f32 %v1149_v24, %v1149_v24 }
  0xf7   :  { %137 = vadd.xlane.f32.xlu0 %v131_v25  ;;  %135 = vadd.xlane.f32.xlu1 %v130_v26  ;;  %v548_v25 = vlaneseq }
  0xf9   :  { %v549_v26 = vshrl.u32 %v548_v25, 7 }
  0xfb   :  { %139 = vadd.xlane.f32.xlu1 %v132_v27  ;;  %v550_v27 = vsub.s32 0, %v549_v26  ;;  %v558_v28 = vsub.s32 2, %v549_v26  ;;  %v562_v30 = vsub.s32 3, %v549_v26 }
  0xfd   :  { %v559_v31 = vrot.slane %v546_v29, %v558_v28  ;;  %v563_v33 = vrot.slane %v546_v29, %v562_v30 }
 0x180   :  { %v134_v55 = vpop.xlane.xlu0 %133 }
 0x181   :  { %v141_v56 = vmul.f32 0.0078125, %v134_v55 }
 0x183   :  { %v145_v57 = vadd.f32 1e-05, %v141_v56 }
 0x184   :  { %v136_v58 = vpop.xlane.xlu1 %135  ;;  %v138_v59 = vpop.xlane.xlu0 %137 }
 0x185   :  { %857 = vrsqrt.f32 %v145_v57  ;;  %v142_v60 = vmul.f32 0.0078125, %v136_v58  ;;  %v143_v61 = vmul.f32 0.0078125, %v138_v59 }
 0x187   :  { %v146_v62 = vadd.f32 1e-05, %v142_v60  ;;  %v147_v63 = vadd.f32 1e-05, %v143_v61 }
 0x188   :  { %v140_v0 = vpop.xlane.xlu1 %139 }
 0x189   :  { %859 = vrsqrt.f32 %v146_v62  ;;  %v144_v1 = vmul.f32 0.0078125, %v140_v0 }
 0x18a   :  { %861 = vrsqrt.f32 %v147_v63 }
 0x18b   :  { %v148_v2 = vadd.f32 1e-05, %v144_v1 }
 0x18d   :  { %863 = vrsqrt.f32 %v148_v2 }
 0x18f   :  { %v858_v3 = vpop.eup %857 }
 0x190   :  { %v153_v4 = vmul.f32 %v858_v3, %v1141_v16 }
 0x192   :  { %v164_v8 = vmul.f32 %v739_v5, %v153_v4 }
 0x193   :  { %v860_v6 = vpop.eup %859 }
 0x194   :  { %v154_v7 = vmul.f32 %v860_v6, %v1147_v23  ;;  %v862_v9 = vpop.eup %861  ;;  %v175_v13 = vadd.f32 %v740_v10, %v164_v8 }
 0x195   :  { %v155_v15 = vmul.f32 %v862_v9, %v1143_v17  ;;  %v554_v17 = vsub.s32 1, %v549_v26 }
 0x196   :  { %v165_v11 = vmul.f32 %v739_v5, %v154_v7 }
 0x197   :  { %v864_v12 = vpop.eup %863  ;;  %v166_v16 = vmul.f32 %v739_v5, %v155_v15  ;;  %v555_v32 = vrot.slane %v546_v29, %v554_v17 }
 0x198   :  { %v176_v14 = vadd.f32 %v740_v10, %v165_v11  ;;  %v156_v18 = vmul.f32 %v864_v12, %v1149_v24  ;;  %v551_v24 = vrot.slane %v546_v29, %v550_v27 }
 0x199   :  { %v177_v22 = vadd.f32 %v740_v10, %v166_v16 }
 0x19a   :  { %v179_v19 = vpack.c.bf16 %v176_v14, %v175_v13  ;;  %v167_v20 = vmul.f32 %v739_v5, %v156_v18 }
 0x19c   :  { %422 = vmatmul.mubr.bf16.vlgmr.msra.gmra.mrb[0].mxu0 %v179_v19  ;;  %475 = vmatmul.mubr.bf16.vlgmr.msra.gmra.mrb[0].mxu1 %v179_v19  ;;  %v178_v21 = vadd.f32 %v740_v10, %v167_v20 }
 0x19d   :  { %431 = vmatprep.mubr.bf16.mxu0 %v1046_v52  ;;  %484 = vmatprep.mubr.bf16.mxu1 %v1046_v52 }
 0x19e   :  { %v180_v23 = vpack.c.bf16 %v178_v21, %v177_v22 }
 0x1a4   :  { %432 = vmatmul.mubr.bf16.gmra.mrb[4].mxu0 %v180_v23  ;;  %485 = vmatmul.mubr.bf16.gmra.mrb[4].mxu1 %v180_v23 }
 0x26f   :  { %v423_v34 = vpop.f32.mrb[0].mxu0  ;;  %v476_v35 = vpop.f32.mrb[0].mxu1 }
 0x270   :  { %v568_v36 = vadd.f32 %v551_v24, %v423_v34  ;;  %v570_v37 = vadd.f32 %v559_v31, %v476_v35  ;;  %v425_v38 = vpop.f32.mrb[1].mxu0  ;;  %v478_v39 = vpop.f32.mrb[1].mxu1 }
 0x271   :  { %v569_v40 = vadd.f32 %v555_v32, %v425_v38  ;;  %v571_v41 = vadd.f32 %v563_v33, %v478_v39  ;;  %v427_v42 = vpop.f32.mrb[2].mxu0  ;;  %v480_v43 = vpop.f32.mrb[2].mxu1 }
 0x272   :  { %v600_v44 = vmul.f32 0.70710677, %v568_v36  ;;  %v602_v45 = vmul.f32 0.70710677, %v570_v37  ;;  %v572_v48 = vadd.f32 %v551_v24, %v427_v42  ;;  %v1161_v49 = vadd.f32 %v559_v31, %v480_v43  ;;  %v429_v50 = vpop.f32.mrb[3].mxu0  ;;  %v482_v51 = vpop.f32.mrb[3].mxu1 }
 0x273   :  { %v601_v46 = vmul.f32 0.70710677, %v569_v40  ;;  %v603_v47 = vmul.f32 0.70710677, %v571_v41  ;;  %v1163_v52 = vadd.f32 %v555_v32, %v429_v50  ;;  %v1165_v53 = vadd.f32 %v563_v33, %v482_v51 }
 0x274   :  { %865 = verf.f32 %v600_v44  ;;  %v604_v54 = vmul.f32 0.70710677, %v572_v48  ;;  %v606_v55 = vmul.f32 0.70710677, %v1161_v49  ;;  %v584_v14 = vmul.f32 0.5, %v568_v36 }
 0x275   :  { %867 = verf.f32 %v602_v45  ;;  %v605_v56 = vmul.f32 0.70710677, %v1163_v52  ;;  %v607_v58 = vmul.f32 0.70710677, %v1165_v53  ;;  %v586_v15 = vmul.f32 0.5, %v570_v37 }
 0x276   :  { %869 = verf.f32 %v601_v46  ;;  %v585_v23 = vmul.f32 0.5, %v569_v40  ;;  %v587_v25 = vmul.f32 0.5, %v571_v41  ;;  %v590_v39 = vmul.f32 0.5, %v1161_v49 }
 0x277   :  { %871 = verf.f32 %v603_v47  ;;  %v433_v57 = vpop.f32.mrb[4].mxu0  ;;  %v486_v60 = vpop.f32.mrb[4].mxu1  ;;  %v589_v41 = vmul.f32 0.5, %v1163_v52  ;;  %v591_v50 = vmul.f32 0.5, %v1165_v53 }
 0x278   :  { %873 = verf.f32 %v604_v54  ;;  %v1170_v59 = vadd.f32 %v551_v24, %v433_v57  ;;  %v435_v61 = vpop.f32.mrb[5].mxu0  ;;  %v1172_v62 = vadd.f32 %v559_v31, %v486_v60  ;;  %v488_v0 = vpop.f32.mrb[5].mxu1 }
 0x279   :  { %875 = verf.f32 %v606_v55  ;;  %v1174_v63 = vadd.f32 %v555_v32, %v435_v61  ;;  %v437_v1 = vpop.f32.mrb[6].mxu0  ;;  %v1177_v3 = vadd.f32 %v563_v33, %v488_v0  ;;  %v490_v4 = vpop.f32.mrb[6].mxu1 }
 0x27a   :  { %877 = verf.f32 %v605_v56  ;;  %v608_v2 = vmul.f32 0.70710677, %v1170_v59  ;;  %v439_v5 = vpop.f32.mrb[7].mxu0  ;;  %v610_v6 = vmul.f32 0.70710677, %v1172_v62  ;;  %v492_v7 = vpop.f32.mrb[7].mxu1  ;;  %v1182_v10 = vadd.f32 %v551_v24, %v437_v1 }
 0x27b   :  { %879 = verf.f32 %v607_v58  ;;  %v609_v8 = vmul.f32 0.70710677, %v1174_v63  ;;  %v611_v9 = vmul.f32 0.70710677, %v1177_v3  ;;  %v1184_v11 = vadd.f32 %v559_v31, %v490_v4 }
 0x27c   :  { %881 = verf.f32 %v608_v2  ;;  %v1186_v12 = vadd.f32 %v555_v32, %v439_v5  ;;  %v612_v20 = vmul.f32 0.70710677, %v1182_v10  ;;  %v1189_v16 = vadd.f32 %v563_v33, %v492_v7 }
 0x27d   :  { %883 = verf.f32 %v610_v6  ;;  %v614_v26 = vmul.f32 0.70710677, %v1184_v11  ;;  %v588_v32 = vmul.f32 0.5, %v572_v48  ;;  %v592_v56 = vmul.f32 0.5, %v1170_v59 }
 0x27e   :  { %v866_v13 = vpop.eup %865  ;;  %885 = verf.f32 %v609_v8  ;;  %v613_v17 = vmul.f32 0.70710677, %v1186_v12  ;;  %v615_v36 = vmul.f32 0.70710677, %v1189_v16  ;;  %v594_v58 = vmul.f32 0.5, %v1172_v62 }
 0x27f   :  { %v868_v18 = vpop.eup %867  ;;  %v632_v19 = vadd.f32 1.0, %v866_v13  ;;  %887 = verf.f32 %v611_v9  ;;  %v593_v2 = vmul.f32 0.5, %v1174_v63  ;;  %v595_v6 = vmul.f32 0.5, %v1177_v3 }
 0x280   :  { %v870_v21 = vpop.eup %869  ;;  %v634_v22 = vadd.f32 1.0, %v868_v18  ;;  %889 = verf.f32 %v612_v20  ;;  %v596_v62 = vmul.f32 0.5, %v1182_v10 }
 0x281   :  { %v872_v27 = vpop.eup %871  ;;  %v648_v28 = vmul.f32 %v632_v19, %v584_v14  ;;  %v633_v29 = vadd.f32 1.0, %v870_v21  ;;  %891 = verf.f32 %v614_v26  ;;  %v598_v19 = vmul.f32 0.5, %v1184_v11 }
 0x282   :  { %v874_v30 = vpop.eup %873  ;;  %v650_v24 = vmul.f32 %v634_v22, %v586_v15  ;;  %v635_v31 = vadd.f32 1.0, %v872_v27  ;;  %893 = verf.f32 %v613_v17  ;;  %v597_v22 = vmul.f32 0.5, %v1186_v12 }
 0x283   :  { %v876_v34 = vpop.eup %875  ;;  %v649_v33 = vmul.f32 %v633_v29, %v585_v23  ;;  %v636_v35 = vadd.f32 1.0, %v874_v30  ;;  %895 = verf.f32 %v615_v36  ;;  %v599_v27 = vmul.f32 0.5, %v1189_v16 }
 0x284   :  { %v878_v37 = vpop.eup %877  ;;  %v651_v38 = vmul.f32 %v635_v31, %v587_v25  ;;  %v638_v40 = vadd.f32 1.0, %v876_v34 }
 0x285   :  { %v880_v42 = vpop.eup %879  ;;  %v781_v43 = vpack.c.bf16 %v649_v33, %v648_v28  ;;  %v652_v44 = vmul.f32 %v636_v35, %v588_v32  ;;  %v637_v45 = vadd.f32 1.0, %v878_v37 }
 0x286   :  { %v882_v46 = vpop.eup %881  ;;  %v782_v47 = vpack.c.bf16 %v651_v38, %v650_v24  ;;  %v654_v48 = vmul.f32 %v638_v40, %v590_v39  ;;  %v639_v51 = vadd.f32 1.0, %v880_v42 }
 0x287   :  { %v884_v54 = vpop.eup %883  ;;  %712 = vst [vmem:[#allocation12] sm:$0xff] %v781_v43  ;;  %v653_v55 = vmul.f32 %v637_v45, %v589_v41  ;;  %v640_v49 = vadd.f32 1.0, %v882_v46 }
 0x288   :  { %v886_v57 = vpop.eup %885  ;;  %713 = vst [vmem:[#allocation12 + $0x8] sm:$0xff] %v782_v47  ;;  %v655_v52 = vmul.f32 %v639_v51, %v591_v50  ;;  %v642_v60 = vadd.f32 1.0, %v884_v54 }
 0x289   :  { %v888_v61 = vpop.eup %887  ;;  %v783_v0 = vpack.c.bf16 %v653_v55, %v652_v44  ;;  %v656_v1 = vmul.f32 %v640_v49, %v592_v56  ;;  %v641_v4 = vadd.f32 1.0, %v886_v57 }
 0x28a   :  { %v784_v53 = vpack.c.bf16 %v655_v52, %v654_v48  ;;  %v658_v5 = vmul.f32 %v642_v60, %v594_v58  ;;  %v643_v7 = vadd.f32 1.0, %v888_v61  ;;  %v890_v8 = vpop.eup %889 }
 0x28b   :  { %714 = vst [vmem:[#allocation12 + $0x10] sm:$0xff] %v783_v0  ;;  %v657_v59 = vmul.f32 %v641_v4, %v593_v2  ;;  %v892_v9 = vpop.eup %891  ;;  %v644_v14 = vadd.f32 1.0, %v890_v8 }
 0x28c   :  { %715 = vst [vmem:[#allocation12 + $0x18] sm:$0xff] %v784_v53  ;;  %v659_v13 = vmul.f32 %v643_v7, %v595_v6  ;;  %v894_v15 = vpop.eup %893  ;;  %v646_v63 = vadd.f32 1.0, %v892_v9 }
 0x28d   :  { %v785_v18 = vpack.c.bf16 %v657_v59, %v656_v1  ;;  %v660_v21 = vmul.f32 %v644_v14, %v596_v62  ;;  %v645_v3 = vadd.f32 1.0, %v894_v15  ;;  %v896_v23 = vpop.eup %895 }
 0x28e   :  { %v786_v20 = vpack.c.bf16 %v659_v13, %v658_v5  ;;  %v662_v25 = vmul.f32 %v646_v63, %v598_v19  ;;  %v647_v28 = vadd.f32 1.0, %v896_v23 }
 0x28f   :  { %716 = vst [vmem:[#allocation12 + $0x20] sm:$0xff] %v785_v18  ;;  %v661_v26 = vmul.f32 %v645_v3, %v597_v22 }
 0x290   :  { %717 = vst [vmem:[#allocation12 + $0x28] sm:$0xff] %v786_v20  ;;  %v663_v29 = vmul.f32 %v647_v28, %v599_v27 }
 0x291   :  { %v787_v10 = vpack.c.bf16 %v661_v26, %v660_v21 }
 0x292   :  { %v788_v11 = vpack.c.bf16 %v663_v29, %v662_v25 }
 0x293   :  { %718 = vst [vmem:[#allocation12 + $0x30] sm:$0xff] %v787_v10 }
 0x294   :  { %719 = vst [vmem:[#allocation12 + $0x38] sm:$0xff] %v788_v11 }
 0x295   :  { %1018 = shalt.err (!%p1015_p2)
}
 0x296   :  { %s1019_s12 = scalar_lea.hbm %s1225_s5, 1024 }
 0x297   :  { %p1020_p3 = scmp.ne.s32.totalorder %s1225_s5, %s1019_s12  ;;  %p1023_p4 = scmp.lt.u32.totalorder %s1019_s12, %s1225_s5 }
 0x299   :  { %p1025_p5 = pnand %p1023_p4, %p1020_p3 }
 0x29b   :  { %1028 = shalt.err (!%p1025_p5)
}
 0x29c   :  { %731 = dma.vmem_to_hbm [thread:$0]  %s726_s7, 1024, %s1225_s5, [#allocation5], %s1038_s28, %s1038_s28, %s1039_s29  }
 0x29d   :  { %1035 = dma.done.wait [#allocation5], 1024  }
 0x29e   :  { %1036 = vsyncadd [#allocation5], 4294966272 }
 0x29f   :  { %735 = vsyncpa [#allocation4], 1 }
 0x2a0   :  { %736 = vsyncpa [#allocation7], 1 }
 0x2a1   :  { %737 = vsyncpa [#allocation10], 1 }
 0x2a2   :  { %738 = vsyncpa [#allocation5], 1 }

// kernel: gpt1d_forward.12
= control target key start
LH: loop header
LB: loop body
LE: loop exit
PB: predicated region body
PF: predicated region fallthrough
CT: control target
= control target key end

     0   :  { %s2511_s0 = inlined_call_operand.hbm [shape: bf16[2,16,384], index: 0, kind: input, shape index: {}, may-alias: {0,1,2}]   ;;  %s2512_s1 = inlined_call_operand.hbm [shape: bf16[2,16,384], index: 1, kind: input, shape index: {}, may-alias: {0,1,2}]   ;;  %s2513_s2 = inlined_call_operand.hbm [shape: bf16[2,16,384], index: 2, kind: input, shape index: {}, may-alias: {0,1,2}]   ;;  %s2514_s3 = inlined_call_operand.hbm [shape: bf16[2,16,128], index: 3, kind: output, shape index: {}]  }
   0x1   :  { %2526 = sst [smem:[#allocation18_spill]] %s2511_s0 }
   0x2   :  { %2527 = sst [smem:[#allocation19_spill]] %s2512_s1 }
   0x3   :  { %8 = vsyncpa [#allocation6], 0 }
   0x4   :  { %10 = vsyncpa [#allocation6 + $0x1], 0 }
   0x5   :  { %11 = vsyncpa [#allocation9], 0 }
   0x6   :  { %13 = vsyncpa [#allocation9 + $0x1], 0 }
   0x7   :  { %14 = vsyncpa [#allocation7], 0 }
   0x8   :  { %16 = vsyncpa [#allocation7 + $0x1], 0  ;;  %s1910_s12 = smov 0   ;;  %s1912_s13 = smov 0  }
   0x9   :  { %s1914_s14 = smov 0   ;;  %s1916_s15 = smov 0  }
   0xa   :  { %s1918_s16 = smov 0   ;;  %s1920_s17 = smov 0  }
   0xb LB: > { %2528 = sst [smem:[#allocation15_spill]] %s1869_s16  ;;  %s1941_s18 = sadd.s32 4294967295, %s1873_s17   ;;  %s1873_s17 = sphi %s1920_s17, %s22_s17   ;;  %s1869_s16 = sphi %s1918_s16, %s2551_s16   ;;  %s1865_s15 = sphi %s1916_s15, %s2550_s15   ;;  %s1861_s14 = sphi %s1914_s14, %s2554_s14   ;;  %s1857_s13 = sphi %s1912_s13, %s2553_s13   ;;  %s1853_s12 = sphi %s1910_s12, %s2552_s12  }
   0xc   : > { %s1421_s19 = sadd.s32 4294967294, %s1873_s17   ;;  %s41_s20 = sadd.s32 1, %s1869_s16 }
   0xd   : > { %s50_s21 = sadd.s32 1, %s1861_s14  ;;  %p43_p0 = scmp.ge.s32.totalorder %s41_s20, 2 }
   0xe   : > { %p57_p1 = scmp.ne.s32.totalorder %s1861_s14, %s1857_s13  ;;  %p58_p2 = scmp.eq.s32.totalorder %s1873_s17, 0 }
   0xf   : > { %p63_p3 = scmp.ne.s32.totalorder %s1857_s13, %s1853_s12  ;;  %s2556_s20 = smov (%p43_p0, %s41_s20), 0 }
  0x10   : > { %2529 = sst [smem:[#allocation16_spill]] %s2556_s20  ;;  %p1953_p4 = por %p58_p2, %p57_p1 }
  0x11   : > { %p64_p5 = scmp.eq.s32.totalorder %s1941_s18, 0  ;;  %s45_s23 = ssub.s32 %s1869_s16, %s2556_s20 }
  0x12   : > { %p153_p6 = scmp.eq.s32.totalorder %s1941_s18, 1  ;;  %p48_p7 = scmp.eq.s32.totalorder %s45_s23, 0 }
  0x13   : > { %p1961_p8 = por %p64_p5, %p63_p3  ;;  %p159_p10 = scmp.eq.s32.totalorder %s1421_s19, 1 }
  0x14   : > { %p1965_p9 = por %p153_p6, %p57_p1  ;;  %p1557_p13 = scmp.lt.s32.totalorder %s1873_s17, 2 }
  0x15   : > { %s2531_s24 = scalar_select %p1961_p8, 1, 0 }
  0x16   : > { %s2532_s25 = scalar_select %p1965_p9, 1, 0 }
  0x17   : > { %s1970_s26 = scalar_select %p48_p7, %s1861_s14, %s50_s21  }
  0x18   : > { %p1972_p11 = por %p159_p10, %p63_p3  ;;  %s2515_s28 = sand.u32 1, %s1861_s14  }
  0x19   : > { %2533 = sst [smem:[#allocation17_spill]] %s1970_s26  ;;  %s1981_s29 = sshll.u32 %s2515_s28, 3 }
  0x1a   : > { %s2534_s27 = scalar_select %p1972_p11, 1, 0 }
  0x1b   : > { %s1984_s30 = smul.u32 384, %s1869_s16  ;;  %p1988_p0 = pnand %p1557_p13, %p1953_p4 }
  0x1c   : > { %s203_s5 = sand.u32 1, %s1873_s17   ;;  %s2536_s1 = sld [smem:[#allocation19_spill]] }
  0x1d   : > { %s207_s9 = scalar_lea.vmem [#allocation8], %s1981_s29  ;;  %s2002_s19 = scalar_lea.sflag [#allocation9], %s203_s5 }
  0x1e   : > { %s220_s10 = sshll.u32 %s207_s9, 4  ;;  %p2007_p2 = pneg %p1988_p0  ;;  %s2000_s10 = int_to_ptr.vmem [resolvable:$true] %s220_s10 }
  0x22   : > { %s1324_s8 = scalar_lea.hbm %s2536_s1, %s1984_s30  ;;  %s1700_s7 = scalar_lea.hbm %s2536_s1, 768 }
  0x23   : > { %s1998_s11 = scalar_lea.hbm %s1324_s8, 64  ;;  %s1725_s21 = scalar_lea.hbm %s1324_s8, 192 }
  0x24   : > { %p1696_p1 = scmp.ne.s32.totalorder %s1998_s11, %s1725_s21  ;;  %p1701_p5 = scmp.lt.u32.totalorder %s1998_s11, %s2536_s1 }
  0x25   : > { %p1702_p6 = scmp.lt.u32.totalorder %s1700_s7, %s1725_s21  ;;  %p1704_p10 = scmp.lt.u32.totalorder %s1725_s21, %s1998_s11 }
  0x26   : > { %p1698_p3 = pnand %p2007_p2, %p1696_p1 }
  0x27   : > { %p1703_p7 = por %p1702_p6, %p1701_p5 }
  0x28   : > { %p1699_p4 = pneg %p1698_p3 }
  0x29   : > { %p1705_p13 = por %p1704_p10, %p1703_p7 }
  0x2b   : > { %p1706_p12 = pnand %p1705_p13, %p1699_p4 }
  0x2d   : > { %1709 = shalt.err (!%p1706_p12)
}
  0x2e   : > { %s1710_s5 = scalar_lea.vmem %s2000_s10, 128  ;;  %s1875_s8 = smov [#allocation8]  }
  0x2f   : > { %p1711_p1 = scmp.ne.s32.totalorder %s2000_s10, %s1710_s5  ;;  %s1715_s23 = sshll.u32 %s1875_s8, 4  ;;  %s1716_s23 = int_to_ptr.vmem [resolvable:$false] %s1715_s23 }
  0x30   : > { %s1717_s28 = scalar_lea.vmem %s1716_s23, 256  ;;  %p1718_p9 = scmp.lt.s32.totalorder %s2000_s10, %s1716_s23 }
  0x31   : > { %p1713_p3 = pnand %p1711_p1, %p2007_p2  ;;  %p1719_p8 = scmp.lt.s32.totalorder %s1717_s28, %s1710_s5 }
  0x33   : > { %p1714_p11 = pneg %p1713_p3  ;;  %p1720_p5 = por %p1719_p8, %p1718_p9 }
  0x35   : > { %p1721_p6 = pnand %p1720_p5, %p1714_p11 }
  0x37   : > { %1724 = shalt.err (!%p1721_p6)
}
  0x38   : > { %s2518_s21 = smov 192   ;;  %s2520_s6 = smov 64  }
  0x39   : > { %s2522_s7 = smov 4   ;;  %p1430_p8 = scmp.ge.s32.totalorder %s1873_s17, 1 }
  0x3a   : > { %1549 = dma.hbm_to_vmem [thread:$0]  (!%p1988_p0), %s1998_s11, 128, %s2000_s10, %s2002_s19, %s2518_s21, %s2520_s6, %s2522_s7  }
  0x3b   : > { %p255_p9 = scmp.lt.s32.totalorder %s1873_s17, 3  ;;  %s2539_s0 = sld [smem:[#allocation18_spill]] }
  0x3c   : > { %s183_s28 = scalar_lea.vmem [#allocation5], %s1981_s29  ;;  %s2053_s21 = scalar_lea.hbm %s2513_s2, %s1984_s30 }
  0x3d   : > { %p2036_p11 = pnand %p1430_p8, %p255_p9  ;;  %s193_s1 = sshll.u32 %s183_s28, 4  ;;  %s2047_s1 = int_to_ptr.vmem [resolvable:$true] %s193_s1 }
  0x3e   : > { %s2540_s6 = sand.u32 1, %s1861_s14  }
  0x3f   : > { %s2538_s9 = scalar_select %p2036_p11, 1, 0 }
  0x40   : > { %s2057_s7 = scalar_lea.sflag [#allocation6], %s2540_s6 }
  0x41   : > { %s2044_s23 = scalar_lea.hbm %s2539_s0, %s1984_s30  ;;  %s1731_s16 = scalar_lea.hbm %s2539_s0, 768 }
  0x42   : > { %s1726_s20 = scalar_lea.hbm %s2044_s23, 128  ;;  %p1732_p10 = scmp.lt.u32.totalorder %s2044_s23, %s2539_s0 }
  0x43   : > { %p1727_p12 = scmp.ne.s32.totalorder %s2044_s23, %s1726_s20  ;;  %p1733_p13 = scmp.lt.u32.totalorder %s1731_s16, %s1726_s20 }
  0x44   : > { %p1735_p3 = scmp.lt.u32.totalorder %s1726_s20, %s2044_s23 }
  0x45   : > { %p1729_p4 = pnand %p1727_p12, %p2007_p2  ;;  %p1734_p1 = por %p1733_p13, %p1732_p10 }
  0x47   : > { %p1730_p7 = pneg %p1729_p4  ;;  %p1736_p5 = por %p1735_p3, %p1734_p1 }
  0x49   : > { %p1737_p6 = pnand %p1736_p5, %p1730_p7 }
  0x4b   : > { %1740 = shalt.err (!%p1737_p6)
}
  0x4c   : > { %s1741_s30 = scalar_lea.vmem %s2047_s1, 128  ;;  %s1879_s6 = smov [#allocation5]  }
  0x4d   : > { %p1742_p8 = scmp.ne.s32.totalorder %s2047_s1, %s1741_s30  ;;  %s1746_s10 = sshll.u32 %s1879_s6, 4  ;;  %s1747_s10 = int_to_ptr.vmem [resolvable:$false] %s1746_s10 }
  0x4e   : > { %s1748_s26 = scalar_lea.vmem %s1747_s10, 256  ;;  %p1749_p4 = scmp.lt.s32.totalorder %s2047_s1, %s1747_s10 }
  0x4f   : > { %p1744_p9 = pnand %p1742_p8, %p2007_p2  ;;  %p1750_p11 = scmp.lt.s32.totalorder %s1748_s26, %s1741_s30 }
  0x51   : > { %p1745_p12 = pneg %p1744_p9  ;;  %p1751_p10 = por %p1750_p11, %p1749_p4 }
  0x53   : > { %p1752_p13 = pnand %p1751_p10, %p1745_p12 }
  0x55   : > { %1755 = shalt.err (!%p1752_p13)
}
  0x56   : > { %s2541_s16 = smov 4   ;;  %s2542_s20 = smov 64  }
  0x57   : > { %s2543_s11 = smov 192   ;;  %s2085_s5 = scalar_lea.hbm %s2053_s21, 128 }
  0x58   : > { %1546 = dma.hbm_to_vmem [thread:$0]  (!%p1988_p0), %s2044_s23, 128, %s2047_s1, %s2057_s7, %s2543_s11, %s2542_s20, %s2541_s16  }
  0x59   : > { %s234_s8 = scalar_lea.vmem [#allocation10], %s1981_s29  ;;  %s1786_s30 = scalar_lea.hbm %s2053_s21, 256 }
  0x5a   : > { %s247_s28 = sshll.u32 %s234_s8, 4  ;;  %p1757_p11 = scmp.ne.s32.totalorder %s2085_s5, %s1786_s30  ;;  %s2088_s28 = int_to_ptr.vmem [resolvable:$true] %s247_s28 }
  0x5b   : > { %s1761_s26 = scalar_lea.hbm %s2513_s2, 768  ;;  %p1762_p3 = scmp.lt.u32.totalorder %s2085_s5, %s2513_s2 }
  0x5c   : > { %p1759_p7 = pnand %p1757_p11, %p2007_p2  ;;  %p1763_p5 = scmp.lt.u32.totalorder %s1761_s26, %s1786_s30 }
  0x5d   : > { %p1765_p8 = scmp.lt.u32.totalorder %s1786_s30, %s2085_s5 }
  0x5e   : > { %p1760_p1 = pneg %p1759_p7  ;;  %p1764_p6 = por %p1763_p5, %p1762_p3 }
  0x60   : > { %p1766_p9 = por %p1765_p8, %p1764_p6 }
  0x62   : > { %p1767_p12 = pnand %p1766_p9, %p1760_p1 }
  0x64   : > { %1770 = shalt.err (!%p1767_p12)
}
  0x65   : > { %s1771_s29 = scalar_lea.vmem %s2088_s28, 128  ;;  %s1880_s21 = smov [#allocation10]  }
  0x66   : > { %p1772_p4 = scmp.ne.s32.totalorder %s2088_s28, %s1771_s29  ;;  %s1776_s7 = sshll.u32 %s1880_s21, 4  ;;  %s1777_s7 = int_to_ptr.vmem [resolvable:$false] %s1776_s7 }
  0x67   : > { %s1778_s0 = scalar_lea.vmem %s1777_s7, 256  ;;  %p1779_p11 = scmp.lt.s32.totalorder %s2088_s28, %s1777_s7 }
  0x68   : > { %p1774_p10 = pnand %p1772_p4, %p2007_p2  ;;  %p1780_p7 = scmp.lt.s32.totalorder %s1778_s0, %s1771_s29 }
  0x6a   : > { %p1775_p13 = pneg %p1774_p10  ;;  %p1781_p3 = por %p1780_p7, %p1779_p11 }
  0x6c   : > { %p1782_p5 = pnand %p1781_p3, %p1775_p13 }
  0x6e   : > { %1785 = shalt.err (!%p1782_p5)
}
  0x6f   : > { %1552 = dma.hbm_to_vmem [thread:$0]  (!%p1988_p0), %s2085_s5, 128, %s2088_s28, %s2002_s19, %s2543_s11, %s2542_s20, %s2541_s16  }
  0x70   : > { %p2544_p2 = scmp.ne.s32.totalorder %s2538_s9, 0 }
  0x71   : > { %s2118_s22 = sand.u32 (!%p2544_p2), 1, %s1857_s13   ;;  %p2545_p1 = scmp.ne.s32.totalorder (!%p2544_p2), %s2531_s24, 0 }
  0x72   : > { %259 = sbr.rel (%p2544_p2) target bundleno = 1606 (0x646), region = 32  ;;  %s2121_s23 = sshll.u32 (!%p2544_p2), %s2118_s22, 3 }
  0x73   : > { %s262_s4 = scalar_lea.sflag (!%p2544_p2), [#allocation6], %s2118_s22  ;;  %s2125_s8 = scalar_lea.vmem (!%p2544_p2), [#allocation5], %s2121_s23 }
  0x79   : > { %1840 = dma.done.wait (%p2545_p1), %s262_s4, 128  }
  0x7a   : > { %1842 = vsyncadd (%p2545_p1), %s262_s4, 4294967168  ;;  %s270_s19 = sand.u32 1, %s1941_s18   ;;  %s2133_s16 = scalar_lea.vmem [#allocation8], %s2121_s23 }
  0x7b   : > { %s271_s9 = scalar_lea.sflag [#allocation9], %s270_s19 }
  0x7c   : > { %1844 = dma.done.wait (%p2545_p1), %s271_s9, 256  }
  0x7d   : > { %1846 = vsyncadd (%p2545_p1), %s271_s9, 4294967040  ;;  %vm346_vm0 = vcmask 261120   ;;  %v1881_v0 = vmov 0.0   ;;  %vm1882_vm1 = vmmov 0   ;;  %v1635_v1 = vld [vmem:[%s2133_s16] sm:$0xff]   ;;  %v1636_v3 = vld [vmem:[%s2125_s8] sm:$0xff]   ;;  %v360_v5 = vlaneseq }
  0x7e   : > { %1486 = vmatprep.subr.bf16.mxu0 %v1881_v0  ;;  %347 = vst.msk [vmem:[#allocation4] sm:$0xff] %vm346_vm0, %v1881_v0  ;;  %348 = vst.msk [vmem:[#allocation4 + $0x8] sm:$0xff] %vm346_vm0, %v1881_v0  ;;  %1488 = vmatprep.mubr.msk.bf16.mxu0 %vm1882_vm1, %v1881_v0  ;;  %v394_v2 = vsel %vm346_vm0, %v1635_v1, 0  ;;  %vm329_vm2 = vcmask 7168   ;;  %v1883_v4 = vmov -inf   ;;  %vm443_vm4 = vcmask 130048  }
  0x7f   : > { %349 = vst.msk [vmem:[#allocation4 + $0x10] sm:$0xff] %vm346_vm0, %v1881_v0  ;;  %350 = vst.msk [vmem:[#allocation4 + $0x18] sm:$0xff] %vm346_vm0, %v1881_v0  ;;  %1492 = vmatprep.subr.bf16.mxu1 %v1881_v0  ;;  %1494 = vmatprep.mubr.msk.bf16.mxu1 %vm1882_vm1, %v1881_v0  ;;  %v2192_v6 = vshrl.u32 %v360_v5, 7  ;;  %v2194_v7 = vand.u32 127, %v360_v5  ;;  %v1884_v19 = vmov 0   ;;  %v1637_v20 = vld [vmem:[%s2133_s16] sm:$0xff]  }
  0x80   : > { %351 = vst.msk [vmem:[#allocation4 + $0x20] sm:$0xff] %vm346_vm0, %v1881_v0  ;;  %352 = vst.msk [vmem:[#allocation4 + $0x28] sm:$0xff] %vm346_vm0, %v1881_v0  ;;  %1487 = vmatpush3.bf16.xpose.msra.mxu0 %v394_v2  ;;  %1618 = vset.pattern.permute.xlu1 %v1884_v19  ;;  %s1885_s18 = smov 96   ;;  %v1638_v29 = vld [vmem:[%s2125_s8] sm:$0xff]   ;;  %v1639_v30 = vld [vmem:[%s2133_s16] sm:$0xff]   ;;  %s2237_s24 = scalar_lea.vmem [#allocation10], %s2121_s23 }
  0x81   : > { %353 = vst.msk [vmem:[#allocation4 + $0x30] sm:$0xff] %vm346_vm0, %v1881_v0  ;;  %354 = vst.msk [vmem:[#allocation4 + $0x38] sm:$0xff] %vm346_vm0, %v1881_v0  ;;  %1504 = vmatprep.subr.bf16.mxu0 %v1881_v0  ;;  %v2197_v8 = vadd.s32 8, %v2192_v6  ;;  %vm371_vm3 = vcmp.le.s32.totalorder %v2194_v7, %v2192_v6  ;;  %1619 = vset.pattern.permute.xlu0 %v1884_v19  ;;  %v1643_v31 = vld [vmem:[%s2237_s24] sm:$0xff]   ;;  %s1886_s20 = smov 64   ;;  %v1641_v33 = vld [vmem:[%s2133_s16] sm:$0xff]  }
  0x82   : > { %330 = vst.msk [vmem:[#allocation2] sm:$0xff] %vm329_vm2, %v1883_v4  ;;  %331 = vst.msk [vmem:[#allocation2 + $0x8] sm:$0xff] %vm329_vm2, %v1883_v4  ;;  %1493 = vmatpush3.bf16.msra.mxu1 %v1643_v31  ;;  %v1640_v32 = vld [vmem:[%s2125_s8] sm:$0xff]   ;;  %s1887_s11 = smov 32   ;;  %vm1247_vm6 = vcmask 523264   ;;  %vm1250_vm7 = vcmask 785408  }
  0x83   : > { %332 = vst.msk [vmem:[#allocation2 + $0x10] sm:$0xff] %vm329_vm2, %v1883_v4  ;;  %333 = vst.msk [vmem:[#allocation2 + $0x18] sm:$0xff] %vm329_vm2, %v1883_v4  ;;  %vm372_vm5 = vcmp.le.s32.totalorder %v2194_v7, %v2197_v8  ;;  %1498 = vmatprep.subr.bf16.mxu1 %v1881_v0  ;;  %v1642_v34 = vld [vmem:[%s2125_s8] sm:$0xff]   ;;  %s1464_s5 = sshll.u32 %s1865_s15, 7  ;;  %s315_s28 = scalar_lea.vmem [#allocation11], %s2121_s23 }
  0x84   : > { %334 = vst.msk [vmem:[#allocation2 + $0x20] sm:$0xff] %vm329_vm2, %v1883_v4  ;;  %335 = vst.msk [vmem:[#allocation2 + $0x28] sm:$0xff] %vm329_vm2, %v1883_v4  ;;  %v1644_v8 = vld [vmem:[%s2237_s24] sm:$0xff]   ;;  %s1279_s30 = sshll.u32 %s315_s28, 4  ;;  %s2458_s26 = scalar_lea.hbm %s2514_s3, %s1464_s5  ;;  %s2460_s30 = int_to_ptr.vmem [resolvable:$true] %s1279_s30 }
  0x85   : > { %336 = vst.msk [vmem:[#allocation2 + $0x30] sm:$0xff] %vm329_vm2, %v1883_v4  ;;  %337 = vst.msk [vmem:[#allocation2 + $0x38] sm:$0xff] %vm329_vm2, %v1883_v4  ;;  %s1264_s15 = scalar_lea.sflag [#allocation7], %s2118_s22  ;;  %s1787_s1 = scalar_lea.vmem %s2460_s30, 128 }
  0x86   : > { %338 = vst.msk [vmem:[#allocation3] sm:$0xff] %vm329_vm2, %v1881_v0  ;;  %339 = vst.msk [vmem:[#allocation3 + $0x8] sm:$0xff] %vm329_vm2, %v1881_v0  ;;  %p1788_p0 = scmp.ne.s32.totalorder %s2460_s30, %s1787_s1  ;;  %p2546_p6 = scmp.ne.s32.totalorder %s2532_s25, 0 }
  0x87   : > { %1489 = vmatmul.mubr.msk.bf16.vlgmr.msra.gmra.mrb[0].mxu0 %vm346_vm0, %v1636_v3  ;;  %340 = vst.msk [vmem:[#allocation3 + $0x10] sm:$0xff] %vm329_vm2, %v1881_v0  ;;  %341 = vst.msk [vmem:[#allocation3 + $0x18] sm:$0xff] %vm329_vm2, %v1881_v0  ;;  %s1888_s29 = smov [#allocation11]  }
  0x88   : > { %1506 = vmatprep.mubr.msk.bf16.mxu0 %vm1882_vm1, %v1881_v0  ;;  %342 = vst.msk [vmem:[#allocation3 + $0x20] sm:$0xff] %vm329_vm2, %v1881_v0  ;;  %343 = vst.msk [vmem:[#allocation3 + $0x28] sm:$0xff] %vm329_vm2, %v1881_v0  ;;  %p1789_p8 = pnand %p1788_p0, %p2546_p6  ;;  %s1791_s21 = sshll.u32 %s1888_s29, 4  ;;  %s1792_s21 = int_to_ptr.vmem [resolvable:$false] %s1791_s21 }
  0x89   : > { %344 = vst.msk [vmem:[#allocation3 + $0x30] sm:$0xff] %vm329_vm2, %v1881_v0  ;;  %345 = vst.msk [vmem:[#allocation3 + $0x38] sm:$0xff] %vm329_vm2, %v1881_v0  ;;  %v2213_v21 = vld [vmem:[#allocation2] sm:$0xff]  ;;  %v2218_v24 = vld [vmem:[#allocation2 + $0x8] sm:$0xff]  ;;  %s1793_s7 = scalar_lea.vmem %s1792_s21, 256  ;;  %p1794_p12 = scmp.lt.s32.totalorder %s2460_s30, %s1792_s21 }
  0x8a   : > { %v2317_v6 = vld [vmem:[#allocation2 + $0x18] sm:$0xff]  ;;  %p1790_p9 = pneg %p1789_p8  ;;  %p1795_p4 = scmp.lt.s32.totalorder %s1793_s7, %s1787_s1 }
  0x8c   : > { %p1796_p10 = por %p1795_p4, %p1794_p12 }
  0x8e   : > { %p1797_p13 = pnand %p1796_p10, %p1790_p9 }
 0x15a   : > { %v430_v9 = vpop.f32.mrb[0].mxu0 }
 0x15b   : > { %v437_v10 = vmul.f32 0.17677669, %v430_v9  ;;  %v1490_v11 = vpop.f32.mrb[1].mxu0 }
 0x15c   : > { %v433_v12 = vpop.f32.mrb[2].mxu0 }
 0x15d   : > { %v438_v13 = vmul.f32 0.17677669, %v433_v12  ;;  %v1491_v14 = vpop.f32.mrb[3].mxu0  ;;  %v439_v15 = vsel %vm371_vm3, %v437_v10, -10000.0 }
 0x15e   : > { %v444_v16 = vsel %vm443_vm4, %v439_v15, -inf }
 0x15f   : > { %445 = vmax.xlane.f32.xlu0 %v444_v16  ;;  %v440_v17 = vsel %vm372_vm5, %v438_v13, -10000.0 }
 0x160   : > { %v447_v18 = vsel %vm443_vm4, %v440_v17, -inf }
 0x163   : > { %448 = vmax.xlane.f32.xlu0 %v447_v18 }
 0x179   : > { %578 = vrot.lane.b32.xlu0 %v1637_v20, %s1885_s18 }
 0x1ec   : > { %v446_v22 = vpop.xlane.xlu0 %445 }
 0x1ed   : > { %v2216_v23 = vmax.f32 %v2213_v21, %v446_v22 }
 0x1ef   : > { %v452_v25 = vsub.f32 %v2213_v21, %v2216_v23  ;;  %558 = vst.msk [vmem:[#allocation2] sm:$0xff] %vm329_vm2, %v2216_v23  ;;  %460 = vperm.xlu1 %1618, %v2216_v23  }
 0x1f0   : > { %v449_v26 = vpop.xlane.xlu0 %448 }
 0x1f1   : > { %v2226_v27 = vmax.f32 %v2218_v24, %v449_v26 }
 0x1f3   : > { %v453_v28 = vsub.f32 %v2218_v24, %v2226_v27  ;;  %559 = vst.msk [vmem:[#allocation2 + $0x8] sm:$0xff] %vm329_vm2, %v2226_v27  ;;  %465 = vperm.xlu1 %1618, %v2226_v27   ;;  %v454_v24 = vmul.f32 1.442695, %v452_v25 }
 0x1f4   : > { %v579_v42 = vpop.permute.xlu0 %578 }
 0x1f5   : > { %v584_v45 = vsel %vm346_vm0, %v579_v42, 0 }
 0x1f7   : > { %571 = vrot.lane.b32.xlu1 %v1638_v29, %s1885_s18 }
 0x1fb   : > { %771 = vrot.lane.b32.xlu1 %v1639_v30, %s1886_s20 }
 0x1ff   : > { %764 = vrot.lane.b32.xlu1 %v1640_v32, %s1886_s20 }
 0x203   : > { %964 = vrot.lane.b32.xlu1 %v1641_v33, %s1887_s11  ;;  %v2315_v33 = vld [vmem:[#allocation2 + $0x10] sm:$0xff] }
 0x207   : > { %957 = vrot.lane.b32.xlu1 %v1642_v34, %s1887_s11 }
 0x26e   : > { %v461_v35 = vpop.permute.xlu1 %460 }
 0x26f   : > { %v468_v36 = vsub.f32 %v439_v15, %v461_v35 }
 0x271   : > { %v470_v37 = vmul.f32 1.442695, %v468_v36 }
 0x272   : > { %v466_v38 = vpop.permute.xlu1 %465 }
 0x273   : > { %v469_v39 = vsub.f32 %v440_v17, %v466_v38  ;;  %1647 = vpow2.f32 %v470_v37 }
 0x275   : > { %v472_v40 = vmul.f32 1.442695, %v469_v39  ;;  %v2336_v39 = vld [vmem:[#allocation2 + $0x20] sm:$0xff] }
 0x276   : > { %v572_v41 = vpop.permute.xlu1 %571 }
 0x277   : > { %1649 = vpow2.f32 %v472_v40 }
 0x27a   : > { %v772_v47 = vpop.permute.xlu1 %771 }
 0x27b   : > { %v777_v49 = vsel %vm346_vm0, %v772_v47, 0 }
 0x27d   : > { %v2248_v43 = vpop.eup %1647 }
 0x27e   : > { %v765_v48 = vpop.permute.xlu1 %764 }
 0x281   : > { %v2250_v44 = vpop.eup %1649 }
 0x282   : > { %v503_v46 = vpack.c.bf16 %v2250_v44, %v2248_v43  ;;  %v965_v50 = vpop.permute.xlu1 %964 }
 0x283   : > { %v970_v51 = vsel %vm346_vm0, %v965_v50, 0 }
 0x284   : > { %1495 = vmatmul.mubr.msk.bf16.vlgmr.msra.gmra.mrb[0].mxu1 %vm443_vm4, %v503_v46 }
 0x285   : > { %1499 = vmatpush3.bf16.xpose.msra.mxu1 %v584_v45  ;;  %1500 = vmatprep.mubr.msk.bf16.mxu1 %vm1882_vm1, %v1881_v0 }
 0x286   : > { %1510 = vmatprep.subr.bf16.mxu1 %v1881_v0  ;;  %v958_v52 = vpop.permute.xlu1 %957 }
 0x28c   : > { %1501 = vmatmul.mubr.msk.bf16.vlgmr.msra.gmra.mrb[4].mxu1 %vm346_vm0, %v572_v41  ;;  %v2339_v41 = vld [vmem:[#allocation2 + $0x28] sm:$0xff] }
 0x28d   : > { %1511 = vmatpush3.bf16.xpose.msra.mxu1 %v777_v49  ;;  %1512 = vmatprep.mubr.msk.bf16.mxu1 %vm1882_vm1, %v1881_v0  ;;  %v2356_v49 = vld [vmem:[#allocation2 + $0x30] sm:$0xff] }
 0x28e   : > { %1522 = vmatprep.subr.bf16.mxu1 %v1881_v0 }
 0x294   : > { %1513 = vmatmul.mubr.msk.bf16.vlgmr.msra.gmra.mrb[8].mxu1 %vm346_vm0, %v765_v48 }
 0x295   : > { %1523 = vmatpush3.bf16.xpose.msra.mxu1 %v970_v51  ;;  %1524 = vmatprep.mubr.msk.bf16.mxu1 %vm1882_vm1, %v1881_v0  ;;  %v2359_v51 = vld [vmem:[#allocation2 + $0x38] sm:$0xff] }
 0x29c   : > { %1525 = vmatmul.mubr.msk.bf16.vlgmr.msra.gmra.mrb[12].mxu1 %vm346_vm0, %v958_v52 }
 0x357   : > { %v2269_v53 = vpop.f32.mrb[0].mxu1 }
 0x358   : > { %v1496_v54 = vpop.f32.mrb[1].mxu1 }
 0x359   : > { %v2271_v55 = vpop.f32.mrb[2].mxu1 }
 0x35a   : > { %v1497_v56 = vpop.f32.mrb[3].mxu1 }
 0x35f   : > { %v620_v57 = vpop.f32.mrb[4].mxu1 }
 0x360   : > { %v627_v58 = vmul.f32 0.17677669, %v620_v57  ;;  %v1502_v59 = vpop.f32.mrb[5].mxu1 }
 0x361   : > { %v623_v60 = vpop.f32.mrb[6].mxu1  ;;  %v1645_v59 = vld [vmem:[%s2237_s24] sm:$0xff]  }
 0x362   : > { %v628_v61 = vmul.f32 0.17677669, %v623_v60  ;;  %v1503_v62 = vpop.f32.mrb[7].mxu1  ;;  %v2276_v63 = vsel %vm371_vm3, %v627_v58, -10000.0  ;;  %v1646_v60 = vld [vmem:[%s2237_s24] sm:$0xff]  }
 0x363   : > { %v634_v1 = vsel %vm443_vm4, %v2276_v63, -inf  ;;  %v478_v62 = vsel %vm443_vm4, %v2248_v43, 0.0 }
 0x364   : > { %635 = vmax.xlane.f32.xlu1 %v634_v1  ;;  %v2283_v2 = vsel %vm372_vm5, %v628_v61, -10000.0  ;;  %v481_v61 = vsel %vm443_vm4, %v2250_v44, 0.0 }
 0x365   : > { %v637_v3 = vsel %vm443_vm4, %v2283_v2, -inf }
 0x366   : > { %638 = vmax.xlane.f32.xlu0 %v637_v3 }
 0x367   : > { %v813_v4 = vpop.f32.mrb[8].mxu1 }
 0x368   : > { %v820_v5 = vmul.f32 0.17677669, %v813_v4  ;;  %v1514_v9 = vpop.f32.mrb[9].mxu1 }
 0x369   : > { %v816_v10 = vpop.f32.mrb[10].mxu1 }
 0x36a   : > { %v821_v11 = vmul.f32 0.17677669, %v816_v10  ;;  %v1515_v12 = vpop.f32.mrb[11].mxu1  ;;  %v2290_v13 = vsel %vm371_vm3, %v820_v5, -10000.0 }
 0x36b   : > { %v827_v14 = vsel %vm443_vm4, %v2290_v13, -inf }
 0x36c   : > { %828 = vmax.xlane.f32.xlu0 %v827_v14  ;;  %v2297_v15 = vsel %vm372_vm5, %v821_v11, -10000.0 }
 0x36d   : > { %v830_v16 = vsel %vm443_vm4, %v2297_v15, -inf }
 0x36e   : > { %831 = vmax.xlane.f32.xlu1 %v830_v16 }
 0x36f   : > { %v1006_v17 = vpop.f32.mrb[12].mxu1 }
 0x370   : > { %v1013_v18 = vmul.f32 0.17677669, %v1006_v17  ;;  %v1526_v19 = vpop.f32.mrb[13].mxu1 }
 0x371   : > { %v1009_v20 = vpop.f32.mrb[14].mxu1 }
 0x372   : > { %v1014_v22 = vmul.f32 0.17677669, %v1009_v20  ;;  %v1527_v26 = vpop.f32.mrb[15].mxu1  ;;  %v2304_v29 = vsel %vm371_vm3, %v1013_v18, -10000.0 }
 0x373   : > { %v1020_v30 = vsel %vm443_vm4, %v2304_v29, -inf }
 0x374   : > { %1021 = vmax.xlane.f32.xlu0 %v1020_v30  ;;  %v2311_v31 = vsel %vm372_vm5, %v1014_v22, -10000.0 }
 0x375   : > { %v1023_v32 = vsel %vm443_vm4, %v2311_v31, -inf }
 0x376   : > { %1024 = vmax.xlane.f32.xlu1 %v1023_v32 }
 0x3f1   : > { %v636_v34 = vpop.xlane.xlu1 %635 }
 0x3f2   : > { %v2320_v35 = vmax.f32 %v2315_v33, %v636_v34 }
 0x3f3   : > { %v639_v36 = vpop.xlane.xlu0 %638 }
 0x3f4   : > { %v642_v37 = vsub.f32 %v2315_v33, %v2320_v35  ;;  %751 = vst.msk [vmem:[#allocation2 + $0x10] sm:$0xff] %vm329_vm2, %v2320_v35  ;;  %v2327_v7 = vmax.f32 %v2317_v6, %v639_v36  ;;  %650 = vperm.xlu0 %1619, %v2320_v35  }
 0x3f6   : > { %v643_v38 = vsub.f32 %v2317_v6, %v2327_v7  ;;  %752 = vst.msk [vmem:[#allocation2 + $0x18] sm:$0xff] %vm329_vm2, %v2327_v7  ;;  %655 = vperm.xlu1 %1618, %v2327_v7  }
 0x3f8   : > { %1086 = vrot.lane.b32.xlu0 %v1644_v8, %s1887_s11 }
 0x3f9   : > { %v829_v40 = vpop.xlane.xlu0 %828 }
 0x3fa   : > { %v2342_v42 = vmax.f32 %v2336_v39, %v829_v40 }
 0x3fb   : > { %v832_v45 = vpop.xlane.xlu1 %831 }
 0x3fc   : > { %v835_v46 = vsub.f32 %v2336_v39, %v2342_v42  ;;  %944 = vst.msk [vmem:[#allocation2 + $0x20] sm:$0xff] %vm329_vm2, %v2342_v42  ;;  %v2349_v47 = vmax.f32 %v2339_v41, %v832_v45  ;;  %843 = vperm.xlu1 %1618, %v2342_v42   ;;  %v456_v45 = vmul.f32 1.442695, %v453_v28  ;;  %v646_v28 = vmul.f32 1.442695, %v643_v38 }
 0x3fe   : > { %v836_v48 = vsub.f32 %v2339_v41, %v2349_v47  ;;  %945 = vst.msk [vmem:[#allocation2 + $0x28] sm:$0xff] %vm329_vm2, %v2349_v47 }
 0x400   : > { %848 = vperm.xlu1 %1618, %v2349_v47   ;;  %v839_v21 = vmul.f32 1.442695, %v836_v48 }
 0x401   : > { %v1022_v50 = vpop.xlane.xlu0 %1021 }
 0x402   : > { %v2362_v52 = vmax.f32 %v2356_v49, %v1022_v50 }
 0x403   : > { %v1025_v54 = vpop.xlane.xlu1 %1024 }
 0x404   : > { %v1028_v56 = vsub.f32 %v2356_v49, %v2362_v52  ;;  %1137 = vst.msk [vmem:[#allocation2 + $0x30] sm:$0xff] %vm329_vm2, %v2362_v52  ;;  %v2369_v57 = vmax.f32 %v2359_v51, %v1025_v54  ;;  %1036 = vperm.xlu1 %1618, %v2362_v52   ;;  %v474_v49 = vld [vmem:[#allocation3] sm:$0xff] }
 0x406   : > { %v1029_v58 = vsub.f32 %v2359_v51, %v2369_v57  ;;  %1138 = vst.msk [vmem:[#allocation2 + $0x38] sm:$0xff] %vm329_vm2, %v2369_v57  ;;  %v1030_v33 = vmul.f32 1.442695, %v1028_v56 }
 0x408   : > { %1041 = vperm.xlu1 %1618, %v2369_v57   ;;  %v1032_v35 = vmul.f32 1.442695, %v1029_v58 }
 0x40c   : > { %700 = vrot.lane.b32.xlu1 %v1645_v59, %s1885_s18 }
 0x410   : > { %893 = vrot.lane.b32.xlu1 %v1646_v60, %s1886_s20 }
 0x417   : > { %482 = vadd.xlane.f32.xlu0 %v481_v61 }
 0x434   : > { %479 = vadd.xlane.f32.xlu1 %v478_v62  ;;  %v644_v62 = vmul.f32 1.442695, %v642_v37 }
 0x473   : > { %v651_v1 = vpop.permute.xlu0 %650 }
 0x474   : > { %v658_v3 = vsub.f32 %v2276_v63, %v651_v1 }
 0x475   : > { %v656_v4 = vpop.permute.xlu1 %655 }
 0x476   : > { %v660_v5 = vmul.f32 1.442695, %v658_v3  ;;  %v659_v9 = vsub.f32 %v2283_v2, %v656_v4  ;;  %v475_v3 = vld [vmem:[#allocation3 + $0x8] sm:$0xff]  ;;  %v665_v4 = vld [vmem:[#allocation3 + $0x10] sm:$0xff] }
 0x477   : > { %v1087_v59 = vpop.permute.xlu0 %1086 }
 0x478   : > { %1651 = vpow2.f32 %v660_v5  ;;  %v662_v10 = vmul.f32 1.442695, %v659_v9  ;;  %v666_v5 = vld [vmem:[#allocation3 + $0x18] sm:$0xff] }
 0x47a   : > { %1653 = vpow2.f32 %v662_v10 }
 0x47b   : > { %v844_v11 = vpop.permute.xlu1 %843 }
 0x47c   : > { %v851_v12 = vsub.f32 %v2290_v13, %v844_v11 }
 0x47e   : > { %v853_v14 = vmul.f32 1.442695, %v851_v12 }
 0x47f   : > { %v849_v44 = vpop.permute.xlu1 %848 }
 0x480   : > { %1655 = vpow2.f32 %v853_v14  ;;  %v852_v16 = vsub.f32 %v2297_v15, %v849_v44 }
 0x482   : > { %v1652_v43 = vpop.eup %1651  ;;  %v855_v17 = vmul.f32 1.442695, %v852_v16  ;;  %v858_v16 = vld [vmem:[#allocation3 + $0x20] sm:$0xff] }
 0x483   : > { %v1037_v18 = vpop.permute.xlu1 %1036  ;;  %v669_v63 = vsel %vm443_vm4, %v1652_v43, 0.0 }
 0x484   : > { %v1654_v19 = vpop.eup %1653  ;;  %1657 = vpow2.f32 %v855_v17  ;;  %v1044_v2 = vsub.f32 %v2304_v29, %v1037_v18  ;;  %670 = vadd.xlane.f32.xlu1 %v669_v63  ;;  %v859_v18 = vld [vmem:[#allocation3 + $0x28] sm:$0xff] }
 0x485   : > { %v672_v20 = vsel %vm443_vm4, %v1654_v19, 0.0  ;;  %v694_v36 = vpack.c.bf16 %v1654_v19, %v1652_v43 }
 0x486   : > { %v1046_v22 = vmul.f32 1.442695, %v1044_v2  ;;  %673 = vadd.xlane.f32.xlu0 %v672_v20 }
 0x487   : > { %v1042_v13 = vpop.permute.xlu1 %1041 }
 0x488   : > { %1659 = vpow2.f32 %v1046_v22  ;;  %v1045_v26 = vsub.f32 %v2311_v31, %v1042_v13  ;;  %v1051_v22 = vld [vmem:[#allocation3 + $0x30] sm:$0xff] }
 0x48a   : > { %v1656_v30 = vpop.eup %1655  ;;  %v1048_v15 = vmul.f32 1.442695, %v1045_v26 }
 0x48b   : > { %v701_v32 = vpop.permute.xlu1 %700  ;;  %v862_v34 = vsel %vm443_vm4, %v1656_v30, 0.0 }
 0x48c   : > { %1661 = vpow2.f32 %v1048_v15  ;;  %863 = vadd.xlane.f32.xlu0 %v862_v34  ;;  %1505 = vmatpush3.bf16.msra.mxu0 %v701_v32  ;;  %v1052_v32 = vld [vmem:[#allocation3 + $0x38] sm:$0xff] }
 0x48d   : > { %1516 = vmatprep.subr.bf16.mxu0 %v1881_v0  ;;  %1663 = vpow2.f32 %v456_v45  ;;  %v490_v45 = vld [vmem:[#allocation4 + $0x8] sm:$0xff] }
 0x48e   : > { %v1658_v29 = vpop.eup %1657  ;;  %1665 = vpow2.f32 %v454_v24 }
 0x48f   : > { %1507 = vmatmul.mubr.msk.bf16.vlgmr.msra.gmra.mrb[4].mxu0 %vm443_vm4, %v694_v36  ;;  %v865_v8 = vsel %vm443_vm4, %v1658_v29, 0.0  ;;  %v894_v40 = vpop.permute.xlu1 %893  ;;  %v887_v54 = vpack.c.bf16 %v1658_v29, %v1656_v30  ;;  %1667 = vpow2.f32 %v646_v28 }
 0x490   : > { %866 = vadd.xlane.f32.xlu1 %v865_v8  ;;  %1517 = vmatpush3.bf16.msra.mxu0 %v894_v40  ;;  %1669 = vpow2.f32 %v644_v62 }
 0x491   : > { %1518 = vmatprep.mubr.msk.bf16.mxu0 %vm1882_vm1, %v1881_v0  ;;  %1528 = vmatprep.subr.bf16.mxu0 %v1881_v0 }
 0x492   : > { %v1660_v31 = vpop.eup %1659 }
 0x493   : > { %v1055_v50 = vsel %vm443_vm4, %v1660_v31, 0.0 }
 0x494   : > { %1056 = vadd.xlane.f32.xlu0 %v1055_v50  ;;  %v489_v50 = vld [vmem:[#allocation4] sm:$0xff] }
 0x496   : > { %v1662_v60 = vpop.eup %1661 }
 0x497   : > { %1519 = vmatmul.mubr.msk.bf16.vlgmr.msra.gmra.mrb[8].mxu0 %vm443_vm4, %v887_v54  ;;  %v1058_v61 = vsel %vm443_vm4, %v1662_v60, 0.0  ;;  %v1080_v27 = vpack.c.bf16 %v1662_v60, %v1660_v31  ;;  %v1664_v1 = vpop.eup %1663 }
 0x498   : > { %1059 = vadd.xlane.f32.xlu1 %v1058_v61  ;;  %1529 = vmatpush3.bf16.msra.mxu0 %v1087_v59  ;;  %v477_v23 = vmul.f32 %v1664_v1, %v475_v3  ;;  %v1666_v37 = vpop.eup %1665 }
 0x499   : > { %1530 = vmatprep.mubr.msk.bf16.mxu0 %vm1882_vm1, %v1881_v0  ;;  %v837_v0 = vmul.f32 1.442695, %v835_v46  ;;  %v1668_v7 = vpop.eup %1667  ;;  %v476_v51 = vmul.f32 %v1666_v37, %v474_v49  ;;  %v874_v49 = vld [vmem:[#allocation4 + $0x28] sm:$0xff] }
 0x49a   : > { %v1670_v38 = vpop.eup %1669  ;;  %v668_v12 = vmul.f32 %v1668_v7, %v666_v5 }
 0x49b   : > { %1671 = vpow2.f32 %v837_v0  ;;  %v667_v9 = vmul.f32 %v1670_v38, %v665_v4 }
 0x49c   : > { %1673 = vpow2.f32 %v839_v21 }
 0x49d   : > { %1675 = vpow2.f32 %v1030_v33 }
 0x49e   : > { %1677 = vpow2.f32 %v1032_v35 }
 0x49f   : > { %1531 = vmatmul.mubr.msk.bf16.vlgmr.msra.gmra.mrb[12].mxu0 %vm443_vm4, %v1080_v27 }
 0x4a4   : > { %v483_v25 = vpop.xlane.xlu0 %482 }
 0x4a5   : > { %v485_v6 = vadd.f32 %v483_v25, %v477_v23  ;;  %v1672_v41 = vpop.eup %1671 }
 0x4a6   : > { %v1674_v42 = vpop.eup %1673  ;;  %v860_v43 = vmul.f32 %v1672_v41, %v858_v16 }
 0x4a7   : > { %488 = vst.msk [vmem:[#allocation3 + $0x8] sm:$0xff] %vm329_vm2, %v485_v6  ;;  %v1676_v46 = vpop.eup %1675  ;;  %v861_v2 = vmul.f32 %v1674_v42, %v859_v18  ;;  %v680_v6 = vld [vmem:[#allocation4 + $0x10] sm:$0xff] }
 0x4a8   : > { %v1678_v47 = vpop.eup %1677  ;;  %v1053_v30 = vmul.f32 %v1676_v46, %v1051_v22 }
 0x4a9   : > { %498 = vperm.xlu1 %1618, %v1664_v1   ;;  %v1054_v29 = vmul.f32 %v1678_v47, %v1052_v32 }
 0x4aa   : > { %493 = vperm.xlu0 %1619, %v1666_v37  }
 0x4ad   : > { %689 = vperm.xlu1 %1618, %v1668_v7  }
 0x4ae   : > { %684 = vperm.xlu0 %1619, %v1670_v38   ;;  %v1143_v39 = vld [vmem:[#allocation3 + $0x8] sm:$0xff] }
 0x4af   : > { %1679 = vrcp.f32 %v1143_v39 }
 0x4b1   : > { %877 = vperm.xlu1 %1618, %v1672_v41  }
 0x4b2   : > { %882 = vperm.xlu0 %1619, %v1674_v42  }
 0x4b5   : > { %1070 = vperm.xlu1 %1618, %v1676_v46  }
 0x4b6   : > { %1075 = vperm.xlu0 %1619, %v1678_v47   ;;  %v873_v47 = vld [vmem:[#allocation4 + $0x20] sm:$0xff] }
 0x4b9   : > { %v1680_v48 = vpop.eup %1679 }
 0x4ba   : > { %1155 = vperm.xlu0 %1619, %v1680_v48  }
 0x4c1   : > { %v480_v52 = vpop.xlane.xlu1 %479 }
 0x4c2   : > { %v484_v56 = vadd.f32 %v480_v52, %v476_v51 }
 0x4c4   : > { %487 = vst.msk [vmem:[#allocation3] sm:$0xff] %vm329_vm2, %v484_v56 }
 0x4cb   : > { %v1142_v57 = vld [vmem:[#allocation3] sm:$0xff] }
 0x4cc   : > { %1681 = vrcp.f32 %v1142_v57 }
 0x4d6   : > { %v1682_v58 = vpop.eup %1681 }
 0x4d7   : > { %1150 = vperm.xlu1 %1618, %v1682_v58  }
 0x511   : > { %v671_v10 = vpop.xlane.xlu1 %670 }
 0x512   : > { %v675_v11 = vadd.f32 %v671_v10, %v667_v9 }
 0x513   : > { %v674_v14 = vpop.xlane.xlu0 %673 }
 0x514   : > { %677 = vst.msk [vmem:[#allocation3 + $0x10] sm:$0xff] %vm329_vm2, %v675_v11  ;;  %v676_v44 = vadd.f32 %v674_v14, %v668_v12  ;;  %v1066_v11 = vld [vmem:[#allocation4 + $0x30] sm:$0xff]  ;;  %v1067_v14 = vld [vmem:[#allocation4 + $0x38] sm:$0xff] }
 0x516   : > { %678 = vst.msk [vmem:[#allocation3 + $0x18] sm:$0xff] %vm329_vm2, %v676_v44 }
 0x519   : > { %v864_v17 = vpop.xlane.xlu0 %863 }
 0x51a   : > { %v868_v63 = vadd.f32 %v864_v17, %v860_v43 }
 0x51b   : > { %v1161_v19 = vld [vmem:[#allocation3 + $0x10] sm:$0xff] }
 0x51c   : > { %870 = vst.msk [vmem:[#allocation3 + $0x20] sm:$0xff] %vm329_vm2, %v868_v63  ;;  %1683 = vrcp.f32 %v1161_v19 }
 0x51d   : > { %v867_v20 = vpop.xlane.xlu1 %866  ;;  %v1162_v13 = vld [vmem:[#allocation3 + $0x18] sm:$0xff] }
 0x51e   : > { %v869_v26 = vadd.f32 %v867_v20, %v861_v2  ;;  %1685 = vrcp.f32 %v1162_v13 }
 0x520   : > { %871 = vst.msk [vmem:[#allocation3 + $0x28] sm:$0xff] %vm329_vm2, %v869_v26 }
 0x521   : > { %v1057_v15 = vpop.xlane.xlu0 %1056 }
 0x522   : > { %v1061_v34 = vadd.f32 %v1057_v15, %v1053_v30 }
 0x523   : > { %v1181_v36 = vld [vmem:[#allocation3 + $0x20] sm:$0xff] }
 0x524   : > { %1063 = vst.msk [vmem:[#allocation3 + $0x30] sm:$0xff] %vm329_vm2, %v1061_v34  ;;  %1687 = vrcp.f32 %v1181_v36 }
 0x525   : > { %v1060_v8 = vpop.xlane.xlu1 %1059 }
 0x526   : > { %v1684_v40 = vpop.eup %1683  ;;  %v1062_v31 = vadd.f32 %v1060_v8, %v1054_v29 }
 0x527   : > { %1170 = vperm.xlu1 %1618, %v1684_v40   ;;  %v1182_v54 = vld [vmem:[#allocation3 + $0x28] sm:$0xff] }
 0x528   : > { %v1686_v59 = vpop.eup %1685  ;;  %1064 = vst.msk [vmem:[#allocation3 + $0x38] sm:$0xff] %vm329_vm2, %v1062_v31  ;;  %1689 = vrcp.f32 %v1182_v54 }
 0x529   : > { %v499_v60 = vpop.permute.xlu1 %498  ;;  %1175 = vperm.xlu0 %1619, %v1686_v59   ;;  %v494_v61 = vpop.permute.xlu0 %493 }
 0x52a   : > { %v502_v24 = vmul.f32 %v499_v60, %v490_v45  ;;  %v501_v27 = vmul.f32 %v494_v61, %v489_v50 }
 0x52b   : > { %v1201_v28 = vld [vmem:[#allocation3 + $0x30] sm:$0xff] }
 0x52c   : > { %v555_v62 = vadd.f32 %v2271_v55, %v502_v24  ;;  %v554_v1 = vadd.f32 %v2269_v53, %v501_v27  ;;  %1691 = vrcp.f32 %v1201_v28  ;;  %v681_v55 = vld [vmem:[#allocation4 + $0x18] sm:$0xff] }
 0x52d   : > { %v685_v33 = vpop.permute.xlu0 %684  ;;  %v690_v35 = vpop.permute.xlu1 %689 }
 0x52e   : > { %v1688_v3 = vpop.eup %1687  ;;  %557 = vst.msk [vmem:[#allocation4 + $0x8] sm:$0xff] %vm346_vm0, %v555_v62  ;;  %556 = vst.msk [vmem:[#allocation4] sm:$0xff] %vm346_vm0, %v554_v1  ;;  %v692_v53 = vmul.f32 %v685_v33, %v680_v6  ;;  %v693_v7 = vmul.f32 %v690_v35, %v681_v55 }
 0x52f   : > { %1190 = vperm.xlu1 %1618, %v1688_v3   ;;  %v1202_v0 = vld [vmem:[#allocation3 + $0x38] sm:$0xff] }
 0x530   : > { %1693 = vrcp.f32 %v1202_v0 }
 0x531   : > { %v878_v48 = vpop.permute.xlu1 %877  ;;  %v883_v51 = vpop.permute.xlu0 %882 }
 0x532   : > { %v1690_v21 = vpop.eup %1689  ;;  %v885_v52 = vmul.f32 %v878_v48, %v873_v47  ;;  %v886_v57 = vmul.f32 %v883_v51, %v874_v49 }
 0x533   : > { %1195 = vperm.xlu0 %1619, %v1690_v21  }
 0x535   : > { %v1071_v12 = vpop.permute.xlu1 %1070  ;;  %v1076_v44 = vpop.permute.xlu0 %1075  ;;  %v1146_v6 = vld [vmem:[#allocation4] sm:$0xff] }
 0x536   : > { %v1692_v23 = vpop.eup %1691  ;;  %v1078_v16 = vmul.f32 %v1071_v12, %v1066_v11  ;;  %v1079_v17 = vmul.f32 %v1076_v44, %v1067_v14 }
 0x537   : > { %1210 = vperm.xlu1 %1618, %v1692_v23  }
 0x539   : > { %v1156_v13 = vpop.permute.xlu0 %1155 }
 0x53a   : > { %v1694_v25 = vpop.eup %1693 }
 0x53b   : > { %1215 = vperm.xlu0 %1619, %v1694_v25   ;;  %v1147_v25 = vld [vmem:[#allocation4 + $0x8] sm:$0xff] }
 0x53c   : > { %v1159_v35 = vmul.f32 %v1156_v13, %v1147_v25 }
 0x556   : > { %v1151_v22 = vpop.permute.xlu1 %1150 }
 0x562   : > { %v740_v37 = vpop.f32.mrb[4].mxu0 }
 0x563   : > { %v747_v38 = vadd.f32 %v740_v37, %v692_v53  ;;  %v1508_v39 = vpop.f32.mrb[5].mxu0  ;;  %v1158_v53 = vmul.f32 %v1151_v22, %v1146_v6 }
 0x564   : > { %v743_v41 = vpop.f32.mrb[6].mxu0 }
 0x565   : > { %749 = vst.msk [vmem:[#allocation4 + $0x10] sm:$0xff] %vm346_vm0, %v747_v38  ;;  %v748_v42 = vadd.f32 %v743_v41, %v693_v7  ;;  %v1509_v46 = vpop.f32.mrb[7].mxu0 }
 0x567   : > { %750 = vst.msk [vmem:[#allocation4 + $0x18] sm:$0xff] %vm346_vm0, %v748_v42 }
 0x56a   : > { %v933_v56 = vpop.f32.mrb[8].mxu0 }
 0x56b   : > { %v940_v58 = vadd.f32 %v933_v56, %v885_v52  ;;  %v1520_v4 = vpop.f32.mrb[9].mxu0 }
 0x56c   : > { %v936_v5 = vpop.f32.mrb[10].mxu0  ;;  %v1166_v30 = vld [vmem:[#allocation4 + $0x10] sm:$0xff] }
 0x56d   : > { %942 = vst.msk [vmem:[#allocation4 + $0x20] sm:$0xff] %vm346_vm0, %v940_v58  ;;  %v941_v9 = vadd.f32 %v936_v5, %v886_v57  ;;  %v1521_v10 = vpop.f32.mrb[11].mxu0 }
 0x56e   : > { %v1167_v15 = vld [vmem:[#allocation4 + $0x18] sm:$0xff] }
 0x56f   : > { %943 = vst.msk [vmem:[#allocation4 + $0x28] sm:$0xff] %vm346_vm0, %v941_v9 }
 0x572   : > { %v1126_v43 = vpop.f32.mrb[12].mxu0 }
 0x573   : > { %v1133_v18 = vadd.f32 %v1126_v43, %v1078_v16  ;;  %v1532_v63 = vpop.f32.mrb[13].mxu0 }
 0x574   : > { %v1129_v19 = vpop.f32.mrb[14].mxu0  ;;  %v1186_v40 = vld [vmem:[#allocation4 + $0x20] sm:$0xff] }
 0x575   : > { %1135 = vst.msk [vmem:[#allocation4 + $0x30] sm:$0xff] %vm346_vm0, %v1133_v18  ;;  %v1134_v2 = vadd.f32 %v1129_v19, %v1079_v17  ;;  %v1533_v20 = vpop.f32.mrb[15].mxu0 }
 0x576   : > { %v1187_v31 = vld [vmem:[#allocation4 + $0x28] sm:$0xff] }
 0x577   : > { %1136 = vst.msk [vmem:[#allocation4 + $0x38] sm:$0xff] %vm346_vm0, %v1134_v2 }
 0x57c   : > { %v1206_v61 = vld [vmem:[#allocation4 + $0x30] sm:$0xff] }
 0x57e   : > { %v1207_v24 = vld [vmem:[#allocation4 + $0x38] sm:$0xff] }
 0x5a6   : > { %v1171_v26 = vpop.permute.xlu1 %1170 }
 0x5a7   : > { %v1178_v34 = vmul.f32 %v1171_v26, %v1166_v30 }
 0x5a8   : > { %v1176_v32 = vpop.permute.xlu0 %1175 }
 0x5a9   : > { %v1179_v36 = vmul.f32 %v1176_v32, %v1167_v15 }
 0x5ab   : > { %v1620_v29 = vpack.i.bf16 %v1179_v36, %v1178_v34 }
 0x5ad   : > { %1621 = vrot.lane.b32.xlu1 %v1620_v29, %s1887_s11 }
 0x5ae   : > { %v1191_v8 = vpop.permute.xlu1 %1190 }
 0x5af   : > { %v1198_v50 = vmul.f32 %v1191_v8, %v1186_v40 }
 0x5b2   : > { %v1196_v45 = vpop.permute.xlu0 %1195 }
 0x5b3   : > { %v1199_v54 = vmul.f32 %v1196_v45, %v1187_v31 }
 0x5b5   : > { %v1625_v59 = vpack.i.bf16 %v1199_v54, %v1198_v50 }
 0x5b6   : > { %v1211_v60 = vpop.permute.xlu1 %1210 }
 0x5b7   : > { %1626 = vrot.lane.b32.xlu0 %v1625_v59, %s1886_s20  ;;  %v1218_v28 = vmul.f32 %v1211_v60, %v1206_v61 }
 0x5ba   : > { %v1216_v27 = vpop.permute.xlu0 %1215 }
 0x5bb   : > { %v1219_v62 = vmul.f32 %v1216_v27, %v1207_v24 }
 0x5bd   : > { %v1630_v1 = vpack.i.bf16 %v1219_v62, %v1218_v28 }
 0x5bf   : > { %1631 = vrot.lane.b32.xlu1 %v1630_v1, %s1885_s18 }
 0x61f   : > { %v1622_v3 = vpop.permute.xlu1 %1621 }
 0x620   : > { %v1624_v21 = vunpack.i.h.bf16 %v1622_v3  ;;  %v1623_v23 = vunpack.i.l.bf16 %v1622_v3 }
 0x622   : > { %v1246_v7 = vsel %vm346_vm0, %v1159_v35, %v1624_v21  ;;  %v1245_v38 = vsel %vm346_vm0, %v1158_v53, %v1623_v23 }
 0x629   : > { %v1627_v0 = vpop.permute.xlu0 %1626 }
 0x62a   : > { %v1629_v33 = vunpack.i.h.bf16 %v1627_v0  ;;  %v1628_v55 = vunpack.i.l.bf16 %v1627_v0 }
 0x62c   : > { %v1248_v42 = vsel %vm1247_vm6, %v1245_v38, %v1628_v55  ;;  %v1249_v46 = vsel %vm1247_vm6, %v1246_v7, %v1629_v33 }
 0x631   : > { %v1632_v37 = vpop.permute.xlu1 %1631 }
 0x632   : > { %v1634_v39 = vunpack.i.h.bf16 %v1632_v37  ;;  %v1633_v41 = vunpack.i.l.bf16 %v1632_v37 }
 0x634   : > { %v1251_v47 = vsel %vm1250_vm7, %v1248_v42, %v1633_v41  ;;  %v1252_v48 = vsel %vm1250_vm7, %v1249_v46, %v1634_v39 }
 0x635   : > { %v1468_v49 = vpack.c.bf16 %v1252_v48, %v1251_v47 }
 0x637   : > { %1469 = vst [vmem:[%s315_s28] sm:$0xff] %v1468_v49  }
 0x638   : > { %1800 = shalt.err (!%p1797_p13)
}
 0x639   : > { %s1801_s0 = scalar_lea.hbm %s2458_s26, 128  ;;  %s1805_s8 = scalar_lea.hbm %s2514_s3, 256 }
 0x63a   : > { %p1802_p11 = scmp.ne.s32.totalorder %s2458_s26, %s1801_s0  ;;  %p1806_p5 = scmp.lt.u32.totalorder %s2458_s26, %s2514_s3 }
 0x63b   : > { %p1807_p2 = scmp.lt.u32.totalorder %s1805_s8, %s1801_s0  ;;  %p1809_p0 = scmp.lt.u32.totalorder %s1801_s0, %s2458_s26 }
 0x63c   : > { %p1803_p7 = pnand %p1802_p11, %p2546_p6 }
 0x63d   : > { %p1808_p1 = por %p1807_p2, %p1806_p5 }
 0x63e   : > { %p1804_p3 = pneg %p1803_p7 }
 0x63f   : > { %p1810_p8 = por %p1809_p0, %p1808_p1 }
 0x641   : > { %p1811_p9 = pnand %p1810_p8, %p1804_p3 }
 0x643   : > { %1814 = shalt.err (!%p1811_p9)
}
 0x644   : > { %s1889_s16 = smov 4  }
 0x645   : > { %1541 = dma.vmem_to_hbm [thread:$0]  (%p2546_p6), %s2460_s30, 128, %s2458_s26, %s1264_s15, %s1886_s20, %s1886_s20, %s1889_s16  }
 0x646 PF: > { %s1294_s18 = sand.u32 1, %s1853_s12   ;;  %p2547_p12 = scmp.ne.s32.totalorder %s2534_s27, 0 }
 0x647   : > { %p2548_p4 = scmp.ge.s32.totalorder %s1873_s17, 2  ;;  %s1295_s24 = scalar_lea.sflag [#allocation7], %s1294_s18 }
 0x649   : > { %p1554_p10 = pnand %p2548_p4, %p2547_p12 }
 0x64b   : > { %1848 = dma.done.wait (!%p1554_p10), %s1295_s24, 128  }
 0x64c   : > { %1850 = vsyncadd (!%p1554_p10), %s1295_s24, 4294967168  ;;  %s22_s17 = sadd.s32 1, %s1873_s17   ;;  %s2549_s25 = sld [smem:[#allocation17_spill]] }
 0x64d   : > { %p19_p13 = scmp.ge.s32.totalorder %s22_s17, 4   ;;  %s2550_s15 = sld [smem:[#allocation15_spill]] }
 0x64e   : > { %s2551_s16 = sld [smem:[#allocation16_spill]]  ;;  %s2552_s12 = smov %s1857_s13 }
 0x64f   : > { %s2553_s13 = smov %s1861_s14  ;;  %21 = sbr.rel (!%p19_p13) target bundleno = 11 (0xb), region = 128 }
 0x652   : > { %s2554_s14 = smov %s2549_s25 }
 0x656   :  { %1300 = vsyncpa [#allocation6], 1 }
 0x657   :  { %1302 = vsyncpa [#allocation6 + $0x1], 1 }
 0x658   :  { %1303 = vsyncpa [#allocation9], 1 }
 0x659   :  { %1305 = vsyncpa [#allocation9 + $0x1], 1 }
 0x65a   :  { %1306 = vsyncpa [#allocation7], 1 }
 0x65b   :  { %1308 = vsyncpa [#allocation7 + $0x1], 1 }

// kernel: gpt1d_forward.15
= control target key start
LH: loop header
LB: loop body
LE: loop exit
PB: predicated region body
PF: predicated region fallthrough
CT: control target
= control target key end

     0   :  { %9 = vsyncpa [#allocation4], 0  ;;  %s969_s0 = inlined_call_operand.hbm [shape: bf16[32,512], index: 0, kind: input, shape index: {}]   ;;  %s970_s1 = inlined_call_operand.hbm [shape: bf16[512,128], index: 1, kind: input, shape index: {}]   ;;  %s971_s2 = inlined_call_operand.hbm [shape: f32[1,128], index: 2, kind: input, shape index: {}]   ;;  %s972_s3 = inlined_call_operand.hbm [shape: bf16[32,128], index: 3, kind: input, shape index: {}]   ;;  %s973_s4 = inlined_call_operand.hbm [shape: bf16[32,128], index: 4, kind: output, shape index: {}]  }
   0x1   :  { %10 = vsyncpa [#allocation7], 0 }
   0x2   :  { %11 = vsyncpa [#allocation10], 0 }
   0x3   :  { %12 = vsyncpa [#allocation5], 0  ;;  %s859_s15 = smov [#allocation6]   ;;  %s741_s19 = scalar_lea.hbm %s970_s1, 4096 }
   0x4   :  { %s30_s16 = sshll.u32 %s859_s15, 4  ;;  %p742_p0 = scmp.ne.s32.totalorder %s970_s1, %s741_s19  ;;  %s31_s16 = int_to_ptr.vmem [resolvable:$true] %s30_s16 }
   0x5   :  { %p745_p1 = scmp.lt.u32.totalorder %s741_s19, %s970_s1 }
   0x7   :  { %p747_p2 = pnand %p745_p1, %p742_p0 }
   0x9   :  { %750 = shalt.err (!%p747_p2)
}
   0xa   :  { %s751_s24 = scalar_lea.vmem %s31_s16, 4096  ;;  %p756_p4 = scmp.lt.s32.totalorder %s31_s16, %s31_s16 }
   0xb   :  { %p752_p3 = scmp.ne.s32.totalorder %s31_s16, %s751_s24  ;;  %p757_p5 = scmp.lt.s32.totalorder %s751_s24, %s751_s24 }
   0xd   :  { %p758_p6 = por %p757_p5, %p756_p4 }
   0xf   :  { %p759_p7 = pnand %p758_p6, %p752_p3 }
  0x11   :  { %762 = shalt.err (!%p759_p7)
}
  0x12   :  { %s860_s25 = smov 64   ;;  %s861_s26 = smov 4  }
  0x13   :  { %36 = dma.hbm_to_vmem [thread:$0]  %s970_s1, 4096, %s31_s16, [#allocation7], %s860_s25, %s860_s25, %s861_s26  }
  0x14   :  { %s862_s29 = smov [#allocation3]   ;;  %s763_s7 = scalar_lea.hbm %s969_s0, 1024 }
  0x15   :  { %s18_s30 = sshll.u32 %s862_s29, 4  ;;  %p764_p8 = scmp.ne.s32.totalorder %s969_s0, %s763_s7  ;;  %s19_s30 = int_to_ptr.vmem [resolvable:$true] %s18_s30 }
  0x16   :  { %p767_p9 = scmp.lt.u32.totalorder %s763_s7, %s969_s0 }
  0x18   :  { %p769_p10 = pnand %p767_p9, %p764_p8 }
  0x1a   :  { %772 = shalt.err (!%p769_p10)
}
  0x1b   :  { %s773_s12 = scalar_lea.vmem %s19_s30, 1024  ;;  %p778_p12 = scmp.lt.s32.totalorder %s19_s30, %s19_s30 }
  0x1c   :  { %p774_p11 = scmp.ne.s32.totalorder %s19_s30, %s773_s12  ;;  %p779_p13 = scmp.lt.s32.totalorder %s773_s12, %s773_s12 }
  0x1e   :  { %p780_p0 = por %p779_p13, %p778_p12 }
  0x20   :  { %p781_p1 = pnand %p780_p0, %p774_p11 }
  0x22   :  { %784 = shalt.err (!%p781_p1)
}
  0x23   :  { %s863_s1 = smov 256   ;;  %s864_s13 = smov 16  }
  0x24   :  { %24 = dma.hbm_to_vmem [thread:$0]  %s969_s0, 1024, %s19_s30, [#allocation4], %s863_s1, %s863_s1, %s864_s13  }
  0x25   :  { %s865_s16 = smov [#allocation8]   ;;  %s866_s18 = smov [#allocation9]  }
  0x26   :  { %s43_s17 = sshll.u32 %s865_s16, 4  ;;  %s52_s19 = sshll.u32 %s866_s18, 4  ;;  %s44_s17 = int_to_ptr.vmem [resolvable:$true] %s43_s17  ;;  %s920_s19 = int_to_ptr.vmem [resolvable:$true] %s52_s19 }
  0x27   :  { %s785_s22 = scalar_lea.hbm %s971_s2, 16 }
  0x28   :  { %p786_p2 = scmp.ne.s32.totalorder %s971_s2, %s785_s22  ;;  %p789_p3 = scmp.lt.u32.totalorder %s785_s22, %s971_s2 }
  0x2a   :  { %p791_p4 = pnand %p789_p3, %p786_p2 }
  0x2c   :  { %794 = shalt.err (!%p791_p4)
}
  0x2d   :  { %s795_s0 = scalar_lea.vmem %s44_s17, 16  ;;  %s799_s29 = scalar_lea.vmem %s44_s17, 32 }
  0x2e   :  { %p796_p5 = scmp.ne.s32.totalorder %s44_s17, %s795_s0  ;;  %p800_p6 = scmp.lt.s32.totalorder %s44_s17, %s44_s17 }
  0x2f   :  { %p801_p7 = scmp.lt.s32.totalorder %s799_s29, %s795_s0 }
  0x31   :  { %p802_p8 = por %p801_p7, %p800_p6 }
  0x33   :  { %p803_p9 = pnand %p802_p8, %p796_p5 }
  0x35   :  { %806 = shalt.err (!%p803_p9)
}
  0x36   :  { %46 = dma.hbm_to_vmem [thread:$0]  %s971_s2, 16, %s44_s17, [#allocation7]  }
  0x37   :  { %s807_s8 = scalar_lea.hbm %s972_s3, 256 }
  0x38   :  { %p808_p10 = scmp.ne.s32.totalorder %s972_s3, %s807_s8  ;;  %p811_p11 = scmp.lt.u32.totalorder %s807_s8, %s972_s3 }
  0x3a   :  { %p813_p12 = pnand %p811_p11, %p808_p10 }
  0x3c   :  { %816 = shalt.err (!%p813_p12)
}
  0x3d   :  { %s817_s1 = scalar_lea.vmem %s920_s19, 256  ;;  %p822_p0 = scmp.lt.s32.totalorder %s920_s19, %s920_s19 }
  0x3e   :  { %p818_p13 = scmp.ne.s32.totalorder %s920_s19, %s817_s1  ;;  %p823_p1 = scmp.lt.s32.totalorder %s817_s1, %s817_s1 }
  0x40   :  { %p824_p2 = por %p823_p1, %p822_p0 }
  0x42   :  { %p825_p3 = pnand %p824_p2, %p818_p13 }
  0x44   :  { %828 = shalt.err (!%p825_p3)
}
  0x45   :  { %58 = dma.hbm_to_vmem [thread:$0]  %s972_s3, 256, %s920_s19, [#allocation10], %s860_s25, %s860_s25, %s861_s26  }
  0x46   :  { %851 = dma.done.wait [#allocation4], 1024  }
  0x47   :  { %852 = vsyncadd [#allocation4], 4294966272 }
  0x48   :  { %853 = dma.done.wait [#allocation7], 4112  }
  0x49   :  { %854 = vsyncadd [#allocation7], 4294963184 }
  0x4a   :  { %855 = dma.done.wait [#allocation10], 256  }
  0x4b   :  { %856 = vsyncadd [#allocation10], 4294967040  ;;  %v697_v0 = vld [vmem:[#allocation6 + $0x40] sm:$0xff]   ;;  %v701_v4 = vld [vmem:[#allocation6 + $0x48] sm:$0xff]   ;;  %s867_s3 = smov [#allocation11]  }
  0x4c   :  { %v698_v1 = vld [vmem:[#allocation6 + $0xc0] sm:$0xff]   ;;  %632 = vmatprep.subr.bf16.mxu0 %v697_v0  ;;  %v702_v5 = vld [vmem:[#allocation6 + $0xc8] sm:$0xff]   ;;  %v705_v8 = vld [vmem:[#allocation6 + $0x50] sm:$0xff]   ;;  %s549_s14 = sshll.u32 %s867_s3, 4  ;;  %s550_s14 = int_to_ptr.vmem [resolvable:$true] %s549_s14 }
  0x4d   :  { %v699_v2 = vld [vmem:[#allocation6] sm:$0xff]   ;;  %660 = vmatprep.subr.bf16.mxu1 %v698_v1  ;;  %v703_v6 = vld [vmem:[#allocation6 + $0x8] sm:$0xff]   ;;  %v706_v9 = vld [vmem:[#allocation6 + $0xd0] sm:$0xff]   ;;  %s829_s15 = scalar_lea.vmem %s550_s14, 256  ;;  %p834_p5 = scmp.lt.s32.totalorder %s550_s14, %s550_s14 }
  0x4e   :  { %v700_v3 = vld [vmem:[#allocation6 + $0x80] sm:$0xff]   ;;  %633 = vmatpush3.bf16.msra.mxu0 %v699_v2  ;;  %v704_v7 = vld [vmem:[#allocation6 + $0x88] sm:$0xff]   ;;  %v707_v10 = vld [vmem:[#allocation6 + $0x10] sm:$0xff]   ;;  %p830_p4 = scmp.ne.s32.totalorder %s550_s14, %s829_s15  ;;  %p835_p6 = scmp.lt.s32.totalorder %s829_s15, %s829_s15 }
  0x4f   :  { %661 = vmatpush3.bf16.msra.mxu1 %v700_v3  ;;  %634 = vmatprep.subr.bf16.mxu0 %v701_v4  ;;  %v708_v11 = vld [vmem:[#allocation6 + $0x90] sm:$0xff]   ;;  %v709_v12 = vld [vmem:[#allocation6 + $0x58] sm:$0xff]   ;;  %v713_v16 = vld [vmem:[#allocation6 + $0x60] sm:$0xff]  }
  0x50   :  { %662 = vmatprep.subr.bf16.mxu1 %v702_v5  ;;  %v710_v13 = vld [vmem:[#allocation6 + $0xd8] sm:$0xff]   ;;  %v714_v17 = vld [vmem:[#allocation6 + $0xe0] sm:$0xff]   ;;  %v717_v20 = vld [vmem:[#allocation6 + $0x68] sm:$0xff]   ;;  %p836_p7 = por %p835_p6, %p834_p5 }
  0x51   :  { %v711_v14 = vld [vmem:[#allocation6 + $0x18] sm:$0xff]   ;;  %v715_v18 = vld [vmem:[#allocation6 + $0x20] sm:$0xff]   ;;  %v718_v21 = vld [vmem:[#allocation6 + $0xe8] sm:$0xff]  }
  0x52   :  { %635 = vmatpush3.bf16.msra.mxu0 %v703_v6  ;;  %v712_v15 = vld [vmem:[#allocation6 + $0x98] sm:$0xff]   ;;  %v716_v19 = vld [vmem:[#allocation6 + $0xa0] sm:$0xff]   ;;  %v719_v22 = vld [vmem:[#allocation6 + $0x28] sm:$0xff]   ;;  %p837_p8 = pnand %p836_p7, %p830_p4 }
  0x53   :  { %663 = vmatpush3.bf16.msra.mxu1 %v704_v7  ;;  %636 = vmatprep.subr.bf16.mxu0 %v705_v8  ;;  %v720_v23 = vld [vmem:[#allocation6 + $0xa8] sm:$0xff]   ;;  %v721_v24 = vld [vmem:[#allocation6 + $0x70] sm:$0xff]   ;;  %v725_v28 = vld [vmem:[#allocation6 + $0x78] sm:$0xff]  }
  0x54   :  { %664 = vmatprep.subr.bf16.mxu1 %v706_v9  ;;  %v722_v25 = vld [vmem:[#allocation6 + $0xf0] sm:$0xff]   ;;  %v726_v29 = vld [vmem:[#allocation6 + $0xf8] sm:$0xff]   ;;  %v603_v49 = vld [vmem:[#allocation8] ss:$0 sm:$0xff] }
  0x55   :  { %v723_v26 = vld [vmem:[#allocation6 + $0x30] sm:$0xff]   ;;  %v727_v30 = vld [vmem:[#allocation6 + $0x38] sm:$0xff]   ;;  %v613_v50 = vld [vmem:[#allocation9] sm:$0xff]  }
  0x56   :  { %637 = vmatpush3.bf16.msra.mxu0 %v707_v10  ;;  %v724_v27 = vld [vmem:[#allocation6 + $0xb0] sm:$0xff]   ;;  %v728_v31 = vld [vmem:[#allocation6 + $0xb8] sm:$0xff]   ;;  %v614_v56 = vunpack.c.l.bf16 %v613_v50  ;;  %v615_v58 = vunpack.c.h.bf16 %v613_v50 }
  0x57   :  { %665 = vmatpush3.bf16.msra.mxu1 %v708_v11  ;;  %638 = vmatprep.subr.bf16.mxu0 %v709_v12  ;;  %v729_v32 = vld [vmem:[#allocation3] ss:$16 sps:$4 sm:$0xff]   ;;  %v731_v33 = vld [vmem:[#allocation3 + $0x4] ss:$16 sps:$4 sm:$0xff]   ;;  %v732_v34 = vld [vmem:[#allocation3 + $0x8] ss:$16 sps:$4 sm:$0xff]  }
  0x58   :  { %666 = vmatprep.subr.bf16.mxu1 %v710_v13  ;;  %v734_v35 = vld [vmem:[#allocation3 + $0xc] ss:$16 sps:$4 sm:$0xff]   ;;  %420 = vmatprep.mubr.bf16.mxu0 %v731_v33  ;;  %v735_v36 = vld [vmem:[#allocation3 + $0x24] ss:$16 sps:$4 sm:$0xff]   ;;  %v739_v38 = vld [vmem:[#allocation3 + $0x20] ss:$16 sps:$4 sm:$0xff]  }
  0x59   :  { %469 = vmatprep.mubr.bf16.mxu1 %v734_v35  ;;  %v737_v37 = vld [vmem:[#allocation3 + $0x2c] ss:$16 sps:$4 sm:$0xff]   ;;  %v740_v39 = vld [vmem:[#allocation3 + $0x28] ss:$16 sps:$4 sm:$0xff]  }
  0x5a   :  { %639 = vmatpush3.bf16.msra.mxu0 %v711_v14  ;;  %v630_v7 = vld [vmem:[#allocation9 + $0x8] sm:$0xff]  }
  0x5b   :  { %667 = vmatpush3.bf16.msra.mxu1 %v712_v15  ;;  %640 = vmatprep.subr.bf16.mxu0 %v713_v16  ;;  %v618_v14 = vunpack.c.l.bf16 %v630_v7  ;;  %v619_v16 = vunpack.c.h.bf16 %v630_v7 }
  0x5c   :  { %668 = vmatprep.subr.bf16.mxu1 %v714_v17 }
  0x5e   :  { %641 = vmatpush3.bf16.msra.mxu0 %v715_v18 }
  0x5f   :  { %669 = vmatpush3.bf16.msra.mxu1 %v716_v19  ;;  %642 = vmatprep.subr.bf16.mxu0 %v717_v20 }
  0x60   :  { %670 = vmatprep.subr.bf16.mxu1 %v718_v21 }
  0x62   :  { %643 = vmatpush3.bf16.msra.mxu0 %v719_v22 }
  0x63   :  { %671 = vmatpush3.bf16.msra.mxu1 %v720_v23  ;;  %644 = vmatprep.subr.bf16.mxu0 %v721_v24 }
  0x64   :  { %672 = vmatprep.subr.bf16.mxu1 %v722_v25 }
  0x66   :  { %645 = vmatpush3.bf16.msra.mxu0 %v723_v26 }
  0x67   :  { %673 = vmatpush3.bf16.msra.mxu1 %v724_v27  ;;  %646 = vmatprep.subr.bf16.mxu0 %v725_v28 }
  0x68   :  { %674 = vmatprep.subr.bf16.mxu1 %v726_v29 }
  0x6a   :  { %647 = vmatpush3.bf16.msra.mxu0 %v727_v30 }
  0x6b   :  { %675 = vmatpush3.bf16.msra.mxu1 %v728_v31 }
  0x6d   :  { %421 = vmatmul.mubr.bf16.vlgmr.msra.gmra.mrb[0].mxu0 %v729_v32 }
  0x6e   :  { %470 = vmatmul.mubr.bf16.vlgmr.msra.gmra.mrb[0].mxu1 %v732_v34  ;;  %428 = vmatprep.mubr.bf16.mxu0 %v735_v36 }
  0x6f   :  { %477 = vmatprep.mubr.bf16.mxu1 %v737_v37 }
  0x75   :  { %429 = vmatmul.mubr.bf16.gmra.mrb[4].mxu0 %v739_v38 }
  0x76   :  { %478 = vmatmul.mubr.bf16.gmra.mrb[4].mxu1 %v740_v39 }
 0x140   :  { %v648_v40 = vpop.f32.mrb[0].mxu0 }
 0x141   :  { %v676_v41 = vpop.f32.mrb[0].mxu1  ;;  %v649_v42 = vpop.f32.mrb[1].mxu0 }
 0x142   :  { %v650_v43 = vadd.f32 %v649_v42, %v648_v40  ;;  %v677_v44 = vpop.f32.mrb[1].mxu1  ;;  %v651_v45 = vpop.f32.mrb[2].mxu0 }
 0x143   :  { %v678_v46 = vadd.f32 %v677_v44, %v676_v41  ;;  %v679_v47 = vpop.f32.mrb[2].mxu1  ;;  %v652_v48 = vpop.f32.mrb[3].mxu0 }
 0x144   :  { %v653_v51 = vadd.f32 %v652_v48, %v651_v45  ;;  %v680_v52 = vpop.f32.mrb[3].mxu1 }
 0x145   :  { %v472_v53 = vadd.f32 %v678_v46, %v650_v43  ;;  %v681_v54 = vadd.f32 %v680_v52, %v679_v47 }
 0x147   :  { %v508_v55 = vadd.f32 %v603_v49, %v472_v53  ;;  %v475_v57 = vadd.f32 %v681_v54, %v653_v51 }
 0x148   :  { %v654_v59 = vpop.f32.mrb[4].mxu0 }
 0x149   :  { %v509_v60 = vadd.f32 %v603_v49, %v475_v57  ;;  %v682_v61 = vpop.f32.mrb[4].mxu1  ;;  %v655_v62 = vpop.f32.mrb[5].mxu0  ;;  %v520_v2 = vadd.f32 %v614_v56, %v508_v55 }
 0x14a   :  { %v656_v63 = vadd.f32 %v655_v62, %v654_v59  ;;  %v683_v0 = vpop.f32.mrb[5].mxu1  ;;  %v657_v1 = vpop.f32.mrb[6].mxu0 }
 0x14b   :  { %v521_v3 = vadd.f32 %v615_v58, %v509_v60  ;;  %v684_v4 = vadd.f32 %v683_v0, %v682_v61  ;;  %v685_v5 = vpop.f32.mrb[6].mxu1  ;;  %v658_v6 = vpop.f32.mrb[7].mxu0 }
 0x14c   :  { %v659_v8 = vadd.f32 %v658_v6, %v657_v1  ;;  %v686_v9 = vpop.f32.mrb[7].mxu1 }
 0x14d   :  { %v480_v10 = vadd.f32 %v684_v4, %v656_v63  ;;  %v687_v11 = vadd.f32 %v686_v9, %v685_v5  ;;  %v623_v12 = vpack.c.bf16 %v521_v3, %v520_v2 }
 0x14f   :  { %v510_v13 = vadd.f32 %v603_v49, %v480_v10  ;;  %v483_v15 = vadd.f32 %v687_v11, %v659_v8  ;;  %624 = vst [vmem:[#allocation11] sm:$0xff] %v623_v12  }
 0x151   :  { %v511_v17 = vadd.f32 %v603_v49, %v483_v15  ;;  %v522_v18 = vadd.f32 %v618_v14, %v510_v13 }
 0x153   :  { %v523_v19 = vadd.f32 %v619_v16, %v511_v17 }
 0x155   :  { %v628_v20 = vpack.c.bf16 %v523_v19, %v522_v18 }
 0x157   :  { %631 = vst [vmem:[#allocation11 + $0x8] sm:$0xff] %v628_v20  }
 0x158   :  { %840 = shalt.err (!%p837_p8)
}
 0x159   :  { %s841_s18 = scalar_lea.hbm %s973_s4, 256 }
 0x15a   :  { %p842_p9 = scmp.ne.s32.totalorder %s973_s4, %s841_s18  ;;  %p845_p10 = scmp.lt.u32.totalorder %s841_s18, %s973_s4 }
 0x15c   :  { %p847_p11 = pnand %p845_p10, %p842_p9 }
 0x15e   :  { %850 = shalt.err (!%p847_p11)
}
 0x15f   :  { %555 = dma.vmem_to_hbm [thread:$0]  %s550_s14, 256, %s973_s4, [#allocation5], %s860_s25, %s860_s25, %s861_s26  }
 0x160   :  { %857 = dma.done.wait [#allocation5], 256  }
 0x161   :  { %858 = vsyncadd [#allocation5], 4294967040 }
 0x162   :  { %559 = vsyncpa [#allocation4], 1 }
 0x163   :  { %560 = vsyncpa [#allocation7], 1 }
 0x164   :  { %561 = vsyncpa [#allocation10], 1 }
 0x165   :  { %562 = vsyncpa [#allocation5], 1 }

// kernel: gpt1d_forward.21
= control target key start
LH: loop header
LB: loop body
LE: loop exit
PB: predicated region body
PF: predicated region fallthrough
CT: control target
= control target key end

     0   :  { %9 = vsyncpa [#allocation4], 0  ;;  %s913_s0 = inlined_call_operand.hbm [shape: bf16[32,128], index: 0, kind: input, shape index: {}]   ;;  %s914_s1 = inlined_call_operand.hbm [shape: bf16[128,512], index: 1, kind: input, shape index: {}]   ;;  %s915_s2 = inlined_call_operand.hbm [shape: f32[1,128], index: 2, kind: input, shape index: {}]   ;;  %s916_s3 = inlined_call_operand.hbm [shape: f32[1,128], index: 3, kind: input, shape index: {}]   ;;  %s917_s4 = inlined_call_operand.hbm [shape: f32[32,512], index: 4, kind: output, shape index: {}]  }
   0x1   :  { %10 = vsyncpa [#allocation7], 0 }
   0x2   :  { %11 = vsyncpa [#allocation10], 0 }
   0x3   :  { %12 = vsyncpa [#allocation5], 0  ;;  %s796_s15 = smov [#allocation6]   ;;  %s678_s19 = scalar_lea.hbm %s914_s1, 4096 }
   0x4   :  { %s30_s16 = sshll.u32 %s796_s15, 4  ;;  %p679_p0 = scmp.ne.s32.totalorder %s914_s1, %s678_s19  ;;  %s31_s16 = int_to_ptr.vmem [resolvable:$true] %s30_s16 }
   0x5   :  { %p682_p1 = scmp.lt.u32.totalorder %s678_s19, %s914_s1 }
   0x7   :  { %p684_p2 = pnand %p682_p1, %p679_p0 }
   0x9   :  { %687 = shalt.err (!%p684_p2)
}
   0xa   :  { %s688_s24 = scalar_lea.vmem %s31_s16, 4096  ;;  %p693_p4 = scmp.lt.s32.totalorder %s31_s16, %s31_s16 }
   0xb   :  { %p689_p3 = scmp.ne.s32.totalorder %s31_s16, %s688_s24  ;;  %p694_p5 = scmp.lt.s32.totalorder %s688_s24, %s688_s24 }
   0xd   :  { %p695_p6 = por %p694_p5, %p693_p4 }
   0xf   :  { %p696_p7 = pnand %p695_p6, %p689_p3 }
  0x11   :  { %699 = shalt.err (!%p696_p7)
}
  0x12   :  { %s797_s25 = smov 256   ;;  %s798_s26 = smov 16  }
  0x13   :  { %36 = dma.hbm_to_vmem [thread:$0]  %s914_s1, 4096, %s31_s16, [#allocation7], %s797_s25, %s797_s25, %s798_s26  }
  0x14   :  { %s799_s29 = smov [#allocation3]   ;;  %s700_s7 = scalar_lea.hbm %s913_s0, 256 }
  0x15   :  { %s18_s30 = sshll.u32 %s799_s29, 4  ;;  %p701_p8 = scmp.ne.s32.totalorder %s913_s0, %s700_s7  ;;  %s19_s30 = int_to_ptr.vmem [resolvable:$true] %s18_s30 }
  0x16   :  { %p704_p9 = scmp.lt.u32.totalorder %s700_s7, %s913_s0 }
  0x18   :  { %p706_p10 = pnand %p704_p9, %p701_p8 }
  0x1a   :  { %709 = shalt.err (!%p706_p10)
}
  0x1b   :  { %s710_s12 = scalar_lea.vmem %s19_s30, 256  ;;  %p715_p12 = scmp.lt.s32.totalorder %s19_s30, %s19_s30 }
  0x1c   :  { %p711_p11 = scmp.ne.s32.totalorder %s19_s30, %s710_s12  ;;  %p716_p13 = scmp.lt.s32.totalorder %s710_s12, %s710_s12 }
  0x1e   :  { %p717_p0 = por %p716_p13, %p715_p12 }
  0x20   :  { %p718_p1 = pnand %p717_p0, %p711_p11 }
  0x22   :  { %721 = shalt.err (!%p718_p1)
}
  0x23   :  { %s800_s1 = smov 64   ;;  %s801_s13 = smov 4  }
  0x24   :  { %24 = dma.hbm_to_vmem [thread:$0]  %s913_s0, 256, %s19_s30, [#allocation4], %s800_s1, %s800_s1, %s801_s13  }
  0x25   :  { %s802_s16 = smov [#allocation8]   ;;  %s803_s18 = smov [#allocation9]  }
  0x26   :  { %s43_s17 = sshll.u32 %s802_s16, 4  ;;  %s53_s19 = sshll.u32 %s803_s18, 4  ;;  %s44_s17 = int_to_ptr.vmem [resolvable:$true] %s43_s17  ;;  %s54_s19 = int_to_ptr.vmem [resolvable:$true] %s53_s19 }
  0x27   :  { %s722_s22 = scalar_lea.hbm %s915_s2, 16 }
  0x28   :  { %p723_p2 = scmp.ne.s32.totalorder %s915_s2, %s722_s22  ;;  %p726_p3 = scmp.lt.u32.totalorder %s722_s22, %s915_s2 }
  0x2a   :  { %p728_p4 = pnand %p726_p3, %p723_p2 }
  0x2c   :  { %731 = shalt.err (!%p728_p4)
}
  0x2d   :  { %s732_s0 = scalar_lea.vmem %s44_s17, 16  ;;  %s736_s27 = scalar_lea.vmem %s44_s17, 32 }
  0x2e   :  { %p733_p5 = scmp.ne.s32.totalorder %s44_s17, %s732_s0  ;;  %p737_p6 = scmp.lt.s32.totalorder %s44_s17, %s44_s17 }
  0x2f   :  { %p738_p7 = scmp.lt.s32.totalorder %s736_s27, %s732_s0 }
  0x31   :  { %p739_p8 = por %p738_p7, %p737_p6 }
  0x33   :  { %p740_p9 = pnand %p739_p8, %p733_p5 }
  0x35   :  { %743 = shalt.err (!%p740_p9)
}
  0x36   :  { %46 = dma.hbm_to_vmem [thread:$0]  %s915_s2, 16, %s44_s17, [#allocation7]  }
  0x37   :  { %s744_s6 = scalar_lea.hbm %s916_s3, 16 }
  0x38   :  { %p745_p10 = scmp.ne.s32.totalorder %s916_s3, %s744_s6  ;;  %p748_p11 = scmp.lt.u32.totalorder %s744_s6, %s916_s3 }
  0x3a   :  { %p750_p12 = pnand %p748_p11, %p745_p10 }
  0x3c   :  { %753 = shalt.err (!%p750_p12)
}
  0x3d   :  { %s754_s11 = scalar_lea.vmem %s54_s19, 16  ;;  %s758_s12 = scalar_lea.vmem %s54_s19, 32 }
  0x3e   :  { %p755_p13 = scmp.ne.s32.totalorder %s54_s19, %s754_s11  ;;  %p759_p0 = scmp.lt.s32.totalorder %s54_s19, %s54_s19 }
  0x3f   :  { %p760_p1 = scmp.lt.s32.totalorder %s758_s12, %s754_s11 }
  0x41   :  { %p761_p2 = por %p760_p1, %p759_p0 }
  0x43   :  { %p762_p3 = pnand %p761_p2, %p755_p13 }
  0x45   :  { %765 = shalt.err (!%p762_p3)
}
  0x46   :  { %56 = dma.hbm_to_vmem [thread:$0]  %s916_s3, 16, %s54_s19, [#allocation10]  }
  0x47   :  { %788 = dma.done.wait [#allocation4], 256  }
  0x48   :  { %789 = vsyncadd [#allocation4], 4294967040 }
  0x49   :  { %790 = dma.done.wait [#allocation7], 4112  }
  0x4a   :  { %791 = vsyncadd [#allocation7], 4294963184 }
  0x4b   :  { %792 = dma.done.wait [#allocation10], 16  }
  0x4c   :  { %793 = vsyncadd [#allocation10], 4294967280  ;;  %v602_v0 = vld [vmem:[#allocation3] sm:$0xff]   ;;  %v609_v1 = vld [vmem:[#allocation3 + $0x8] sm:$0xff]   ;;  %v804_v52 = vmov 0   ;;  %s805_s3 = smov [#allocation11]  }
  0x4d   :  { %v603_v2 = vunpack.c.l.bf16 %v602_v0  ;;  %v607_v3 = vunpack.c.l.bf16 %v609_v1  ;;  %v604_v4 = vunpack.c.h.bf16 %v602_v0  ;;  %v608_v5 = vunpack.c.h.bf16 %v609_v1  ;;  %v622_v6 = vld [vmem:[#allocation6 + $0x4] ss:$16 sps:$4 sm:$0xff]   ;;  %v624_v7 = vld [vmem:[#allocation6 + $0xc] ss:$16 sps:$4 sm:$0xff]   ;;  %v626_v8 = vld [vmem:[#allocation6] ss:$16 sps:$4 sm:$0xff]   ;;  %407 = vmatprep.mubr.bf16.mxu0 %v804_v52  ;;  %460 = vmatprep.mubr.bf16.mxu1 %v804_v52 }
  0x4e   :  { %v627_v9 = vld [vmem:[#allocation6 + $0x8] ss:$16 sps:$4 sm:$0xff]   ;;  %v628_v10 = vld [vmem:[#allocation6 + $0x24] ss:$16 sps:$4 sm:$0xff]   ;;  %v630_v11 = vld [vmem:[#allocation6 + $0x2c] ss:$16 sps:$4 sm:$0xff]   ;;  %375 = vmatprep.subr.bf16.mxu0 %v622_v6  ;;  %428 = vmatprep.subr.bf16.mxu1 %v624_v7 }
  0x4f   :  { %98 = vadd.xlane.f32.xlu0 %v603_v2  ;;  %102 = vadd.xlane.f32.xlu1 %v607_v3  ;;  %v632_v28 = vld [vmem:[#allocation6 + $0x20] ss:$16 sps:$4 sm:$0xff]   ;;  %v633_v29 = vld [vmem:[#allocation6 + $0x28] ss:$16 sps:$4 sm:$0xff]   ;;  %v634_v30 = vld [vmem:[#allocation6 + $0x44] ss:$16 sps:$4 sm:$0xff]  }
  0x50   :  { %376 = vmatpush1.bf16.msra.mxu0 %v626_v8  ;;  %429 = vmatpush1.bf16.msra.mxu1 %v627_v9  ;;  %v636_v31 = vld [vmem:[#allocation6 + $0x4c] ss:$16 sps:$4 sm:$0xff]   ;;  %v638_v32 = vld [vmem:[#allocation6 + $0x40] ss:$16 sps:$4 sm:$0xff]   ;;  %v639_v33 = vld [vmem:[#allocation6 + $0x48] ss:$16 sps:$4 sm:$0xff]  }
  0x51   :  { %377 = vmatprep.subr.bf16.mxu0 %v628_v10  ;;  %430 = vmatprep.subr.bf16.mxu1 %v630_v11  ;;  %v640_v34 = vld [vmem:[#allocation6 + $0x64] ss:$16 sps:$4 sm:$0xff]   ;;  %v642_v35 = vld [vmem:[#allocation6 + $0x6c] ss:$16 sps:$4 sm:$0xff]   ;;  %v644_v36 = vld [vmem:[#allocation6 + $0x60] ss:$16 sps:$4 sm:$0xff]  }
  0x52   :  { %v645_v37 = vld [vmem:[#allocation6 + $0x68] ss:$16 sps:$4 sm:$0xff]   ;;  %v646_v38 = vld [vmem:[#allocation6 + $0x84] ss:$16 sps:$4 sm:$0xff]   ;;  %v648_v39 = vld [vmem:[#allocation6 + $0x8c] ss:$16 sps:$4 sm:$0xff]  }
  0x53   :  { %100 = vadd.xlane.f32.xlu0 %v604_v4  ;;  %104 = vadd.xlane.f32.xlu1 %v608_v5  ;;  %v650_v40 = vld [vmem:[#allocation6 + $0x80] ss:$16 sps:$4 sm:$0xff]   ;;  %v651_v41 = vld [vmem:[#allocation6 + $0x88] ss:$16 sps:$4 sm:$0xff]   ;;  %v652_v42 = vld [vmem:[#allocation6 + $0xa4] ss:$16 sps:$4 sm:$0xff]  }
  0x54   :  { %378 = vmatpush1.bf16.msra.mxu0 %v632_v28  ;;  %431 = vmatpush1.bf16.msra.mxu1 %v633_v29  ;;  %v654_v43 = vld [vmem:[#allocation6 + $0xac] ss:$16 sps:$4 sm:$0xff]   ;;  %v656_v44 = vld [vmem:[#allocation6 + $0xa0] ss:$16 sps:$4 sm:$0xff]   ;;  %v657_v45 = vld [vmem:[#allocation6 + $0xa8] ss:$16 sps:$4 sm:$0xff]  }
  0x55   :  { %379 = vmatprep.subr.bf16.mxu0 %v634_v30  ;;  %432 = vmatprep.subr.bf16.mxu1 %v636_v31  ;;  %v658_v46 = vld [vmem:[#allocation6 + $0xc4] ss:$16 sps:$4 sm:$0xff]   ;;  %v660_v47 = vld [vmem:[#allocation6 + $0xcc] ss:$16 sps:$4 sm:$0xff]   ;;  %v662_v48 = vld [vmem:[#allocation6 + $0xc0] ss:$16 sps:$4 sm:$0xff]  }
  0x56   :  { %v663_v49 = vld [vmem:[#allocation6 + $0xc8] ss:$16 sps:$4 sm:$0xff]   ;;  %v664_v50 = vld [vmem:[#allocation6 + $0xe4] ss:$16 sps:$4 sm:$0xff]   ;;  %v666_v51 = vld [vmem:[#allocation6 + $0xec] ss:$16 sps:$4 sm:$0xff]  }
  0x57   :  { %v668_v53 = vld [vmem:[#allocation6 + $0xe0] ss:$16 sps:$4 sm:$0xff]   ;;  %v669_v54 = vld [vmem:[#allocation6 + $0xe8] ss:$16 sps:$4 sm:$0xff]   ;;  %s553_s13 = sshll.u32 %s805_s3, 4  ;;  %s554_s13 = int_to_ptr.vmem [resolvable:$true] %s553_s13 }
  0x58   :  { %380 = vmatpush1.bf16.msra.mxu0 %v638_v32  ;;  %433 = vmatpush1.bf16.msra.mxu1 %v639_v33  ;;  %v568_v10 = vld [vmem:[#allocation9] ss:$0 sm:$0xff]  ;;  %s766_s14 = scalar_lea.vmem %s554_s13, 2048  ;;  %p771_p5 = scmp.lt.s32.totalorder %s554_s13, %s554_s13 }
  0x59   :  { %381 = vmatprep.subr.bf16.mxu0 %v640_v34  ;;  %434 = vmatprep.subr.bf16.mxu1 %v642_v35  ;;  %p767_p4 = scmp.ne.s32.totalorder %s554_s13, %s766_s14  ;;  %p772_p6 = scmp.lt.s32.totalorder %s766_s14, %s766_s14 }
  0x5b   :  { %p773_p7 = por %p772_p6, %p771_p5 }
  0x5c   :  { %382 = vmatpush1.bf16.msra.mxu0 %v644_v36  ;;  %435 = vmatpush1.bf16.msra.mxu1 %v645_v37 }
  0x5d   :  { %383 = vmatprep.subr.bf16.mxu0 %v646_v38  ;;  %436 = vmatprep.subr.bf16.mxu1 %v648_v39  ;;  %p774_p8 = pnand %p773_p7, %p767_p4 }
  0x60   :  { %384 = vmatpush1.bf16.msra.mxu0 %v650_v40  ;;  %437 = vmatpush1.bf16.msra.mxu1 %v651_v41 }
  0x61   :  { %385 = vmatprep.subr.bf16.mxu0 %v652_v42  ;;  %438 = vmatprep.subr.bf16.mxu1 %v654_v43 }
  0x64   :  { %386 = vmatpush1.bf16.msra.mxu0 %v656_v44  ;;  %439 = vmatpush1.bf16.msra.mxu1 %v657_v45 }
  0x65   :  { %387 = vmatprep.subr.bf16.mxu0 %v658_v46  ;;  %440 = vmatprep.subr.bf16.mxu1 %v660_v47 }
  0x68   :  { %388 = vmatpush1.bf16.msra.mxu0 %v662_v48  ;;  %441 = vmatpush1.bf16.msra.mxu1 %v663_v49 }
  0x69   :  { %389 = vmatprep.subr.bf16.mxu0 %v664_v50  ;;  %442 = vmatprep.subr.bf16.mxu1 %v666_v51 }
  0x6c   :  { %390 = vmatpush1.bf16.msra.mxu0 %v668_v53  ;;  %443 = vmatpush1.bf16.msra.mxu1 %v669_v54 }
  0xdc   :  { %v99_v12 = vpop.xlane.xlu0 %98  ;;  %v103_v13 = vpop.xlane.xlu1 %102 }
  0xdd   :  { %v107_v14 = vmul.f32 0.0078125, %v99_v12  ;;  %v109_v15 = vmul.f32 0.0078125, %v103_v13 }
  0xdf   :  { %v881_v16 = vsub.f32 %v603_v2, %v107_v14  ;;  %v883_v17 = vsub.f32 %v607_v3, %v109_v15 }
  0xe0   :  { %v101_v18 = vpop.xlane.xlu0 %100  ;;  %v105_v19 = vpop.xlane.xlu1 %104 }
  0xe1   :  { %v108_v20 = vmul.f32 0.0078125, %v101_v18  ;;  %v115_v21 = vmul.f32 %v881_v16, %v881_v16  ;;  %v110_v22 = vmul.f32 0.0078125, %v105_v19  ;;  %v117_v25 = vmul.f32 %v883_v17, %v883_v17 }
  0xe3   :  { %v887_v23 = vsub.f32 %v604_v4, %v108_v20  ;;  %119 = vadd.xlane.f32.xlu0 %v115_v21  ;;  %v889_v24 = vsub.f32 %v608_v5, %v110_v22  ;;  %v567_v5 = vld [vmem:[#allocation8] ss:$0 sm:$0xff] }
  0xe5   :  { %v116_v26 = vmul.f32 %v887_v23, %v887_v23  ;;  %v118_v27 = vmul.f32 %v889_v24, %v889_v24 }
  0xe7   :  { %123 = vadd.xlane.f32.xlu0 %v117_v25  ;;  %121 = vadd.xlane.f32.xlu1 %v116_v26 }
  0xeb   :  { %125 = vadd.xlane.f32.xlu1 %v118_v27 }
 0x170   :  { %v120_v55 = vpop.xlane.xlu0 %119 }
 0x171   :  { %v127_v56 = vmul.f32 0.0078125, %v120_v55 }
 0x173   :  { %v131_v57 = vadd.f32 1e-05, %v127_v56 }
 0x174   :  { %v122_v58 = vpop.xlane.xlu1 %121  ;;  %v124_v59 = vpop.xlane.xlu0 %123 }
 0x175   :  { %670 = vrsqrt.f32 %v131_v57  ;;  %v128_v60 = vmul.f32 0.0078125, %v122_v58  ;;  %v129_v61 = vmul.f32 0.0078125, %v124_v59 }
 0x177   :  { %v132_v62 = vadd.f32 1e-05, %v128_v60  ;;  %v133_v63 = vadd.f32 1e-05, %v129_v61 }
 0x178   :  { %v126_v0 = vpop.xlane.xlu1 %125 }
 0x179   :  { %672 = vrsqrt.f32 %v132_v62  ;;  %v130_v1 = vmul.f32 0.0078125, %v126_v0 }
 0x17a   :  { %674 = vrsqrt.f32 %v133_v63 }
 0x17b   :  { %v134_v2 = vadd.f32 1e-05, %v130_v1 }
 0x17d   :  { %676 = vrsqrt.f32 %v134_v2 }
 0x17f   :  { %v671_v3 = vpop.eup %670 }
 0x180   :  { %v139_v4 = vmul.f32 %v671_v3, %v881_v16 }
 0x182   :  { %v150_v8 = vmul.f32 %v567_v5, %v139_v4 }
 0x183   :  { %v673_v6 = vpop.eup %672 }
 0x184   :  { %v140_v7 = vmul.f32 %v673_v6, %v887_v23  ;;  %v675_v9 = vpop.eup %674  ;;  %v161_v13 = vadd.f32 %v568_v10, %v150_v8 }
 0x185   :  { %v141_v15 = vmul.f32 %v675_v9, %v883_v17 }
 0x186   :  { %v151_v11 = vmul.f32 %v567_v5, %v140_v7 }
 0x187   :  { %v677_v12 = vpop.eup %676  ;;  %v152_v16 = vmul.f32 %v567_v5, %v141_v15 }
 0x188   :  { %v162_v14 = vadd.f32 %v568_v10, %v151_v11  ;;  %v142_v18 = vmul.f32 %v677_v12, %v889_v24 }
 0x189   :  { %v163_v22 = vadd.f32 %v568_v10, %v152_v16 }
 0x18a   :  { %v165_v19 = vpack.c.bf16 %v162_v14, %v161_v13  ;;  %v153_v20 = vmul.f32 %v567_v5, %v142_v18 }
 0x18c   :  { %408 = vmatmul.mubr.bf16.vlgmr.msra.gmra.mrb[0].mxu0 %v165_v19  ;;  %461 = vmatmul.mubr.bf16.vlgmr.msra.gmra.mrb[0].mxu1 %v165_v19  ;;  %v164_v21 = vadd.f32 %v568_v10, %v153_v20 }
 0x18d   :  { %417 = vmatprep.mubr.bf16.mxu0 %v804_v52  ;;  %470 = vmatprep.mubr.bf16.mxu1 %v804_v52 }
 0x18e   :  { %v166_v23 = vpack.c.bf16 %v164_v21, %v163_v22 }
 0x194   :  { %418 = vmatmul.mubr.bf16.gmra.mrb[4].mxu0 %v166_v23  ;;  %471 = vmatmul.mubr.bf16.gmra.mrb[4].mxu1 %v166_v23 }
 0x25f   :  { %v409_v25 = vpop.f32.mrb[0].mxu0  ;;  %v462_v26 = vpop.f32.mrb[0].mxu1 }
 0x260   :  { %532 = vst [vmem:[#allocation11] sm:$0xff] %v409_v25  ;;  %534 = vst [vmem:[#allocation11 + $0x10] sm:$0xff] %v462_v26  ;;  %v411_v27 = vpop.f32.mrb[1].mxu0  ;;  %v464_v17 = vpop.f32.mrb[1].mxu1 }
 0x261   :  { %533 = vst [vmem:[#allocation11 + $0x8] sm:$0xff] %v411_v27  ;;  %535 = vst [vmem:[#allocation11 + $0x18] sm:$0xff] %v464_v17  ;;  %v413_v24 = vpop.f32.mrb[2].mxu0  ;;  %v466_v28 = vpop.f32.mrb[2].mxu1 }
 0x262   :  { %536 = vst [vmem:[#allocation11 + $0x20] sm:$0xff] %v413_v24  ;;  %538 = vst [vmem:[#allocation11 + $0x30] sm:$0xff] %v466_v28  ;;  %v415_v29 = vpop.f32.mrb[3].mxu0  ;;  %v468_v30 = vpop.f32.mrb[3].mxu1 }
 0x263   :  { %537 = vst [vmem:[#allocation11 + $0x28] sm:$0xff] %v415_v29  ;;  %539 = vst [vmem:[#allocation11 + $0x38] sm:$0xff] %v468_v30 }
 0x267   :  { %v419_v31 = vpop.f32.mrb[4].mxu0  ;;  %v472_v32 = vpop.f32.mrb[4].mxu1 }
 0x268   :  { %540 = vst [vmem:[#allocation11 + $0x40] sm:$0xff] %v419_v31  ;;  %542 = vst [vmem:[#allocation11 + $0x50] sm:$0xff] %v472_v32  ;;  %v421_v33 = vpop.f32.mrb[5].mxu0  ;;  %v474_v34 = vpop.f32.mrb[5].mxu1 }
 0x269   :  { %541 = vst [vmem:[#allocation11 + $0x48] sm:$0xff] %v421_v33  ;;  %543 = vst [vmem:[#allocation11 + $0x58] sm:$0xff] %v474_v34  ;;  %v423_v35 = vpop.f32.mrb[6].mxu0  ;;  %v476_v36 = vpop.f32.mrb[6].mxu1 }
 0x26a   :  { %544 = vst [vmem:[#allocation11 + $0x60] sm:$0xff] %v423_v35  ;;  %546 = vst [vmem:[#allocation11 + $0x70] sm:$0xff] %v476_v36  ;;  %v425_v37 = vpop.f32.mrb[7].mxu0  ;;  %v478_v38 = vpop.f32.mrb[7].mxu1 }
 0x26b   :  { %545 = vst [vmem:[#allocation11 + $0x68] sm:$0xff] %v425_v37  ;;  %547 = vst [vmem:[#allocation11 + $0x78] sm:$0xff] %v478_v38 }
 0x26c   :  { %777 = shalt.err (!%p774_p8)
}
 0x26d   :  { %s778_s17 = scalar_lea.hbm %s917_s4, 2048 }
 0x26e   :  { %p779_p9 = scmp.ne.s32.totalorder %s917_s4, %s778_s17  ;;  %p782_p10 = scmp.lt.u32.totalorder %s778_s17, %s917_s4 }
 0x270   :  { %p784_p11 = pnand %p782_p10, %p779_p9 }
 0x272   :  { %787 = shalt.err (!%p784_p11)
}
 0x273   :  { %s806_s22 = smov 512   ;;  %s807_s23 = smov 32  }
 0x274   :  { %559 = dma.vmem_to_hbm [thread:$0]  %s554_s13, 2048, %s917_s4, [#allocation5], %s806_s22, %s806_s22, %s807_s23  }
 0x275   :  { %794 = dma.done.wait [#allocation5], 2048  }
 0x276   :  { %795 = vsyncadd [#allocation5], 4294965248 }
 0x277   :  { %563 = vsyncpa [#allocation4], 1 }
 0x278   :  { %564 = vsyncpa [#allocation7], 1 }
 0x279   :  { %565 = vsyncpa [#allocation10], 1 }
 0x27a   :  { %566 = vsyncpa [#allocation5], 1 }

</bundles_post_ra>
